<compile_context>
chip_gen: v5e
topology: v5e:2x2
jax: 0.10.0
libtpu: 0.0.40
codegen_flags: <defaults>
</compile_context>

<pallas_src>
import jax
import jax.numpy as jnp
from jax import lax
from jax.experimental import pallas as pl
from jax.experimental.pallas import tpu as pltpu

C1, C2 = 32, 64  # channel widths fixed by the module


# ----------------------------------------------------------------------------
# Fused encoder kernel (one grid step = TB batch images)
# ----------------------------------------------------------------------------
def _make_encoder_kernel(TB, OH2, OW2, latent_dim):
    M2 = OH2 * OW2
    M1 = 4 * M2

    def kernel(x1_ref, w1_ref, b1_ref, w2_ref, b2_ref, w3_ref, b3_ref,
               o_ref, h1s_ref, h2p_ref):
        f32 = jnp.float32
        bf16 = jnp.bfloat16

        # ----- layer 1: 4x4 s2 conv as one (TB*4*M2, 16) @ (16, C1) matmul -----
        x1 = x1_ref[...].reshape(TB * M1, 16)                       # bf16
        h1 = jnp.dot(x1, w1_ref[...], preferred_element_type=f32)
        h1 = jnp.maximum(h1 + b1_ref[...], 0.0).astype(bf16)        # (TB*M1, C1)
        h1 = h1.reshape(TB, 4, OH2, OW2, C1)

        # Zero only the 1-wide pad ring of the lane-folded scratch (lane-dense
        # stores); the parity scatter below overwrites the non-pad parts.
        h1s_ref[:, 0, :, :] = jnp.zeros((TB, OW2 + 1, 4 * C1), bf16)
        h1s_ref[:, OH2, :, :] = jnp.zeros((TB, OW2 + 1, 4 * C1), bf16)
        h1s_ref[:, :, 0, :] = jnp.zeros((TB, OH2 + 1, 4 * C1), bf16)
        h1s_ref[:, :, OW2, :] = jnp.zeros((TB, OH2 + 1, 4 * C1), bf16)

        # Scatter the 4 parity groups into the lane-folded, spatially padded
        # layout:  h1s[t, a, b, g*C1 + c] = h1_padded[t, 2a+p, 2b+q, c], g = 2p+q.
        for g in range(4):
            p, q = g // 2, g % 2
            h1s_ref[:, 1 - p:1 - p + OH2, 1 - q:1 - q + OW2,
                    g * C1:(g + 1) * C1] = h1[:, g]

        # ----- layer 2: 4x4 s2 conv; 4 lane-dense (128-wide) slices -> K = 512 -----
        pieces = [h1s_ref[:, di:di + OH2, dj:dj + OW2, :]
                  for di in range(2) for dj in range(2)]
        x2 = jnp.concatenate(pieces, axis=-1).reshape(TB * M2, 16 * C1)   # bf16
        h2 = jnp.dot(x2, w2_ref[...], preferred_element_type=f32)
        h2 = jnp.maximum(h2 + b2_ref[...], 0.0).astype(bf16)              # (TB*M2, C2)

        # ----- layer 3: 3x3 s1 conv over padded bf16 h2 -----
        h2p_ref[:, 0, :, :] = jnp.zeros((TB, OW2 + 2, C2), bf16)
        h2p_ref[:, OH2 + 1, :, :] = jnp.zeros((TB, OW2 + 2, C2), bf16)
        h2p_ref[:, :, 0, :] = jnp.zeros((TB, OH2 + 2, C2), bf16)
        h2p_ref[:, :, OW2 + 1, :] = jnp.zeros((TB, OH2 + 2, C2), bf16)
        h2p_ref[:, 1:1 + OH2, 1:1 + OW2, :] = h2.reshape(TB, OH2, OW2, C2)

        pieces3 = [h2p_ref[:, i:i + OH2, j:j + OW2, :]
                   for i in range(3) for j in range(3)]
        x3 = jnp.concatenate(pieces3, axis=-1).reshape(TB * M2, 9 * C2)   # bf16
        h3 = jnp.dot(x3, w3_ref[...], preferred_element_type=f32)
        o_ref[...] = jnp.maximum(h3 + b3_ref[...], 0.0).reshape(TB, M2, latent_dim)

    return kernel


# ----------------------------------------------------------------------------
# Host glue: layer-1 im2col only (the raw input must be read anyway), with rows
# grouped by output-position parity so the kernel can write layer-1's output
# straight into its parity-split layout.  K order is (kh, kw), matching w1.
# ----------------------------------------------------------------------------
def _layer1_rows_grouped(x_nchw):
    N, C, H, W = x_nchw.shape
    OH1, OW1 = H // 2, W // 2
    xp = jnp.pad(x_nchw[:, 0], ((0, 0), (1, 1), (1, 1)))           # (N, H+2, W+2)
    cols = jnp.stack(
        [xp[:, i:i + 2 * OH1:2, j:j + 2 * OW1:2]
         for i in range(4) for j in range(4)],
        axis=-1)                                                    # (N, OH1, OW1, 16)
    groups = []
    for p in (0, 1):            # output-row parity group
        for q in (0, 1):        # output-col parity group
            blk = cols[:, 1 - p::2][:, :, 1 - q::2]                 # (N, OH2, OW2, 16)
            groups.append(blk.reshape(N, -1, 16))
    return jnp.concatenate(groups, axis=1).astype(jnp.bfloat16)    # (N, OH1*OW1, 16)


# ----------------------------------------------------------------------------
# Parameters: init (PyTorch-style) + one-time packing for the kernel
# ----------------------------------------------------------------------------
def init_conv_encoder_params(latent_dim, key):
    specs = [(C1, 1, 4, 4), (C2, C1, 4, 4), (latent_dim, C2, 3, 3)]
    params = []
    for i, (cout, cin, kh, kw) in enumerate(specs):
        kw_key, kb_key = jax.random.split(jax.random.fold_in(key, i))
        bound = 1.0 / float(cin * kh * kw) ** 0.5
        w = jax.random.uniform(kw_key, (cout, cin, kh, kw), jnp.float32, -bound, bound)
        b = jax.random.uniform(kb_key, (cout,), jnp.float32, -bound, bound)
        params.append((w, b))
    return params


def pack_conv_encoder_params(params):
    """One-time weight packing for the fused kernel.

    w1, w3: OIHW f32 -> (KH*KW*Cin, Cout) bf16, K row order (kh, kw, cin).
    w2    : OIHW f32 -> (16*Cin, Cout) bf16 with K row order
            ((di*2+dj)*4 + (p*2+q), cin)  <->  tap (kh=2*di+p, kw=2*dj+q),
            matching the kernel's lane-folded layer-2 gather.
    biases: (1, Cout) f32.
    """
    (w1, b1), (w2, b2), (w3, b3) = params

    def pack_generic(w):
        cout, cin, kh, kw = w.shape
        return (jnp.transpose(w, (2, 3, 1, 0))
                .reshape(kh * kw * cin, cout).astype(jnp.bfloat16))

    def pack_w2_parity(w):
        rows = []
        for di in range(2):
            for dj in range(2):
                for p in range(2):
                    for q in range(2):
                        rows.append(jnp.transpose(w[:, :, 2 * di + p, 2 * dj + q],
                                                  (1, 0)))          # (Cin, Cout)
        return jnp.concatenate(rows, axis=0).astype(jnp.bfloat16)   # (16*Cin, Cout)

    def bias(b):
        return b.reshape(1, -1).astype(jnp.float32)

    return [(pack_generic(w1), bias(b1)),
            (pack_w2_parity(w2), bias(b2)),
            (pack_generic(w3), bias(b3))]


# ----------------------------------------------------------------------------
# Batch-tile choice + VMEM sizing
# ----------------------------------------------------------------------------
def _pick_batch_tile(N, cap=16):
    """Largest TB <= cap dividing N that keeps >= 2 grid steps (v7x megacore)."""
    if N == 1:
        return 1
    best = 1
    for tb in range(1, min(cap, N // 2) + 1):
        if N % tb == 0:
            best = tb
    return best


def _vmem_limit_bytes(TB, M1, M2, OH2, OW2, latent_dim):
    x1 = TB * M1 * 16 * 2
    out = TB * M2 * latent_dim * 4
    w = (16 * C1 + 16 * C1 * C2 + 9 * C2 * latent_dim) * 2 \
        + (C1 + C2 + latent_dim) * 4
    h1s = TB * (OH2 + 1) * (OW2 + 1) * 4 * C1 * 2
    h2p = TB * (OH2 + 2) * (OW2 + 2) * C2 * 2
    tmp = 4 * TB * M2 * (16 * C1 + 9 * C2) * 2     # in-kernel concat temporaries
    need = 2 * (x1 + out + w) + h1s + h2p + tmp    # 2x for double buffering
    # Explicit, generous, and below v7x's 64 MiB physical VMEM.
    return int(min(48 * 2 ** 20, max(32 * 2 ** 20, 4 * need)))


# ----------------------------------------------------------------------------
# Forward pass
# ----------------------------------------------------------------------------
@jax.jit
def conv_encoder_forward(x, packed_params):
    """x: (N, 1, H, W) f32 NCHW -> (N, latent_dim, H//4, W//4) f32 NCHW."""
    (w1, b1), (w2, b2), (w3, b3) = packed_params
    N, C, H, W = x.shape
    assert C == 1 and H % 4 == 0 and W % 4 == 0
    OH1, OW1 = H // 2, W // 2
    OH2, OW2 = OH1 // 2, OW1 // 2
    M1, M2 = OH1 * OW1, OH2 * OW2
    latent_dim = w3.shape[1]

    TB = _pick_batch_tile(N)
    x1_rows = _layer1_rows_grouped(x)                               # (N, M1, 16) bf16

    out = pl.pallas_call(
        _make_encoder_kernel(TB, OH2, OW2, latent_dim),
        out_shape=jax.ShapeDtypeStruct((N, M2, latent_dim), jnp.float32),
        grid=(N // TB,),
        in_specs=[
            pl.BlockSpec((TB, M1, 16), lambda n: (n, 0, 0)),        # layer-1 im2col rows
            pl.BlockSpec((16, C1), lambda n: (0, 0)),               # w1 (bf16)
            pl.BlockSpec((1, C1), lambda n: (0, 0)),                # b1 (f32)
            pl.BlockSpec((16 * C1, C2), lambda n: (0, 0)),          # w2 (bf16, parity K order)
            pl.BlockSpec((1, C2), lambda n: (0, 0)),                # b2 (f32)
            pl.BlockSpec((9 * C2, latent_dim), lambda n: (0, 0)),   # w3 (bf16)
            pl.BlockSpec((1, latent_dim), lambda n: (0, 0)),        # b3 (f32)
        ],
        out_specs=pl.BlockSpec((TB, M2, latent_dim), lambda n: (n, 0, 0)),
        scratch_shapes=[
            pltpu.VMEM((TB, OH2 + 1, OW2 + 1, 4 * C1), jnp.bfloat16),  # lane-folded padded h1
            pltpu.VMEM((TB, OH2 + 2, OW2 + 2, C2), jnp.bfloat16),      # padded h2
        ],
        compiler_params=pltpu.CompilerParams(
            dimension_semantics=("parallel",),
            vmem_limit_bytes=_vmem_limit_bytes(TB, M1, M2, OH2, OW2, latent_dim)),
    )(x1_rows, w1, b1, w2, b2, w3, b3)

    out = out.reshape(N, OH2, OW2, latent_dim)
    return jnp.transpose(out, (0, 3, 1, 2))                         # NCHW at boundary only


# ----------------------------------------------------------------------------
# Pure-JAX references for the correctness check
# ----------------------------------------------------------------------------
def _ref_forward(x, params, bf16_inputs):
    """lax.conv reference.  If bf16_inputs, round inputs/weights/activations to
    bf16 exactly like the kernel's bf16-dot / f32-accumulate path."""
    def rt(a):
        return a.astype(jnp.bfloat16).astype(jnp.float32) if bf16_inputs else a

    h = rt(x)
    cfgs = [(2, 1), (2, 1), (1, 1)]
    for idx, ((w, b), (s, p)) in enumerate(zip(params, cfgs)):
        h = lax.conv_general_dilated(
            h, rt(w), (s, s), ((p, p), (p, p)),
            dimension_numbers=("NCHW", "OIHW", "NCHW"),
            precision=lax.Precision.HIGHEST)
        h = jnp.maximum(h + b[None, :, None, None], 0.0)
        if idx < 2:
            h = rt(h)
    return h


if __name__ == "__main__":
    latent_dim = 32
    key = jax.random.PRNGKey(0)
    k_x, k_p = jax.random.split(key)

    # N = 8 -> TB = 4, grid = (2,): exercises batch tiling and keeps both v7x
    # TensorCores busy while staying tiny.
    x = jax.random.normal(k_x, (8, 1, 16, 16), jnp.float32)         # NCHW
    raw_params = init_conv_encoder_params(latent_dim, k_p)
    packed_params = pack_conv_encoder_params(raw_params)

    out = jax.block_until_ready(conv_encoder_forward(x, packed_params))
    assert out.shape == (8, latent_dim, 4, 4), out.shape

    # Tight check vs. a reference that mirrors the kernel's bf16 dot inputs and
    # bf16 inter-layer activations.
    ref_bf16 = jax.block_until_ready(_ref_forward(x, raw_params, bf16_inputs=True))
    err = float(jnp.max(jnp.abs(out - ref_bf16)))
    assert jnp.allclose(out, ref_bf16, atol=2e-3, rtol=2e-3), err

    # Loose check vs. the full-f32 PyTorch-equivalent forward (kernel intentionally
    # uses bf16 MXU inputs, so only a loose tolerance applies here).
    ref_f32 = jax.block_until_ready(_ref_forward(x, raw_params, bf16_inputs=False))
    err32 = float(jnp.max(jnp.abs(out - ref_f32)))
    assert jnp.allclose(out, ref_f32, atol=5e-2, rtol=5e-2), err32

    print("KERNEL_OK")
</pallas_src>

<mosaic_0001>
module attributes {stable_mosaic.version = 11 : i64} {
  func.func @kernel(%arg0: i32, %arg1: memref<4x64x16xbf16, #tpu.memory_space<vmem>>, %arg2: memref<16x32xbf16, #tpu.memory_space<vmem>>, %arg3: memref<1x32xf32, #tpu.memory_space<vmem>>, %arg4: memref<512x64xbf16, #tpu.memory_space<vmem>>, %arg5: memref<1x64xf32, #tpu.memory_space<vmem>>, %arg6: memref<576x32xbf16, #tpu.memory_space<vmem>>, %arg7: memref<1x32xf32, #tpu.memory_space<vmem>>, %arg8: memref<4x16x32xf32, #tpu.memory_space<vmem>>, %arg9: memref<4x5x5x128xbf16, #tpu.memory_space<vmem>>, %arg10: memref<4x6x6x64xbf16, #tpu.memory_space<vmem>>) attributes {dimension_semantics = [#tpu.dimension_semantics<parallel>], iteration_bounds = array<i64: 2>, scalar_prefetch = 0 : i64, scratch_operands = 2 : i64, tpu.core_type = #tpu.core_type<tc>, window_params = [{transform_indices = @transform_0, window_bounds = array<i64: 4, 64, 16>}, {pipeline_mode = #tpu.pipeline_mode<synchronous>, transform_indices = @transform_1, window_bounds = array<i64: 16, 32>}, {pipeline_mode = #tpu.pipeline_mode<synchronous>, transform_indices = @transform_2, window_bounds = array<i64: 1, 32>}, {pipeline_mode = #tpu.pipeline_mode<synchronous>, transform_indices = @transform_3, window_bounds = array<i64: 512, 64>}, {pipeline_mode = #tpu.pipeline_mode<synchronous>, transform_indices = @transform_4, window_bounds = array<i64: 1, 64>}, {pipeline_mode = #tpu.pipeline_mode<synchronous>, transform_indices = @transform_5, window_bounds = array<i64: 576, 32>}, {pipeline_mode = #tpu.pipeline_mode<synchronous>, transform_indices = @transform_6, window_bounds = array<i64: 1, 32>}, {transform_indices = @transform_7, window_bounds = array<i64: 4, 16, 32>}]} {
    %c0 = arith.constant 0 : index
    %c0_0 = arith.constant 0 : index
    %c0_1 = arith.constant 0 : index
    %0 = vector.load %arg1[%c0, %c0_0, %c0_1] : memref<4x64x16xbf16, #tpu.memory_space<vmem>>, vector<4x64x16xbf16>
    %1 = vector.shape_cast %0 : vector<4x64x16xbf16> to vector<256x16xbf16>
    %c0_2 = arith.constant 0 : index
    %c0_3 = arith.constant 0 : index
    %2 = vector.load %arg2[%c0_2, %c0_3] : memref<16x32xbf16, #tpu.memory_space<vmem>>, vector<16x32xbf16>
    %cst = arith.constant dense<0.000000e+00> : vector<256x32xf32>
    %3 = tpu.matmul %1, %2, %cst {dimension_numbers = #tpu.dot_dimension_numbers<[1], [0], [0], [1], [0, 0, 1, 1], [], []>} : vector<256x16xbf16>, vector<16x32xbf16>, vector<256x32xf32> -> vector<256x32xf32>
    %c0_4 = arith.constant 0 : index
    %c0_5 = arith.constant 0 : index
    %4 = vector.load %arg3[%c0_4, %c0_5] : memref<1x32xf32, #tpu.memory_space<vmem>>, vector<1x32xf32>
    %5 = vector.broadcast %4 : vector<1x32xf32> to vector<256x32xf32>
    %6 = arith.addf %3, %5 : vector<256x32xf32>
    %cst_6 = arith.constant 0.000000e+00 : f32
    %7 = vector.broadcast %cst_6 : f32 to vector<256x32xf32>
    %8 = arith.maximumf %6, %7 : vector<256x32xf32>
    %9 = arith.truncf %8 : vector<256x32xf32> to vector<256x32xbf16>
    %10 = vector.shape_cast %9 : vector<256x32xbf16> to vector<4x4x4x4x32xbf16>
    %cst_7 = arith.constant 0.000000e+00 : bf16
    %11 = vector.broadcast %cst_7 : bf16 to vector<4x5x128xbf16>
    %c0_8 = arith.constant 0 : index
    %c0_9 = arith.constant 0 : index
    %c0_10 = arith.constant 0 : index
    %c0_11 = arith.constant 0 : index
    %12 = vector.load %arg9[%c0_8, %c0_9, %c0_10, %c0_11] : memref<4x5x5x128xbf16, #tpu.memory_space<vmem>>, vector<4x1x5x128xbf16>
    %13 = vector.shape_cast %12 : vector<4x1x5x128xbf16> to vector<4x5x128xbf16>
    %14 = vector.shape_cast %11 : vector<4x5x128xbf16> to vector<4x1x5x128xbf16>
    tpu.vector_store %arg9[%c0_8, %c0_9, %c0_10, %c0_11], %14 {strides = array<i32>} : memref<4x5x5x128xbf16, #tpu.memory_space<vmem>>, vector<4x1x5x128xbf16>,
    %cst_12 = arith.constant 0.000000e+00 : bf16
    %15 = vector.broadcast %cst_12 : bf16 to vector<4x5x128xbf16>
    %c0_13 = arith.constant 0 : index
    %c4 = arith.constant 4 : index
    %c0_14 = arith.constant 0 : index
    %c0_15 = arith.constant 0 : index
    %16 = vector.load %arg9[%c0_13, %c4, %c0_14, %c0_15] : memref<4x5x5x128xbf16, #tpu.memory_space<vmem>>, vector<4x1x5x128xbf16>
    %17 = vector.shape_cast %16 : vector<4x1x5x128xbf16> to vector<4x5x128xbf16>
    %18 = vector.shape_cast %15 : vector<4x5x128xbf16> to vector<4x1x5x128xbf16>
    tpu.vector_store %arg9[%c0_13, %c4, %c0_14, %c0_15], %18 {strides = array<i32>} : memref<4x5x5x128xbf16, #tpu.memory_space<vmem>>, vector<4x1x5x128xbf16>,
    %cst_16 = arith.constant 0.000000e+00 : bf16
    %19 = vector.broadcast %cst_16 : bf16 to vector<4x5x128xbf16>
    %c0_17 = arith.constant 0 : index
    %c0_18 = arith.constant 0 : index
    %c0_19 = arith.constant 0 : index
    %c0_20 = arith.constant 0 : index
    %20 = vector.load %arg9[%c0_17, %c0_18, %c0_19, %c0_20] : memref<4x5x5x128xbf16, #tpu.memory_space<vmem>>, vector<4x5x1x128xbf16>
    %21 = vector.shape_cast %20 : vector<4x5x1x128xbf16> to vector<4x5x128xbf16>
    %22 = vector.shape_cast %19 : vector<4x5x128xbf16> to vector<4x5x1x128xbf16>
    tpu.vector_store %arg9[%c0_17, %c0_18, %c0_19, %c0_20], %22 {strides = array<i32>} : memref<4x5x5x128xbf16, #tpu.memory_space<vmem>>, vector<4x5x1x128xbf16>,
    %cst_21 = arith.constant 0.000000e+00 : bf16
    %23 = vector.broadcast %cst_21 : bf16 to vector<4x5x128xbf16>
    %c0_22 = arith.constant 0 : index
    %c0_23 = arith.constant 0 : index
    %c4_24 = arith.constant 4 : index
    %c0_25 = arith.constant 0 : index
    %24 = vector.load %arg9[%c0_22, %c0_23, %c4_24, %c0_25] : memref<4x5x5x128xbf16, #tpu.memory_space<vmem>>, vector<4x5x1x128xbf16>
    %25 = vector.shape_cast %24 : vector<4x5x1x128xbf16> to vector<4x5x128xbf16>
    %26 = vector.shape_cast %23 : vector<4x5x128xbf16> to vector<4x5x1x128xbf16>
    tpu.vector_store %arg9[%c0_22, %c0_23, %c4_24, %c0_25], %26 {strides = array<i32>} : memref<4x5x5x128xbf16, #tpu.memory_space<vmem>>, vector<4x5x1x128xbf16>,
    %27 = vector.extract_strided_slice %10 {offsets = [0, 0, 0, 0, 0], sizes = [4, 1, 4, 4, 32], strides = [1, 1, 1, 1, 1]} : vector<4x4x4x4x32xbf16> to vector<4x1x4x4x32xbf16>
    %28 = vector.shape_cast %27 : vector<4x1x4x4x32xbf16> to vector<4x4x4x32xbf16>
    %c0_26 = arith.constant 0 : index
    %c1 = arith.constant 1 : index
    %c1_27 = arith.constant 1 : index
    %c0_28 = arith.constant 0 : index
    %29 = vector.load %arg9[%c0_26, %c1, %c1_27, %c0_28] : memref<4x5x5x128xbf16, #tpu.memory_space<vmem>>, vector<4x4x4x32xbf16>
    tpu.vector_store %arg9[%c0_26, %c1, %c1_27, %c0_28], %28 {strides = array<i32>} : memref<4x5x5x128xbf16, #tpu.memory_space<vmem>>, vector<4x4x4x32xbf16>,
    %30 = vector.extract_strided_slice %10 {offsets = [0, 1, 0, 0, 0], sizes = [4, 1, 4, 4, 32], strides = [1, 1, 1, 1, 1]} : vector<4x4x4x4x32xbf16> to vector<4x1x4x4x32xbf16>
    %31 = vector.shape_cast %30 : vector<4x1x4x4x32xbf16> to vector<4x4x4x32xbf16>
    %c0_29 = arith.constant 0 : index
    %c1_30 = arith.constant 1 : index
    %c0_31 = arith.constant 0 : index
    %c32 = arith.constant 32 : index
    %32 = vector.load %arg9[%c0_29, %c1_30, %c0_31, %c32] : memref<4x5x5x128xbf16, #tpu.memory_space<vmem>>, vector<4x4x4x32xbf16>
    tpu.vector_store %arg9[%c0_29, %c1_30, %c0_31, %c32], %31 {strides = array<i32>} : memref<4x5x5x128xbf16, #tpu.memory_space<vmem>>, vector<4x4x4x32xbf16>,
    %33 = vector.extract_strided_slice %10 {offsets = [0, 2, 0, 0, 0], sizes = [4, 1, 4, 4, 32], strides = [1, 1, 1, 1, 1]} : vector<4x4x4x4x32xbf16> to vector<4x1x4x4x32xbf16>
    %34 = vector.shape_cast %33 : vector<4x1x4x4x32xbf16> to vector<4x4x4x32xbf16>
    %c0_32 = arith.constant 0 : index
    %c0_33 = arith.constant 0 : index
    %c1_34 = arith.constant 1 : index
    %c64 = arith.constant 64 : index
    %35 = vector.load %arg9[%c0_32, %c0_33, %c1_34, %c64] : memref<4x5x5x128xbf16, #tpu.memory_space<vmem>>, vector<4x4x4x32xbf16>
    tpu.vector_store %arg9[%c0_32, %c0_33, %c1_34, %c64], %34 {strides = array<i32>} : memref<4x5x5x128xbf16, #tpu.memory_space<vmem>>, vector<4x4x4x32xbf16>,
    %36 = vector.extract_strided_slice %10 {offsets = [0, 3, 0, 0, 0], sizes = [4, 1, 4, 4, 32], strides = [1, 1, 1, 1, 1]} : vector<4x4x4x4x32xbf16> to vector<4x1x4x4x32xbf16>
    %37 = vector.shape_cast %36 : vector<4x1x4x4x32xbf16> to vector<4x4x4x32xbf16>
    %c0_35 = arith.constant 0 : index
    %c0_36 = arith.constant 0 : index
    %c0_37 = arith.constant 0 : index
    %c96 = arith.constant 96 : index
    %38 = vector.load %arg9[%c0_35, %c0_36, %c0_37, %c96] : memref<4x5x5x128xbf16, #tpu.memory_space<vmem>>, vector<4x4x4x32xbf16>
    tpu.vector_store %arg9[%c0_35, %c0_36, %c0_37, %c96], %37 {strides = array<i32>} : memref<4x5x5x128xbf16, #tpu.memory_space<vmem>>, vector<4x4x4x32xbf16>,
    %c0_38 = arith.constant 0 : index
    %c0_39 = arith.constant 0 : index
    %c0_40 = arith.constant 0 : index
    %c0_41 = arith.constant 0 : index
    %39 = vector.load %arg9[%c0_38, %c0_39, %c0_40, %c0_41] : memref<4x5x5x128xbf16, #tpu.memory_space<vmem>>, vector<4x4x4x128xbf16>
    %c0_42 = arith.constant 0 : index
    %c0_43 = arith.constant 0 : index
    %c1_44 = arith.constant 1 : index
    %c0_45 = arith.constant 0 : index
    %40 = vector.load %arg9[%c0_42, %c0_43, %c1_44, %c0_45] : memref<4x5x5x128xbf16, #tpu.memory_space<vmem>>, vector<4x4x4x128xbf16>
    %c0_46 = arith.constant 0 : index
    %c1_47 = arith.constant 1 : index
    %c0_48 = arith.constant 0 : index
    %c0_49 = arith.constant 0 : index
    %41 = vector.load %arg9[%c0_46, %c1_47, %c0_48, %c0_49] : memref<4x5x5x128xbf16, #tpu.memory_space<vmem>>, vector<4x4x4x128xbf16>
    %c0_50 = arith.constant 0 : index
    %c1_51 = arith.constant 1 : index
    %c1_52 = arith.constant 1 : index
    %c0_53 = arith.constant 0 : index
    %42 = vector.load %arg9[%c0_50, %c1_51, %c1_52, %c0_53] : memref<4x5x5x128xbf16, #tpu.memory_space<vmem>>, vector<4x4x4x128xbf16>
    %43 = tpu.concatenate %39, %40, %41, %42 in 3 : vector<4x4x4x128xbf16>, vector<4x4x4x128xbf16>, vector<4x4x4x128xbf16>, vector<4x4x4x128xbf16> -> vector<4x4x4x512xbf16>
    %44 = vector.shape_cast %43 : vector<4x4x4x512xbf16> to vector<64x512xbf16>
    %c0_54 = arith.constant 0 : index
    %c0_55 = arith.constant 0 : index
    %45 = vector.load %arg4[%c0_54, %c0_55] : memref<512x64xbf16, #tpu.memory_space<vmem>>, vector<512x64xbf16>
    %cst_56 = arith.constant dense<0.000000e+00> : vector<64x64xf32>
    %46 = tpu.matmul %44, %45, %cst_56 {dimension_numbers = #tpu.dot_dimension_numbers<[1], [0], [0], [1], [0, 0, 1, 1], [], []>} : vector<64x512xbf16>, vector<512x64xbf16>, vector<64x64xf32> -> vector<64x64xf32>
    %c0_57 = arith.constant 0 : index
    %c0_58 = arith.constant 0 : index
    %47 = vector.load %arg5[%c0_57, %c0_58] : memref<1x64xf32, #tpu.memory_space<vmem>>, vector<1x64xf32>
    %48 = vector.broadcast %47 : vector<1x64xf32> to vector<64x64xf32>
    %49 = arith.addf %46, %48 : vector<64x64xf32>
    %cst_59 = arith.constant 0.000000e+00 : f32
    %50 = vector.broadcast %cst_59 : f32 to vector<64x64xf32>
    %51 = arith.maximumf %49, %50 : vector<64x64xf32>
    %52 = arith.truncf %51 : vector<64x64xf32> to vector<64x64xbf16>
    %cst_60 = arith.constant 0.000000e+00 : bf16
    %53 = vector.broadcast %cst_60 : bf16 to vector<4x6x64xbf16>
    %c0_61 = arith.constant 0 : index
    %c0_62 = arith.constant 0 : index
    %c0_63 = arith.constant 0 : index
    %c0_64 = arith.constant 0 : index
    %54 = vector.load %arg10[%c0_61, %c0_62, %c0_63, %c0_64] : memref<4x6x6x64xbf16, #tpu.memory_space<vmem>>, vector<4x1x6x64xbf16>
    %55 = vector.shape_cast %54 : vector<4x1x6x64xbf16> to vector<4x6x64xbf16>
    %56 = vector.shape_cast %53 : vector<4x6x64xbf16> to vector<4x1x6x64xbf16>
    tpu.vector_store %arg10[%c0_61, %c0_62, %c0_63, %c0_64], %56 {strides = array<i32>} : memref<4x6x6x64xbf16, #tpu.memory_space<vmem>>, vector<4x1x6x64xbf16>,
    %cst_65 = arith.constant 0.000000e+00 : bf16
    %57 = vector.broadcast %cst_65 : bf16 to vector<4x6x64xbf16>
    %c0_66 = arith.constant 0 : index
    %c5 = arith.constant 5 : index
    %c0_67 = arith.constant 0 : index
    %c0_68 = arith.constant 0 : index
    %58 = vector.load %arg10[%c0_66, %c5, %c0_67, %c0_68] : memref<4x6x6x64xbf16, #tpu.memory_space<vmem>>, vector<4x1x6x64xbf16>
    %59 = vector.shape_cast %58 : vector<4x1x6x64xbf16> to vector<4x6x64xbf16>
    %60 = vector.shape_cast %57 : vector<4x6x64xbf16> to vector<4x1x6x64xbf16>
    tpu.vector_store %arg10[%c0_66, %c5, %c0_67, %c0_68], %60 {strides = array<i32>} : memref<4x6x6x64xbf16, #tpu.memory_space<vmem>>, vector<4x1x6x64xbf16>,
    %cst_69 = arith.constant 0.000000e+00 : bf16
    %61 = vector.broadcast %cst_69 : bf16 to vector<4x6x64xbf16>
    %c0_70 = arith.constant 0 : index
    %c0_71 = arith.constant 0 : index
    %c0_72 = arith.constant 0 : index
    %c0_73 = arith.constant 0 : index
    %62 = vector.load %arg10[%c0_70, %c0_71, %c0_72, %c0_73] : memref<4x6x6x64xbf16, #tpu.memory_space<vmem>>, vector<4x6x1x64xbf16>
    %63 = vector.shape_cast %62 : vector<4x6x1x64xbf16> to vector<4x6x64xbf16>
    %64 = vector.shape_cast %61 : vector<4x6x64xbf16> to vector<4x6x1x64xbf16>
    tpu.vector_store %arg10[%c0_70, %c0_71, %c0_72, %c0_73], %64 {strides = array<i32>} : memref<4x6x6x64xbf16, #tpu.memory_space<vmem>>, vector<4x6x1x64xbf16>,
    %cst_74 = arith.constant 0.000000e+00 : bf16
    %65 = vector.broadcast %cst_74 : bf16 to vector<4x6x64xbf16>
    %c0_75 = arith.constant 0 : index
    %c0_76 = arith.constant 0 : index
    %c5_77 = arith.constant 5 : index
    %c0_78 = arith.constant 0 : index
    %66 = vector.load %arg10[%c0_75, %c0_76, %c5_77, %c0_78] : memref<4x6x6x64xbf16, #tpu.memory_space<vmem>>, vector<4x6x1x64xbf16>
    %67 = vector.shape_cast %66 : vector<4x6x1x64xbf16> to vector<4x6x64xbf16>
    %68 = vector.shape_cast %65 : vector<4x6x64xbf16> to vector<4x6x1x64xbf16>
    tpu.vector_store %arg10[%c0_75, %c0_76, %c5_77, %c0_78], %68 {strides = array<i32>} : memref<4x6x6x64xbf16, #tpu.memory_space<vmem>>, vector<4x6x1x64xbf16>,
    %69 = vector.shape_cast %52 : vector<64x64xbf16> to vector<4x4x4x64xbf16>
    %c0_79 = arith.constant 0 : index
    %c1_80 = arith.constant 1 : index
    %c1_81 = arith.constant 1 : index
    %c0_82 = arith.constant 0 : index
    %70 = vector.load %arg10[%c0_79, %c1_80, %c1_81, %c0_82] : memref<4x6x6x64xbf16, #tpu.memory_space<vmem>>, vector<4x4x4x64xbf16>
    tpu.vector_store %arg10[%c0_79, %c1_80, %c1_81, %c0_82], %69 {strides = array<i32>} : memref<4x6x6x64xbf16, #tpu.memory_space<vmem>>, vector<4x4x4x64xbf16>,
    %c0_83 = arith.constant 0 : index
    %c0_84 = arith.constant 0 : index
    %c0_85 = arith.constant 0 : index
    %c0_86 = arith.constant 0 : index
    %71 = vector.load %arg10[%c0_83, %c0_84, %c0_85, %c0_86] : memref<4x6x6x64xbf16, #tpu.memory_space<vmem>>, vector<4x4x4x64xbf16>
    %c0_87 = arith.constant 0 : index
    %c0_88 = arith.constant 0 : index
    %c1_89 = arith.constant 1 : index
    %c0_90 = arith.constant 0 : index
    %72 = vector.load %arg10[%c0_87, %c0_88, %c1_89, %c0_90] : memref<4x6x6x64xbf16, #tpu.memory_space<vmem>>, vector<4x4x4x64xbf16>
    %c0_91 = arith.constant 0 : index
    %c0_92 = arith.constant 0 : index
    %c2 = arith.constant 2 : index
    %c0_93 = arith.constant 0 : index
    %73 = vector.load %arg10[%c0_91, %c0_92, %c2, %c0_93] : memref<4x6x6x64xbf16, #tpu.memory_space<vmem>>, vector<4x4x4x64xbf16>
    %c0_94 = arith.constant 0 : index
    %c1_95 = arith.constant 1 : index
    %c0_96 = arith.constant 0 : index
    %c0_97 = arith.constant 0 : index
    %74 = vector.load %arg10[%c0_94, %c1_95, %c0_96, %c0_97] : memref<4x6x6x64xbf16, #tpu.memory_space<vmem>>, vector<4x4x4x64xbf16>
    %c0_98 = arith.constant 0 : index
    %c1_99 = arith.constant 1 : index
    %c1_100 = arith.constant 1 : index
    %c0_101 = arith.constant 0 : index
    %75 = vector.load %arg10[%c0_98, %c1_99, %c1_100, %c0_101] : memref<4x6x6x64xbf16, #tpu.memory_space<vmem>>, vector<4x4x4x64xbf16>
    %c0_102 = arith.constant 0 : index
    %c1_103 = arith.constant 1 : index
    %c2_104 = arith.constant 2 : index
    %c0_105 = arith.constant 0 : index
    %76 = vector.load %arg10[%c0_102, %c1_103, %c2_104, %c0_105] : memref<4x6x6x64xbf16, #tpu.memory_space<vmem>>, vector<4x4x4x64xbf16>
    %c0_106 = arith.constant 0 : index
    %c2_107 = arith.constant 2 : index
    %c0_108 = arith.constant 0 : index
    %c0_109 = arith.constant 0 : index
    %77 = vector.load %arg10[%c0_106, %c2_107, %c0_108, %c0_109] : memref<4x6x6x64xbf16, #tpu.memory_space<vmem>>, vector<4x4x4x64xbf16>
    %c0_110 = arith.constant 0 : index
    %c2_111 = arith.constant 2 : index
    %c1_112 = arith.constant 1 : index
    %c0_113 = arith.constant 0 : index
    %78 = vector.load %arg10[%c0_110, %c2_111, %c1_112, %c0_113] : memref<4x6x6x64xbf16, #tpu.memory_space<vmem>>, vector<4x4x4x64xbf16>
    %c0_114 = arith.constant 0 : index
    %c2_115 = arith.constant 2 : index
    %c2_116 = arith.constant 2 : index
    %c0_117 = arith.constant 0 : index
    %79 = vector.load %arg10[%c0_114, %c2_115, %c2_116, %c0_117] : memref<4x6x6x64xbf16, #tpu.memory_space<vmem>>, vector<4x4x4x64xbf16>
    %80 = tpu.concatenate %71, %72, %73, %74, %75, %76, %77, %78, %79 in 3 : vector<4x4x4x64xbf16>, vector<4x4x4x64xbf16>, vector<4x4x4x64xbf16>, vector<4x4x4x64xbf16>, vector<4x4x4x64xbf16>, vector<4x4x4x64xbf16>, vector<4x4x4x64xbf16>, vector<4x4x4x64xbf16>, vector<4x4x4x64xbf16> -> vector<4x4x4x576xbf16>
    %81 = vector.shape_cast %80 : vector<4x4x4x576xbf16> to vector<64x576xbf16>
    %c0_118 = arith.constant 0 : index
    %c0_119 = arith.constant 0 : index
    %82 = vector.load %arg6[%c0_118, %c0_119] : memref<576x32xbf16, #tpu.memory_space<vmem>>, vector<576x32xbf16>
    %cst_120 = arith.constant dense<0.000000e+00> : vector<64x32xf32>
    %83 = tpu.matmul %81, %82, %cst_120 {dimension_numbers = #tpu.dot_dimension_numbers<[1], [0], [0], [1], [0, 0, 1, 1], [], []>} : vector<64x576xbf16>, vector<576x32xbf16>, vector<64x32xf32> -> vector<64x32xf32>
    %c0_121 = arith.constant 0 : index
    %c0_122 = arith.constant 0 : index
    %84 = vector.load %arg7[%c0_121, %c0_122] : memref<1x32xf32, #tpu.memory_space<vmem>>, vector<1x32xf32>
    %85 = vector.broadcast %84 : vector<1x32xf32> to vector<64x32xf32>
    %86 = arith.addf %83, %85 : vector<64x32xf32>
    %cst_123 = arith.constant 0.000000e+00 : f32
    %87 = vector.broadcast %cst_123 : f32 to vector<64x32xf32>
    %88 = arith.maximumf %86, %87 : vector<64x32xf32>
    %89 = vector.shape_cast %88 : vector<64x32xf32> to vector<4x16x32xf32>
    %c0_124 = arith.constant 0 : index
    %c0_125 = arith.constant 0 : index
    %c0_126 = arith.constant 0 : index
    %90 = vector.load %arg8[%c0_124, %c0_125, %c0_126] : memref<4x16x32xf32, #tpu.memory_space<vmem>>, vector<4x16x32xf32>
    tpu.vector_store %arg8[%c0_124, %c0_125, %c0_126], %89 {strides = array<i32>} : memref<4x16x32xf32, #tpu.memory_space<vmem>>, vector<4x16x32xf32>,
    return
  }
  func.func @transform_0(%arg0: i32) -> (i32, i32, i32) {
    %c0_i32 = arith.constant 0 : i32
    %c0_i32_0 = arith.constant 0 : i32
    %c0_i32_1 = arith.constant 0 : i32
    return %arg0, %c0_i32, %c0_i32_0 : i32, i32, i32
  }
  func.func @transform_1(%arg0: i32) -> (i32, i32) {
    %c0_i32 = arith.constant 0 : i32
    %c0_i32_0 = arith.constant 0 : i32
    %c0_i32_1 = arith.constant 0 : i32
    return %c0_i32, %c0_i32_0 : i32, i32
  }
  func.func @transform_2(%arg0: i32) -> (i32, i32) {
    %c0_i32 = arith.constant 0 : i32
    %c0_i32_0 = arith.constant 0 : i32
    %c0_i32_1 = arith.constant 0 : i32
    return %c0_i32, %c0_i32_0 : i32, i32
  }
  func.func @transform_3(%arg0: i32) -> (i32, i32) {
    %c0_i32 = arith.constant 0 : i32
    %c0_i32_0 = arith.constant 0 : i32
    %c0_i32_1 = arith.constant 0 : i32
    return %c0_i32, %c0_i32_0 : i32, i32
  }
  func.func @transform_4(%arg0: i32) -> (i32, i32) {
    %c0_i32 = arith.constant 0 : i32
    %c0_i32_0 = arith.constant 0 : i32
    %c0_i32_1 = arith.constant 0 : i32
    return %c0_i32, %c0_i32_0 : i32, i32
  }
  func.func @transform_5(%arg0: i32) -> (i32, i32) {
    %c0_i32 = arith.constant 0 : i32
    %c0_i32_0 = arith.constant 0 : i32
    %c0_i32_1 = arith.constant 0 : i32
    return %c0_i32, %c0_i32_0 : i32, i32
  }
  func.func @transform_6(%arg0: i32) -> (i32, i32) {
    %c0_i32 = arith.constant 0 : i32
    %c0_i32_0 = arith.constant 0 : i32
    %c0_i32_1 = arith.constant 0 : i32
    return %c0_i32, %c0_i32_0 : i32, i32
  }
  func.func @transform_7(%arg0: i32) -> (i32, i32, i32) {
    %c0_i32 = arith.constant 0 : i32
    %c0_i32_0 = arith.constant 0 : i32
    %c0_i32_1 = arith.constant 0 : i32
    return %arg0, %c0_i32, %c0_i32_0 : i32, i32, i32
  }
}

</mosaic_0001>

<bundles_post_ra>
// kernel: conv_encoder_forward.1
= control target key start
LH: loop header
LB: loop body
LE: loop exit
PB: predicated region body
PF: predicated region fallthrough
CT: control target
= control target key end

     0   :  { %12 = vsyncpa [#allocation5], 0  ;;  %s7382_s0 = inlined_call_operand.vmem [shape: bf16[8,64,16], index: 0, kind: input, shape index: {}]   ;;  %s7383_s1 = inlined_call_operand.vmem [shape: bf16[16,32], index: 1, kind: input, shape index: {}]   ;;  %s7384_s2 = inlined_call_operand.vmem [shape: f32[1,32], index: 2, kind: input, shape index: {}]   ;;  %s7385_s3 = inlined_call_operand.vmem [shape: bf16[512,64], index: 3, kind: input, shape index: {}]   ;;  %s7386_s4 = inlined_call_operand.vmem [shape: f32[1,64], index: 4, kind: input, shape index: {}]   ;;  %s7387_s5 = inlined_call_operand.vmem [shape: bf16[576,32], index: 5, kind: input, shape index: {}]   ;;  %s7388_s6 = inlined_call_operand.vmem [shape: f32[1,32], index: 6, kind: input, shape index: {}]   ;;  %s7389_s7 = inlined_call_operand.hbm [shape: f32[8,16,32], index: 7, kind: output, shape index: {}]  }
   0x1   :  { %14 = vsyncpa [#allocation5 + $0x1], 0  ;;  %s5783_s24 = smov 0   ;;  %s5785_s25 = smov 0  }
   0x2   :  { %s5787_s26 = smov 0   ;;  %s5789_s27 = smov 0  }
   0x3 LB: > { %s5804_s28 = sadd.s32 4294967295, %s5735_s27   ;;  %s5161_s29 = sadd.s32 4294967294, %s5735_s27   ;;  %s5735_s27 = sphi %s5789_s27, %s7411_s27   ;;  %s5731_s26 = sphi %s5787_s26, %s7410_s26   ;;  %s5727_s25 = sphi %s5785_s25, %s7409_s25   ;;  %s5723_s24 = sphi %s5783_s24, %s7408_s24  }
   0x4   : > { %s5808_s30 = sadd.s32 1, %s5735_s27   ;;  %s179_s8 = sadd.s32 1, %s5731_s26 }
   0x5   : > { %s176_s9 = ssub.s32 %s5735_s27, %s5808_s30  ;;  %p189_p0 = scmp.ne.s32.totalorder %s5731_s26, %s5727_s25 }
   0x6   : > { %p177_p1 = scmp.eq.s32.totalorder %s176_s9, 0  ;;  %p190_p2 = scmp.eq.s32.totalorder %s5804_s28, 1 }
   0x7   : > { %p195_p3 = scmp.ne.s32.totalorder %s5727_s25, %s5723_s24  ;;  %p196_p4 = scmp.eq.s32.totalorder %s5161_s29, 1 }
   0x8   : > { %s5819_s10 = scalar_select %p177_p1, %s5731_s26, %s179_s8  }
   0x9   : > { %p5821_p5 = por %p190_p2, %p189_p0  ;;  %p5825_p6 = por %p196_p4, %p195_p3 }
   0xa   : > { %p5164_p7 = scmp.ge.s32.totalorder %s5735_s27, 1  ;;  %p242_p8 = scmp.lt.s32.totalorder %s5735_s27, 3 }
   0xc   : > { %p243_p9 = pnand %p5164_p7, %p242_p8 }
   0xd   : > { %s5166_s15 = sshll.u32 (!%p243_p9), %s5804_s28, 2  ;;  %s5737_s22 = smov (!%p243_p9), 32  }
   0xe   : > { %246 = sbr.rel (%p243_p9) target bundleno = 1316 (0x524), region = 48  ;;  %p276_p10 = scmp.lt.s32.totalorder (!%p243_p9), %s5166_s15, 7 }
   0xf   : > { %s5738_s23 = smov (!%p243_p9), 64   ;;  %s5739_s9 = smov (!%p243_p9), 96  }
  0x10   : > { %s272_s21 = sand.u32 (!%p243_p9), 1, %s5727_s25   ;;  %s5622_s29 = sshll.u32 (!%p243_p9), %s5804_s28, 6 }
  0x11   : > { %s5095_s13 = scalar_lea.hbm (!%p243_p9), %s7389_s7, %s5622_s29  ;;  %s5083_s28 = scalar_lea.sflag (!%p243_p9), [#allocation5], %s272_s21 }
  0x12   : > { %s5693_s20 = scalar_lea.hbm (!%p243_p9), %s7389_s7, 128 }
  0x13   : > { %v5552_v0 = vld [vmem:[%s7383_s1] sm:$0xff]  ;;  %s7413_s15 = smov (!%p276_p10, %s5166_s15), 7  ;;  %vm408_vm0 = vcmask 130048   ;;  %vm869_vm1 = vsmask.f32 2304  ;;  %vm896_vm2 = vcmask 1040384  }
  0x14   : > { %464 = vmatpush.bf16.msra.mxu0 %v5552_v0  ;;  %5623 = vmatpush.bf16.msra.mxu1 %v5552_v0  ;;  %s5535_s16 = sshll.u32 %s7413_s15, 5  ;;  %vm897_vm3 = vsmask.f32 256  ;;  %vm959_vm4 = vcmask 1042434   ;;  %v902_v10 = vld [vmem:[#allocation2 + $0x4] sm:$0x1] }
  0x15   : > { %s5838_s19 = scalar_lea.vmem %s7382_s0, %s5535_s16  ;;  %vm5856_vm5 = vmand %vm896_vm2, %vm897_vm3  ;;  %vm868_vm6 = vcmask 1042432   ;;  %v964_v13 = vld [vmem:[#allocation2 + $0x4] sm:$0x4]  ;;  %v884_v14 = vld [vmem:[#allocation2 + $0x10] sm:$0x7]  ;;  %vm674_vm9 = vcmask 1041408  }
  0x16   : > { %v5536_v1 = vld [vmem:[%s5838_s19] sm:$0xff]  ;;  %v5537_v2 = vld [vmem:[%s5838_s19 + $0x8] sm:$0xff]  ;;  %v5538_v3 = vld [vmem:[%s5838_s19 + $0x10] sm:$0xff]  ;;  %v903_v12 = vsel %vm5856_vm5, 0, %v902_v10  ;;  %vm678_vm10 = vcmask 1043458   ;;  %vm1177_vm11 = vcmask 256000  }
  0x17   : > { %5237 = vmatmul.msk.bf16.vlgmr.msra.gmra.mxu0 %vm408_vm0, %v5536_v1  ;;  %v5539_v4 = vld [vmem:[%s5838_s19 + $0x18] sm:$0xff]  ;;  %v5540_v5 = vld [vmem:[%s5838_s19 + $0x20] sm:$0xff]  ;;  %v5541_v6 = vld [vmem:[%s5838_s19 + $0x28] sm:$0xff]  ;;  %904 = vst [vmem:[#allocation2 + $0x4] sm:$0x1] %v903_v12  ;;  %vm1335_vm14 = vcmask 517376  }
  0x18   : > { %v5542_v7 = vld [vmem:[%s5838_s19 + $0x30] sm:$0xff]  ;;  %v5543_v8 = vld [vmem:[%s5838_s19 + $0x38] sm:$0xff]  ;;  %vm5861_vm7 = vmand %vm959_vm4, %vm869_vm1  ;;  %vm1178_vm12 = vsmask.f32 2306  ;;  %vm1539_vm15 = vcmask 780800   ;;  %vm2164_vm2 = vcmask 1045508  }
  0x19   : > { %v965_v15 = vsel %vm5861_vm7, 0, %v964_v13  ;;  %v905_v16 = vld [vmem:[#allocation2 + $0x8] sm:$0x1]  ;;  %vm5871_vm8 = vmand %vm868_vm6, %vm869_vm1  ;;  %v967_v19 = vld [vmem:[#allocation2 + $0x8] sm:$0x4]  ;;  %vm1696_vm1 = vcmask 1042176  }
  0x1a   : > { %966 = vst [vmem:[#allocation2 + $0x4] sm:$0x4] %v965_v15  ;;  %v906_v18 = vsel %vm5856_vm5, 0, %v905_v16  ;;  %v885_v20 = vsel %vm5871_vm8, 0, %v884_v14  ;;  %v968_v21 = vsel %vm5861_vm7, 0, %v967_v19  ;;  %v5544_v29 = vld [vmem:[%s5838_s19 + $0x40] sm:$0xff]  ;;  %vm5907_vm13 = vmand %vm1177_vm11, %vm1178_vm12 }
  0x1b   : > { %907 = vst [vmem:[#allocation2 + $0x8] sm:$0x1] %v906_v18  ;;  %v908_v22 = vld [vmem:[#allocation2 + $0xc] sm:$0x1]  ;;  %v970_v24 = vld [vmem:[#allocation2 + $0xc] sm:$0x4] }
  0x1c   : > { %969 = vst [vmem:[#allocation2 + $0x8] sm:$0x4] %v968_v21  ;;  %v909_v23 = vsel %vm5856_vm5, 0, %v908_v22  ;;  %v971_v25 = vsel %vm5861_vm7, 0, %v970_v24  ;;  %v5888_v26 = vld [vmem:[%s7384_s2] ss:$0 sm:$0xff] }
  0x1d   : > { %886 = vst [vmem:[#allocation2 + $0x10] sm:$0x7] %v885_v20  ;;  %v5545_v45 = vld [vmem:[%s5838_s19 + $0x48] sm:$0xff]  ;;  %v5546_v14 = vld [vmem:[%s5838_s19 + $0x50] sm:$0xff]  ;;  %v5547_v22 = vld [vmem:[%s5838_s19 + $0x58] sm:$0xff]  ;;  %vm2168_vm4 = vcmask 1043456  }
  0x1e   : > { %910 = vst [vmem:[#allocation2 + $0xc] sm:$0x1] %v909_v23  ;;  %v917_v24 = vld [vmem:[#allocation2 + $0x18] sm:$0x1]  ;;  %v5554_v9 = vld [vmem:[%s7385_s3 + $0x8] sm:$0xff]  ;;  %vm2732_vm6 = vcmask 516096  }
  0x1f   : > { %972 = vst [vmem:[#allocation2 + $0xc] sm:$0x4] %v971_v25  ;;  %v979_v25 = vld [vmem:[#allocation2 + $0x18] sm:$0x4]  ;;  %vm2807_vm11 = vsmask.f32 7946 }
  0x20   : > { %s5098_s15 = sshll.u32 %s5095_s13, 4  ;;  %s5099_s15 = int_to_ptr.hbm [resolvable:$true] %s5098_s15 }
  0x21   : > { %v1180_v57 = vld [vmem:[#allocation2 + $0x4] sm:$0x7]  ;;  %s5687_s16 = sshra.s32 %s5099_s15, 4  ;;  %s5688_s16 = int_to_ptr.hbm [resolvable:$true] %s5687_s16 }
  0x22   : > { %s5689_s17 = scalar_lea.hbm %s5688_s16, 64  ;;  %p5694_p0 = scmp.lt.s32.totalorder %s5688_s16, %s7389_s7 }
  0x23   : > { %v1183_v61 = vld [vmem:[#allocation2 + $0x8] sm:$0x7]  ;;  %p5690_p11 = scmp.ne.s32.totalorder %s5688_s16, %s5689_s17  ;;  %p5695_p1 = scmp.lt.s32.totalorder %s5693_s20, %s5689_s17 }
  0x24   : > { %v911_v27 = vld [vmem:[#allocation2 + $0x10] sm:$0x1]  ;;  %v973_v28 = vld [vmem:[#allocation2 + $0x10] sm:$0x4] }
  0x25   : > { %v912_v30 = vsel %vm5856_vm5, 0, %v911_v27  ;;  %v974_v31 = vsel %vm5861_vm7, 0, %v973_v28  ;;  %v918_v27 = vsel %vm5856_vm5, 0, %v917_v24  ;;  %v980_v28 = vsel %vm5861_vm7, 0, %v979_v25  ;;  %p5691_p12 = pnand %p5690_p11, %p5821_p5  ;;  %p5696_p2 = por %p5695_p1, %p5694_p0 }
  0x26   : > { %913 = vst [vmem:[#allocation2 + $0x10] sm:$0x1] %v912_v30  ;;  %v920_v30 = vld [vmem:[#allocation2 + $0x1c] sm:$0x1] }
  0x27   : > { %5238 = vmatmul.msk.bf16.gmra.mxu0 %vm408_vm0, %v5537_v2  ;;  %975 = vst [vmem:[#allocation2 + $0x10] sm:$0x4] %v974_v31  ;;  %v921_v31 = vsel %vm5856_vm5, 0, %v920_v30  ;;  %p5692_p13 = pneg %p5691_p12 }
  0x28   : > { %919 = vst [vmem:[#allocation2 + $0x18] sm:$0x1] %v918_v27 }
  0x29   : > { %981 = vst [vmem:[#allocation2 + $0x18] sm:$0x4] %v980_v28  ;;  %p5697_p3 = pnand %p5696_p2, %p5692_p13 }
  0x2a   : > { %922 = vst [vmem:[#allocation2 + $0x1c] sm:$0x1] %v921_v31 }
  0x2e   : > { %v1189_v15 = vld [vmem:[#allocation2 + $0x10] sm:$0x7] }
  0x37   : > { %5239 = vmatmul.msk.bf16.gmra.mxu0 %vm408_vm0, %v5538_v3 }
  0x47   : > { %5240 = vmatmul.msk.bf16.gmra.mxu0 %vm408_vm0, %v5539_v4 }
  0x57   : > { %5241 = vmatmul.msk.bf16.gmra.mxu0 %vm408_vm0, %v5540_v5 }
  0x67   : > { %5242 = vmatmul.msk.bf16.gmra.mxu0 %vm408_vm0, %v5541_v6 }
  0x77   : > { %5243 = vmatmul.msk.bf16.gmra.mxu0 %vm408_vm0, %v5542_v7 }
  0x87   : > { %5244 = vmatmul.msk.bf16.gmra.mxu0 %vm408_vm0, %v5543_v8  ;;  %v1186_v8 = vld [vmem:[#allocation2 + $0xc] sm:$0x7] }
  0x94   : > { %v466_v32 = vpop.f32.mrf.mxu0 }
  0x95   : > { %v467_v33 = vadd.f32 %v5888_v26, %v466_v32  ;;  %v982_v32 = vld [vmem:[#allocation2 + $0x1c] sm:$0x4] }
  0x97   : > { %v546_v34 = vmax.f32 %v467_v33, 0.0  ;;  %5245 = vmatmul.msk.bf16.gmra.mxu0 %vm408_vm0, %v5544_v29  ;;  %v887_v29 = vld [vmem:[#allocation2 + $0x24] sm:$0x7] }
  0x98   : > { %v888_v33 = vsel %vm5871_vm8, 0, %v887_v29 }
  0x99   : > { %v578_v35 = vpack.c.bf16 %v546_v34, %v546_v34  ;;  %v983_v34 = vsel %vm5861_vm7, 0, %v982_v32  ;;  %889 = vst [vmem:[#allocation2 + $0x24] sm:$0x7] %v888_v33 }
  0x9a   : > { %984 = vst [vmem:[#allocation2 + $0x1c] sm:$0x4] %v983_v34 }
  0x9b   : > { %v642_v36 = vrot.slane %v578_v35, 2 }
  0x9c   : > { %v468_v37 = vpop.f32.mrf.mxu0 }
  0x9d   : > { %v677_v38 = vsel %vm674_vm9, %v578_v35, %v642_v36  ;;  %v679_v39 = vsel %vm678_vm10, %v578_v35, %v642_v36  ;;  %v469_v40 = vadd.f32 %v5888_v26, %v468_v37  ;;  %v923_v36 = vld [vmem:[#allocation2 + $0x20] sm:$0x1]  ;;  %v985_v37 = vld [vmem:[#allocation2 + $0x20] sm:$0x4] }
  0x9e   : > { %v681_v41 = vrot.slane %v679_v39, 2  ;;  %1021 = vst [vmem:[#allocation1] ss:$2 sm:$0xff] %v677_v38  ;;  %v924_v38 = vsel %vm5856_vm5, 0, %v923_v36  ;;  %v986_v39 = vsel %vm5861_vm7, 0, %v985_v37 }
  0x9f   : > { %v547_v42 = vmax.f32 %v469_v40, 0.0  ;;  %925 = vst [vmem:[#allocation2 + $0x20] sm:$0x1] %v924_v38 }
  0xa0   : > { %1025 = vst [vmem:[#allocation1 + $0x10] ss:$2 sm:$0xff] %v681_v41  ;;  %v926_v40 = vld [vmem:[#allocation2 + $0x24] sm:$0x1]  ;;  %v988_v41 = vld [vmem:[#allocation2 + $0x24] sm:$0x4] }
  0xa1   : > { %v579_v43 = vpack.c.bf16 %v547_v42, %v547_v42  ;;  %987 = vst [vmem:[#allocation2 + $0x20] sm:$0x4] %v986_v39  ;;  %v5548_v42 = vld [vmem:[%s5838_s19 + $0x60] sm:$0xff]  ;;  %v5550_v39 = vld [vmem:[%s5838_s19 + $0x70] sm:$0xff] }
  0xa2   : > { %5251 = vmatmul.msk.bf16.vlgmr.msra.gmra.mxu1 %vm408_vm0, %v5550_v39 }
  0xa3   : > { %v643_v44 = vrot.slane %v579_v43, 2 }
  0xa4   : > { %v5901_v46 = vpop.f32.mrf.mxu0 }
  0xa5   : > { %v1022_v47 = vld.sshfl [vmem:[#allocation1] sm:$0xff pattern:$0x75643120]  ;;  %v684_v48 = vsel %vm674_vm9, %v579_v43, %v643_v44  ;;  %v685_v49 = vsel %vm678_vm10, %v579_v43, %v643_v44  ;;  %v927_v43 = vsel %vm5856_vm5, 0, %v926_v40  ;;  %v989_v44 = vsel %vm5861_vm7, 0, %v988_v41 }
  0xa6   : > { %v687_v50 = vrot.slane %v685_v49, 2  ;;  %1028 = vst [vmem:[#allocation1 + $0x20] ss:$2 sm:$0xff] %v684_v48  ;;  %v1064_v51 = vshrl.u32 %v1022_v47, 16  ;;  %v1067_v54 = vshll.u32 %v1022_v47, 16 }
  0xa7   : > { %v1026_v52 = vld.sshfl [vmem:[#allocation1 + $0x10] sm:$0xff pattern:$0x75643120]  ;;  %5246 = vmatmul.msk.bf16.gmra.mxu0 %vm408_vm0, %v5545_v45  ;;  %928 = vst [vmem:[#allocation2 + $0x24] sm:$0x1] %v927_v43 }
  0xa8   : > { %1032 = vst [vmem:[#allocation1 + $0x30] ss:$2 sm:$0xff] %v687_v50  ;;  %v1066_v53 = vrot.slane %v1064_v51, 7  ;;  %v1070_v55 = vshrl.u32 %v1026_v52, 16  ;;  %v1073_v60 = vshll.u32 %v1026_v52, 16 }
  0xa9   : > { %990 = vst [vmem:[#allocation2 + $0x24] sm:$0x4] %v989_v44  ;;  %v1198_v30 = vld [vmem:[#allocation2 + $0x20] sm:$0x7]  ;;  %v932_v43 = vld [vmem:[#allocation2 + $0x2c] sm:$0x1] }
  0xaa   : > { %v1069_v58 = vor.u32 %v1067_v54, %v1066_v53  ;;  %v1072_v59 = vrot.slane %v1070_v55, 7  ;;  %v994_v44 = vld [vmem:[#allocation2 + $0x2c] sm:$0x4] }
  0xac   : > { %v5911_v62 = vpop.f32.mrf.mxu0  ;;  %v1181_v63 = vsel %vm5907_vm13, %v1069_v58, %v1180_v57  ;;  %v1075_v0 = vor.u32 %v1073_v60, %v1072_v59  ;;  %v5549_v60 = vld [vmem:[%s5838_s19 + $0x68] sm:$0xff] }
  0xad   : > { %v1029_v1 = vld.sshfl [vmem:[#allocation1 + $0x20] sm:$0xff pattern:$0x75643120]  ;;  %1182 = vst [vmem:[#allocation2 + $0x4] sm:$0x7] %v1181_v63 }
  0xae   : > { %v1076_v2 = vshrl.u32 %v1029_v1, 16  ;;  %v1184_v3 = vsel %vm5907_vm13, %v1075_v0, %v1183_v61  ;;  %v1079_v6 = vshll.u32 %v1029_v1, 16 }
  0xaf   : > { %v1033_v4 = vld.sshfl [vmem:[#allocation1 + $0x30] sm:$0xff pattern:$0x75643120]  ;;  %1185 = vst [vmem:[#allocation2 + $0x8] sm:$0x7] %v1184_v3 }
  0xb0   : > { %v1078_v5 = vrot.slane %v1076_v2, 7  ;;  %v1082_v7 = vshrl.u32 %v1033_v4, 16  ;;  %v1085_v13 = vshll.u32 %v1033_v4, 16  ;;  %v1201_v34 = vld [vmem:[#allocation2 + $0x24] sm:$0x7] }
  0xb2   : > { %v1081_v10 = vor.u32 %v1079_v6, %v1078_v5  ;;  %v1084_v12 = vrot.slane %v1082_v7, 7 }
  0xb4   : > { %v5918_v16 = vpop.f32.mrf.mxu0  ;;  %v1187_v18 = vsel %vm5907_vm13, %v1081_v10, %v1186_v8  ;;  %v1087_v19 = vor.u32 %v1085_v13, %v1084_v12  ;;  %v1192_v8 = vld [vmem:[#allocation2 + $0x18] sm:$0x7] }
  0xb5   : > { %1188 = vst [vmem:[#allocation2 + $0xc] sm:$0x7] %v1187_v18 }
  0xb6   : > { %v1190_v20 = vsel %vm5907_vm13, %v1087_v19, %v1189_v15 }
  0xb7   : > { %5247 = vmatmul.msk.bf16.gmra.mxu0 %vm408_vm0, %v5546_v14  ;;  %1191 = vst [vmem:[#allocation2 + $0x10] sm:$0x7] %v1190_v20  ;;  %v1195_v14 = vld [vmem:[#allocation2 + $0x1c] sm:$0x7] }
  0xbc   : > { %v5925_v21 = vpop.f32.mrf.mxu0 }
  0xc4   : > { %v5928_v23 = vpop.f32.mrf.mxu0 }
  0xc7   : > { %5248 = vmatmul.msk.bf16.gmra.mxu0 %vm408_vm0, %v5547_v22 }
  0xcc   : > { %v5941_v35 = vpop.f32.mrf.mxu0 }
  0xd4   : > { %v486_v45 = vpop.f32.mrf.mxu0 }
  0xd5   : > { %v487_v47 = vadd.f32 %v5888_v26, %v486_v45  ;;  %v933_v45 = vsel %vm5856_vm5, 0, %v932_v43 }
  0xd6   : > { %934 = vst [vmem:[#allocation2 + $0x2c] sm:$0x1] %v933_v45 }
  0xd7   : > { %v554_v48 = vmax.f32 %v487_v47, 0.0  ;;  %5249 = vmatmul.msk.bf16.gmra.mxu0 %vm408_vm0, %v5548_v42  ;;  %v995_v47 = vsel %vm5861_vm7, 0, %v994_v44 }
  0xd8   : > { %996 = vst [vmem:[#allocation2 + $0x2c] sm:$0x4] %v995_v47 }
  0xd9   : > { %v586_v49 = vpack.c.bf16 %v554_v48, %v554_v48  ;;  %v890_v48 = vld [vmem:[#allocation2 + $0x38] sm:$0x7] }
  0xdb   : > { %v650_v50 = vrot.slane %v586_v49, 2 }
  0xdc   : > { %v488_v51 = vpop.f32.mrf.mxu0 }
  0xdd   : > { %v726_v52 = vsel %vm674_vm9, %v586_v49, %v650_v50  ;;  %v727_v53 = vsel %vm678_vm10, %v586_v49, %v650_v50  ;;  %v489_v54 = vadd.f32 %v5888_v26, %v488_v51  ;;  %v935_v49 = vld [vmem:[#allocation2 + $0x30] sm:$0x1]  ;;  %v997_v51 = vld [vmem:[#allocation2 + $0x30] sm:$0x4] }
  0xde   : > { %v729_v55 = vrot.slane %v727_v53, 2  ;;  %1034 = vst [vmem:[#allocation1] ss:$2 sm:$0xff] %v726_v52  ;;  %v936_v50 = vsel %vm5856_vm5, 0, %v935_v49  ;;  %v891_v52 = vsel %vm5871_vm8, 0, %v890_v48  ;;  %v998_v53 = vsel %vm5861_vm7, 0, %v997_v51 }
  0xdf   : > { %v555_v57 = vmax.f32 %v489_v54, 0.0  ;;  %937 = vst [vmem:[#allocation2 + $0x30] sm:$0x1] %v936_v50 }
  0xe0   : > { %1037 = vst [vmem:[#allocation1 + $0x10] ss:$2 sm:$0xff] %v729_v55  ;;  %v938_v55 = vld [vmem:[#allocation2 + $0x34] sm:$0x1] }
  0xe1   : > { %v587_v58 = vpack.c.bf16 %v555_v57, %v555_v57  ;;  %999 = vst [vmem:[#allocation2 + $0x30] sm:$0x4] %v998_v53  ;;  %v1000_v57 = vld [vmem:[#allocation2 + $0x34] sm:$0x4] }
  0xe2   : > { %892 = vst [vmem:[#allocation2 + $0x38] sm:$0x7] %v891_v52  ;;  %v5551_v53 = vld [vmem:[%s5838_s19 + $0x78] sm:$0xff] }
  0xe3   : > { %v651_v59 = vrot.slane %v587_v58, 2  ;;  %5252 = vmatmul.msk.bf16.gmra.mxu1 %vm408_vm0, %v5551_v53 }
  0xe4   : > { %v5958_v61 = vpop.f32.mrf.mxu0 }
  0xe5   : > { %v1035_v63 = vld.sshfl [vmem:[#allocation1] sm:$0xff pattern:$0x75643120]  ;;  %v732_v0 = vsel %vm674_vm9, %v587_v58, %v651_v59  ;;  %v733_v1 = vsel %vm678_vm10, %v587_v58, %v651_v59  ;;  %v939_v58 = vsel %vm5856_vm5, 0, %v938_v55  ;;  %v1001_v59 = vsel %vm5861_vm7, 0, %v1000_v57 }
  0xe6   : > { %v735_v2 = vrot.slane %v733_v1, 2  ;;  %1039 = vst [vmem:[#allocation1 + $0x20] ss:$2 sm:$0xff] %v732_v0  ;;  %v1088_v3 = vshrl.u32 %v1035_v63, 16  ;;  %v1091_v6 = vshll.u32 %v1035_v63, 16 }
  0xe7   : > { %v1038_v4 = vld.sshfl [vmem:[#allocation1 + $0x10] sm:$0xff pattern:$0x75643120]  ;;  %5250 = vmatmul.msk.bf16.gmra.mxu0 %vm408_vm0, %v5549_v60  ;;  %940 = vst [vmem:[#allocation2 + $0x34] sm:$0x1] %v939_v58  ;;  %vm6275_vm0 = vmand %vm1539_vm15, %vm1178_vm12 }
  0xe8   : > { %1042 = vst [vmem:[#allocation1 + $0x30] ss:$2 sm:$0xff] %v735_v2  ;;  %v1090_v5 = vrot.slane %v1088_v3, 7  ;;  %v1094_v7 = vshrl.u32 %v1038_v4, 16  ;;  %v1097_v13 = vshll.u32 %v1038_v4, 16 }
  0xe9   : > { %1002 = vst [vmem:[#allocation2 + $0x34] sm:$0x4] %v1001_v59  ;;  %v941_v60 = vld [vmem:[#allocation2 + $0x38] sm:$0x1]  ;;  %v1003_v63 = vld [vmem:[#allocation2 + $0x38] sm:$0x4] }
  0xea   : > { %v1093_v10 = vor.u32 %v1091_v6, %v1090_v5  ;;  %v1096_v12 = vrot.slane %v1094_v7, 7  ;;  %v942_v0 = vsel %vm5856_vm5, 0, %v941_v60  ;;  %v1004_v1 = vsel %vm5861_vm7, 0, %v1003_v63  ;;  %v1207_v39 = vld [vmem:[#allocation2 + $0x30] sm:$0x7] }
  0xeb   : > { %943 = vst [vmem:[#allocation2 + $0x38] sm:$0x1] %v942_v0 }
  0xec   : > { %v5963_v15 = vpop.f32.mrf.mxu0  ;;  %v1193_v18 = vsel %vm5907_vm13, %v1093_v10, %v1192_v8  ;;  %v1099_v19 = vor.u32 %v1097_v13, %v1096_v12  ;;  %1005 = vst [vmem:[#allocation2 + $0x38] sm:$0x4] %v1004_v1 }
  0xed   : > { %v1040_v20 = vld.sshfl [vmem:[#allocation1 + $0x20] sm:$0xff pattern:$0x75643120]  ;;  %1194 = vst [vmem:[#allocation2 + $0x18] sm:$0x7] %v1193_v18 }
  0xee   : > { %v1100_v22 = vshrl.u32 %v1040_v20, 16  ;;  %v1196_v24 = vsel %vm5907_vm13, %v1099_v19, %v1195_v14  ;;  %v1103_v28 = vshll.u32 %v1040_v20, 16 }
  0xef   : > { %v1043_v25 = vld.sshfl [vmem:[#allocation1 + $0x30] sm:$0xff pattern:$0x75643120]  ;;  %1197 = vst [vmem:[#allocation2 + $0x1c] sm:$0x7] %v1196_v24 }
  0xf0   : > { %v1102_v27 = vrot.slane %v1100_v22, 7  ;;  %v1106_v29 = vshrl.u32 %v1043_v25, 16  ;;  %v1109_v33 = vshll.u32 %v1043_v25, 16  ;;  %v1210_v55 = vld [vmem:[#allocation2 + $0x34] sm:$0x7] }
  0xf2   : > { %v1105_v31 = vor.u32 %v1103_v28, %v1102_v27  ;;  %v1108_v32 = vrot.slane %v1106_v29, 7 }
  0xf3   : > { %v1213_v60 = vld [vmem:[#allocation2 + $0x38] sm:$0x7] }
  0xf4   : > { %v5969_v36 = vpop.f32.mrf.mxu0  ;;  %v1199_v37 = vsel %vm5907_vm13, %v1105_v31, %v1198_v30  ;;  %v1111_v38 = vor.u32 %v1109_v33, %v1108_v32  ;;  %v1204_v33 = vld [vmem:[#allocation2 + $0x2c] sm:$0x7] }
  0xf5   : > { %1200 = vst [vmem:[#allocation2 + $0x20] sm:$0x7] %v1199_v37 }
  0xf6   : > { %v1202_v40 = vsel %vm5907_vm13, %v1111_v38, %v1201_v34 }
  0xf7   : > { %1203 = vst [vmem:[#allocation2 + $0x24] sm:$0x7] %v1202_v40 }
  0xfc   : > { %v5977_v41 = vpop.f32.mrf.mxu0 }
 0x104   : > { %v5979_v42 = vpop.f32.mrf.mxu0 }
 0x10c   : > { %v5991_v54 = vpop.f32.mrf.mxu0 }
 0x114   : > { %v506_v2 = vpop.f32.mrf.mxu0 }
 0x115   : > { %v507_v3 = vadd.f32 %v5888_v26, %v506_v2 }
 0x117   : > { %v562_v4 = vmax.f32 %v507_v3, 0.0 }
 0x119   : > { %v594_v5 = vpack.c.bf16 %v562_v4, %v562_v4 }
 0x11b   : > { %v658_v6 = vrot.slane %v594_v5, 2 }
 0x11c   : > { %v508_v7 = vpop.f32.mrf.mxu0 }
 0x11d   : > { %v774_v8 = vsel %vm674_vm9, %v594_v5, %v658_v6  ;;  %v775_v10 = vsel %vm678_vm10, %v594_v5, %v658_v6  ;;  %v509_v12 = vadd.f32 %v5888_v26, %v508_v7  ;;  %v950_v5 = vld [vmem:[#allocation2 + $0x44] sm:$0x1]  ;;  %v1012_v6 = vld [vmem:[#allocation2 + $0x44] sm:$0x4]  ;;  %v947_v7 = vld [vmem:[#allocation2 + $0x40] sm:$0x1] }
 0x11e   : > { %v777_v13 = vrot.slane %v775_v10, 2  ;;  %1044 = vst [vmem:[#allocation1] ss:$2 sm:$0xff] %v774_v8  ;;  %v951_v8 = vsel %vm5856_vm5, 0, %v950_v5  ;;  %v1013_v10 = vsel %vm5861_vm7, 0, %v1012_v6 }
 0x11f   : > { %v563_v14 = vmax.f32 %v509_v12, 0.0  ;;  %v948_v12 = vsel %vm5856_vm5, 0, %v947_v7  ;;  %952 = vst [vmem:[#allocation2 + $0x44] sm:$0x1] %v951_v8 }
 0x120   : > { %1047 = vst [vmem:[#allocation1 + $0x10] ss:$2 sm:$0xff] %v777_v13  ;;  %v1009_v13 = vld [vmem:[#allocation2 + $0x40] sm:$0x4] }
 0x121   : > { %v595_v18 = vpack.c.bf16 %v563_v14, %v563_v14  ;;  %v1010_v14 = vsel %vm5861_vm7, 0, %v1009_v13  ;;  %1014 = vst [vmem:[#allocation2 + $0x44] sm:$0x4] %v1013_v10 }
 0x122   : > { %949 = vst [vmem:[#allocation2 + $0x40] sm:$0x1] %v948_v12 }
 0x123   : > { %v659_v19 = vrot.slane %v595_v18, 2  ;;  %1011 = vst [vmem:[#allocation2 + $0x40] sm:$0x4] %v1010_v14 }
 0x124   : > { %v6005_v20 = vpop.f32.mrf.mxu0 }
 0x125   : > { %v1045_v22 = vld.sshfl [vmem:[#allocation1] sm:$0xff pattern:$0x75643120]  ;;  %v780_v24 = vsel %vm674_vm9, %v595_v18, %v659_v19  ;;  %v781_v25 = vsel %vm678_vm10, %v595_v18, %v659_v19  ;;  %v953_v19 = vld [vmem:[#allocation2 + $0x48] sm:$0x1] }
 0x126   : > { %v783_v27 = vrot.slane %v781_v25, 2  ;;  %1049 = vst [vmem:[#allocation1 + $0x20] ss:$2 sm:$0xff] %v780_v24  ;;  %v1112_v28 = vshrl.u32 %v1045_v22, 16  ;;  %v1115_v31 = vshll.u32 %v1045_v22, 16  ;;  %v954_v24 = vsel %vm5856_vm5, 0, %v953_v19 }
 0x127   : > { %v1048_v29 = vld.sshfl [vmem:[#allocation1 + $0x10] sm:$0xff pattern:$0x75643120]  ;;  %955 = vst [vmem:[#allocation2 + $0x48] sm:$0x1] %v954_v24 }
 0x128   : > { %1052 = vst [vmem:[#allocation1 + $0x30] ss:$2 sm:$0xff] %v783_v27  ;;  %v1114_v30 = vrot.slane %v1112_v28, 7  ;;  %v1118_v32 = vshrl.u32 %v1048_v29, 16  ;;  %v1121_v38 = vshll.u32 %v1048_v29, 16  ;;  %v472_v29 = vadd.f32 %v5888_v26, %v5901_v46 }
 0x129   : > { %v1015_v22 = vld [vmem:[#allocation2 + $0x48] sm:$0x4]  ;;  %v893_v27 = vld [vmem:[#allocation2 + $0x4c] sm:$0x7] }
 0x12a   : > { %v1117_v34 = vor.u32 %v1115_v31, %v1114_v30  ;;  %v1120_v37 = vrot.slane %v1118_v32, 7  ;;  %v1016_v25 = vsel %vm5861_vm7, 0, %v1015_v22  ;;  %v894_v28 = vsel %vm5871_vm8, 0, %v893_v27 }
 0x12b   : > { %1017 = vst [vmem:[#allocation2 + $0x48] sm:$0x4] %v1016_v25  ;;  %v548_v32 = vmax.f32 %v472_v29, 0.0 }
 0x12c   : > { %v6009_v40 = vpop.f32.mrf.mxu0  ;;  %v1205_v43 = vsel %vm5907_vm13, %v1117_v34, %v1204_v33  ;;  %v1123_v44 = vor.u32 %v1121_v38, %v1120_v37  ;;  %895 = vst [vmem:[#allocation2 + $0x4c] sm:$0x7] %v894_v28  ;;  %v474_v33 = vadd.f32 %v5888_v26, %v5911_v62 }
 0x12d   : > { %v1050_v45 = vld.sshfl [vmem:[#allocation1 + $0x20] sm:$0xff pattern:$0x75643120]  ;;  %1206 = vst [vmem:[#allocation2 + $0x2c] sm:$0x7] %v1205_v43 }
 0x12e   : > { %v1124_v47 = vshrl.u32 %v1050_v45, 16  ;;  %v1208_v48 = vsel %vm5907_vm13, %v1123_v44, %v1207_v39  ;;  %v1127_v51 = vshll.u32 %v1050_v45, 16  ;;  %v492_v39 = vadd.f32 %v5888_v26, %v5958_v61 }
 0x12f   : > { %v1053_v49 = vld.sshfl [vmem:[#allocation1 + $0x30] sm:$0xff pattern:$0x75643120]  ;;  %1209 = vst [vmem:[#allocation2 + $0x30] sm:$0x7] %v1208_v48  ;;  %v580_v45 = vpack.c.bf16 %v548_v32, %v548_v32 }
 0x130   : > { %v1126_v50 = vrot.slane %v1124_v47, 7  ;;  %v1130_v52 = vshrl.u32 %v1053_v49, 16  ;;  %v1133_v59 = vshll.u32 %v1053_v49, 16  ;;  %v549_v47 = vmax.f32 %v474_v33, 0.0  ;;  %v1216_v33 = vld [vmem:[#allocation2 + $0x40] sm:$0x7] }
 0x131   : > { %v556_v62 = vmax.f32 %v492_v39, 0.0  ;;  %v644_v53 = vrot.slane %v580_v45, 2 }
 0x132   : > { %v1129_v57 = vor.u32 %v1127_v51, %v1126_v50  ;;  %v1132_v58 = vrot.slane %v1130_v52, 7 }
 0x133   : > { %v956_v37 = vld [vmem:[#allocation2 + $0x4c] sm:$0x1]  ;;  %v1018_v38 = vld [vmem:[#allocation2 + $0x4c] sm:$0x4]  ;;  %v690_v6 = vsel %vm674_vm9, %v580_v45, %v644_v53 }
 0x134   : > { %v6017_v63 = vpop.f32.mrf.mxu0  ;;  %v1211_v0 = vsel %vm5907_vm13, %v1129_v57, %v1210_v55  ;;  %v1135_v1 = vor.u32 %v1133_v59, %v1132_v58  ;;  %v957_v44 = vsel %vm5856_vm5, 0, %v956_v37  ;;  %v1019_v46 = vsel %vm5861_vm7, 0, %v1018_v38 }
 0x135   : > { %1212 = vst [vmem:[#allocation2 + $0x34] sm:$0x7] %v1211_v0  ;;  %v581_v55 = vpack.c.bf16 %v549_v47, %v549_v47  ;;  %v494_v58 = vadd.f32 %v5888_v26, %v5963_v15  ;;  %v588_v59 = vpack.c.bf16 %v556_v62, %v556_v62 }
 0x136   : > { %v1214_v2 = vsel %vm5907_vm13, %v1135_v1, %v1213_v60  ;;  %958 = vst [vmem:[#allocation2 + $0x4c] sm:$0x1] %v957_v44  ;;  %v512_v60 = vadd.f32 %v5888_v26, %v6005_v20  ;;  %v691_v1 = vsel %vm678_vm10, %v580_v45, %v644_v53 }
 0x137   : > { %1215 = vst [vmem:[#allocation2 + $0x38] sm:$0x7] %v1214_v2  ;;  %v645_v2 = vrot.slane %v581_v55, 2  ;;  %v557_v7 = vmax.f32 %v494_v58, 0.0  ;;  %v652_v8 = vrot.slane %v588_v59, 2  ;;  %v693_v14 = vrot.slane %v691_v1, 2 }
 0x138   : > { %1020 = vst [vmem:[#allocation2 + $0x4c] sm:$0x4] %v1019_v46  ;;  %v564_v10 = vmax.f32 %v512_v60, 0.0 }
 0x139   : > { %v697_v20 = vsel %vm678_vm10, %v581_v55, %v645_v2  ;;  %v589_v27 = vpack.c.bf16 %v557_v7, %v557_v7  ;;  %v738_v62 = vsel %vm674_vm9, %v588_v59, %v652_v8 }
 0x13a   : > { %v596_v32 = vpack.c.bf16 %v564_v10, %v564_v10 }
 0x13b   : > { %v653_v45 = vrot.slane %v589_v27, 2 }
 0x13c   : > { %v6023_v3 = vpop.f32.mrf.mxu0 }
 0x144   : > { %v6025_v4 = vpop.f32.mrf.mxu0 }
 0x14c   : > { %v6035_v18 = vpop.f32.mrf.mxu0 }
 0x154   : > { %v526_v30 = vpop.f32.mrf.mxu0 }
 0x155   : > { %v527_v31 = vadd.f32 %v5888_v26, %v526_v30 }
 0x157   : > { %v570_v34 = vmax.f32 %v527_v31, 0.0  ;;  %v739_v31 = vsel %vm678_vm10, %v588_v59, %v652_v8  ;;  %v477_v59 = vadd.f32 %v5888_v26, %v5918_v16 }
 0x158   : > { %v741_v46 = vrot.slane %v739_v31, 2 }
 0x159   : > { %v602_v43 = vpack.c.bf16 %v570_v34, %v570_v34  ;;  %v514_v34 = vadd.f32 %v5888_v26, %v6009_v40  ;;  %v696_v40 = vsel %vm674_vm9, %v581_v55, %v645_v2  ;;  %v745_v55 = vsel %vm678_vm10, %v589_v27, %v653_v45 }
 0x15b   : > { %v666_v48 = vrot.slane %v602_v43, 2 }
 0x15c   : > { %v528_v49 = vpop.f32.mrf.mxu0 }
 0x15d   : > { %v822_v50 = vsel %vm674_vm9, %v602_v43, %v666_v48  ;;  %v823_v51 = vsel %vm678_vm10, %v602_v43, %v666_v48  ;;  %v529_v61 = vadd.f32 %v5888_v26, %v528_v49  ;;  %v699_v43 = vrot.slane %v697_v20, 2  ;;  %v1219_v48 = vld [vmem:[#allocation2 + $0x44] sm:$0x7] }
 0x15e   : > { %v825_v52 = vrot.slane %v823_v51, 2  ;;  %1054 = vst [vmem:[#allocation1] ss:$2 sm:$0xff] %v822_v50  ;;  %v660_v50 = vrot.slane %v596_v32, 2 }
 0x15f   : > { %v571_v57 = vmax.f32 %v529_v61, 0.0  ;;  %v565_v61 = vmax.f32 %v514_v34, 0.0 }
 0x160   : > { %1057 = vst [vmem:[#allocation1 + $0x10] ss:$2 sm:$0xff] %v825_v52  ;;  %v786_v20 = vsel %vm674_vm9, %v596_v32, %v660_v50 }
 0x161   : > { %v603_v0 = vpack.c.bf16 %v571_v57, %v571_v57 }
 0x163   : > { %v667_v5 = vrot.slane %v603_v0, 2 }
 0x164   : > { %v531_v25 = vpop.f32.mrf.mxu0 }
 0x165   : > { %v1055_v12 = vld.sshfl [vmem:[#allocation1] sm:$0xff pattern:$0x75643120]  ;;  %v828_v13 = vsel %vm674_vm9, %v603_v0, %v667_v5  ;;  %v829_v15 = vsel %vm678_vm10, %v603_v0, %v667_v5  ;;  %v532_v44 = vadd.f32 %v5888_v26, %v531_v25  ;;  %v787_v5 = vsel %vm678_vm10, %v596_v32, %v660_v50 }
 0x166   : > { %1228 = vst [vmem:[#allocation1] ss:$2 sm:$0xff] %v690_v6  ;;  %v831_v19 = vrot.slane %v829_v15, 2  ;;  %v1136_v22 = vshrl.u32 %v1055_v12, 16  ;;  %v1139_v30 = vshll.u32 %v1055_v12, 16  ;;  %v597_v6 = vpack.c.bf16 %v565_v61, %v565_v61 }
 0x167   : > { %v1058_v24 = vld.sshfl [vmem:[#allocation1 + $0x10] sm:$0xff pattern:$0x75643120]  ;;  %1059 = vst [vmem:[#allocation1 + $0x20] ss:$2 sm:$0xff] %v828_v13  ;;  %v572_v57 = vmax.f32 %v532_v44, 0.0  ;;  %v479_v44 = vadd.f32 %v5888_v26, %v5925_v21 }
 0x168   : > { %1233 = vst [vmem:[#allocation1 + $0x10] ss:$2 sm:$0xff] %v693_v14  ;;  %v1142_v28 = vshrl.u32 %v1058_v24, 16  ;;  %v1138_v29 = vrot.slane %v1136_v22, 7  ;;  %v1145_v38 = vshll.u32 %v1058_v24, 16  ;;  %v550_v15 = vmax.f32 %v477_v59, 0.0 }
 0x169   : > { %1062 = vst [vmem:[#allocation1 + $0x30] ss:$2 sm:$0xff] %v831_v19  ;;  %v604_v10 = vpack.c.bf16 %v572_v57, %v572_v57  ;;  %v747_v14 = vrot.slane %v745_v55, 2  ;;  %v1222_v22 = vld [vmem:[#allocation2 + $0x48] sm:$0x7]  ;;  %v789_v24 = vrot.slane %v787_v5, 2  ;;  %v517_v59 = vadd.f32 %v5888_v26, %v6017_v63  ;;  %v536_v5 = vpop.f32.mrf.mxu1 }
 0x16a   : > { %v1144_v37 = vrot.slane %v1142_v28, 7  ;;  %v1141_v39 = vor.u32 %v1139_v30, %v1138_v29  ;;  %v1225_v29 = vld [vmem:[#allocation2 + $0x4c] sm:$0x7]  ;;  %v744_v30 = vsel %vm674_vm9, %v589_v27, %v653_v45  ;;  %v661_v31 = vrot.slane %v597_v6, 2 }
 0x16b   : > { %v582_v27 = vpack.c.bf16 %v550_v15, %v550_v15 }
 0x16c   : > { %v1147_v47 = vor.u32 %v1145_v38, %v1144_v37  ;;  %v1217_v49 = vsel %vm5907_vm13, %v1141_v39, %v1216_v33  ;;  %v533_v1 = vpop.f32.mrf.mxu0  ;;  %v668_v37 = vrot.slane %v604_v10, 2 }
 0x16d   : > { %v1229_v51 = vld.sshfl [vmem:[#allocation1] sm:$0xff pattern:$0x75643120]  ;;  %1218 = vst [vmem:[#allocation2 + $0x40] sm:$0x7] %v1217_v49  ;;  %v534_v16 = vadd.f32 %v5888_v26, %v533_v1  ;;  %v646_v49 = vrot.slane %v582_v27, 2 }
 0x16e   : > { %1245 = vst [vmem:[#allocation1] ss:$2 sm:$0xff] %v738_v62  ;;  %v1060_v52 = vld.sshfl [vmem:[#allocation1 + $0x20] sm:$0xff pattern:$0x75643120]  ;;  %1287 = vrot.lane.b32.xlu0 %v1229_v51, %s5737_s22  ;;  %v1220_v58 = vsel %vm5907_vm13, %v1147_v47, %v1219_v48  ;;  %v835_v45 = vsel %vm678_vm10, %v604_v10, %v668_v37  ;;  %v793_v47 = vsel %vm678_vm10, %v597_v6, %v661_v31  ;;  %v551_v62 = vmax.f32 %v479_v44, 0.0 }
 0x16f   : > { %v1234_v53 = vld.sshfl [vmem:[#allocation1 + $0x10] sm:$0xff pattern:$0x75643120]  ;;  %1237 = vst [vmem:[#allocation1 + $0x20] ss:$2 sm:$0xff] %v696_v40  ;;  %v1148_v0 = vshrl.u32 %v1060_v52, 16  ;;  %v834_v56 = vsel %vm674_vm9, %v604_v10, %v668_v37  ;;  %v792_v40 = vsel %vm674_vm9, %v597_v6, %v661_v31  ;;  %v702_v6 = vsel %vm674_vm9, %v582_v27, %v646_v49 }
 0x170   : > { %1249 = vst [vmem:[#allocation1 + $0x10] ss:$2 sm:$0xff] %v741_v46  ;;  %v1063_v60 = vld.sshfl [vmem:[#allocation1 + $0x30] sm:$0xff pattern:$0x75643120]  ;;  %v1151_v8 = vshll.u32 %v1060_v52, 16  ;;  %v497_v46 = vadd.f32 %v5888_v26, %v5969_v36  ;;  %v583_v55 = vpack.c.bf16 %v551_v62, %v551_v62 }
 0x171   : > { %1242 = vst [vmem:[#allocation1 + $0x30] ss:$2 sm:$0xff] %v699_v43  ;;  %v1154_v2 = vshrl.u32 %v1063_v60, 16  ;;  %v1150_v7 = vrot.slane %v1148_v0, 7  ;;  %v1157_v13 = vshll.u32 %v1063_v60, 16  ;;  %v573_v39 = vmax.f32 %v534_v16, 0.0 }
 0x172   : > { %1221 = vst [vmem:[#allocation2 + $0x44] sm:$0x7] %v1220_v58  ;;  %v558_v50 = vmax.f32 %v497_v46, 0.0  ;;  %v837_v61 = vrot.slane %v835_v45, 2  ;;  %v795_v36 = vrot.slane %v793_v47, 2  ;;  %v703_v60 = vsel %vm678_vm10, %v582_v27, %v646_v49 }
 0x173   : > { %v1156_v12 = vrot.slane %v1154_v2, 7  ;;  %v1153_v19 = vor.u32 %v1151_v8, %v1150_v7  ;;  %v605_v48 = vpack.c.bf16 %v573_v39, %v573_v39  ;;  %v705_v7 = vrot.slane %v703_v60, 2 }
 0x174   : > { %v590_v0 = vpack.c.bf16 %v558_v50, %v558_v50  ;;  %v566_v8 = vmax.f32 %v517_v59, 0.0 }
 0x175   : > { %v1246_v25 = vld.sshfl [vmem:[#allocation1] sm:$0xff pattern:$0x75643120]  ;;  %v1159_v28 = vor.u32 %v1157_v13, %v1156_v12  ;;  %v1223_v38 = vsel %vm5907_vm13, %v1153_v19, %v1222_v22  ;;  %v669_v58 = vrot.slane %v605_v48, 2 }
 0x176   : > { %1259 = vst [vmem:[#allocation1] ss:$2 sm:$0xff] %v786_v20  ;;  %v1238_v33 = vld.sshfl [vmem:[#allocation1 + $0x20] sm:$0xff pattern:$0x75643120]  ;;  %1289 = vrot.lane.b32.xlu0 %v1234_v53, %s5737_s22  ;;  %v499_v53 = vadd.f32 %v5888_v26, %v5977_v41  ;;  %v654_v10 = vrot.slane %v590_v0, 2  ;;  %v598_v22 = vpack.c.bf16 %v566_v8, %v566_v8  ;;  %v519_v20 = vadd.f32 %v5888_v26, %v6023_v3 }
 0x177   : > { %v1250_v34 = vld.sshfl [vmem:[#allocation1 + $0x10] sm:$0xff pattern:$0x75643120]  ;;  %1252 = vst [vmem:[#allocation1 + $0x20] ss:$2 sm:$0xff] %v744_v30  ;;  %1291 = vrot.lane.b32.xlu1 %v1238_v33, %s5737_s22  ;;  %v1226_v43 = vsel %vm5907_vm13, %v1159_v28, %v1225_v29  ;;  %v841_v2 = vsel %vm678_vm10, %v605_v48, %v669_v58  ;;  %v840_v12 = vsel %vm674_vm9, %v605_v48, %v669_v58 }
 0x178   : > { %1263 = vst [vmem:[#allocation1 + $0x10] ss:$2 sm:$0xff] %v789_v24  ;;  %v1243_v32 = vld.sshfl [vmem:[#allocation1 + $0x30] sm:$0xff pattern:$0x75643120]  ;;  %v559_v1 = vmax.f32 %v499_v53, 0.0  ;;  %v537_v24 = vadd.f32 %v5888_v26, %v536_v5  ;;  %v750_v30 = vsel %vm674_vm9, %v590_v0, %v654_v10  ;;  %v482_v3 = vadd.f32 %v5888_v26, %v5928_v23 }
 0x179   : > { %1256 = vst [vmem:[#allocation1 + $0x30] ss:$2 sm:$0xff] %v747_v14  ;;  %v843_v15 = vrot.slane %v841_v2, 2  ;;  %v647_v14 = vrot.slane %v583_v55, 2  ;;  %v662_v31 = vrot.slane %v598_v22, 2  ;;  %v567_v33 = vmax.f32 %v519_v20, 0.0 }
 0x17a   : > { %1224 = vst [vmem:[#allocation2 + $0x48] sm:$0x7] %v1223_v38  ;;  %v591_v16 = vpack.c.bf16 %v559_v1, %v559_v1  ;;  %v574_v37 = vmax.f32 %v537_v24, 0.0  ;;  %v552_v50 = vmax.f32 %v482_v3, 0.0  ;;  %v484_v2 = vadd.f32 %v5888_v26, %v5941_v35 }
 0x17b   : > { %1227 = vst [vmem:[#allocation2 + $0x4c] sm:$0x7] %v1226_v43  ;;  %v709_v28 = vsel %vm678_vm10, %v583_v55, %v647_v14  ;;  %v708_v38 = vsel %vm674_vm9, %v583_v55, %v647_v14  ;;  %v538_v43 = vpop.f32.mrf.mxu1  ;;  %v799_v48 = vsel %vm678_vm10, %v598_v22, %v662_v31  ;;  %v599_v49 = vpack.c.bf16 %v567_v33, %v567_v33 }
 0x17c   : > { %v655_v29 = vrot.slane %v591_v16, 2  ;;  %v711_v27 = vrot.slane %v709_v28, 2  ;;  %v606_v23 = vpack.c.bf16 %v574_v37, %v574_v37  ;;  %v539_v62 = vadd.f32 %v5888_v26, %v538_v43 }
 0x17d   : > { %v1260_v51 = vld.sshfl [vmem:[#allocation1] sm:$0xff pattern:$0x75643120]  ;;  %v663_v53 = vrot.slane %v599_v49, 2  ;;  %v584_v60 = vpack.c.bf16 %v552_v50, %v552_v50  ;;  %v553_v20 = vmax.f32 %v484_v2, 0.0 }
 0x17e   : > { %v1253_v21 = vld.sshfl [vmem:[#allocation1 + $0x20] sm:$0xff pattern:$0x75643120]  ;;  %1273 = vst [vmem:[#allocation1] ss:$2 sm:$0xff] %v834_v56  ;;  %1295 = vrot.lane.b32.xlu0 %v1246_v25, %s5737_s22  ;;  %v751_v25 = vsel %vm678_vm10, %v590_v0, %v654_v10  ;;  %v757_v46 = vsel %vm678_vm10, %v591_v16, %v655_v29  ;;  %v670_v58 = vrot.slane %v606_v23, 2  ;;  %v756_v0 = vsel %vm674_vm9, %v591_v16, %v655_v29 }
 0x17f   : > { %v6099_v52 = vld.sshfl [vmem:[#allocation1 + $0x10] sm:$0xff pattern:$0x75643120]  ;;  %1266 = vst [vmem:[#allocation1 + $0x20] ss:$2 sm:$0xff] %v792_v40  ;;  %1293 = vrot.lane.b32.xlu1 %v1243_v32, %s5737_s22  ;;  %1299 = vrot.lane.b32.xlu2 %v1253_v21, %s5737_s22  ;;  %v753_v32 = vrot.slane %v751_v25, 2  ;;  %v805_v35 = vsel %vm678_vm10, %v599_v49, %v663_v53  ;;  %v804_v37 = vsel %vm674_vm9, %v599_v49, %v663_v53 }
 0x180   : > { %v1257_v57 = vld.sshfl [vmem:[#allocation1 + $0x30] sm:$0xff pattern:$0x75643120]  ;;  %1277 = vst [vmem:[#allocation1 + $0x10] ss:$2 sm:$0xff] %v837_v61  ;;  %v759_v40 = vrot.slane %v757_v46, 2  ;;  %v6157_v43 = vpack.c.bf16 %v553_v20, %v553_v20 }
 0x181   : > { %1270 = vst [vmem:[#allocation1 + $0x30] ss:$2 sm:$0xff] %v795_v36  ;;  %v801_v21 = vrot.slane %v799_v48, 2  ;;  %v798_v36 = vsel %vm674_vm9, %v598_v22, %v662_v31  ;;  %v575_v59 = vmax.f32 %v539_v62, 0.0  ;;  %v648_v14 = vrot.slane %v584_v60, 2 }
 0x185   : > { %v6110_v41 = vld.sshfl [vmem:[#allocation1] sm:$0xff pattern:$0x75643120] }
 0x186   : > { %1352 = vst [vmem:[#allocation1] ss:$2 sm:$0xff] %v702_v6  ;;  %v1267_v63 = vld.sshfl [vmem:[#allocation1 + $0x20] sm:$0xff pattern:$0x75643120]  ;;  %1303 = vrot.lane.b32.xlu0 %v1260_v51, %s5737_s22 }
 0x187   : > { %v6114_v13 = vld.sshfl [vmem:[#allocation1 + $0x10] sm:$0xff pattern:$0x75643120]  ;;  %1280 = vst [vmem:[#allocation1 + $0x20] ss:$2 sm:$0xff] %v840_v12  ;;  %1307 = vrot.lane.b32.xlu2 %v1267_v63, %s5737_s22  ;;  %1297 = vrot.lane.b32.xlu1 %v1250_v34, %s5737_s22  ;;  %v847_v12 = vsel %vm678_vm10, %v606_v23, %v670_v58  ;;  %v607_v63 = vpack.c.bf16 %v575_v59, %v575_v59 }
 0x188   : > { %v6118_v19 = vld.sshfl [vmem:[#allocation1 + $0x30] sm:$0xff pattern:$0x75643120]  ;;  %1356 = vst [vmem:[#allocation1 + $0x10] ss:$2 sm:$0xff] %v705_v7  ;;  %v502_v7 = vadd.f32 %v5888_v26, %v5979_v42  ;;  %v849_v26 = vrot.slane %v847_v12, 2 }
 0x189   : > { %1284 = vst [vmem:[#allocation1 + $0x30] ss:$2 sm:$0xff] %v843_v15  ;;  %v807_v42 = vrot.slane %v805_v35, 2 }
 0x18a   : > { %v560_v28 = vmax.f32 %v502_v7, 0.0 }
 0x18c   : > { %v592_v46 = vpack.c.bf16 %v560_v28, %v560_v28 }
 0x18d   : > { %v6126_v34 = vld.sshfl [vmem:[#allocation1] sm:$0xff pattern:$0x75643120] }
 0x18e   : > { %1365 = vst [vmem:[#allocation1] ss:$2 sm:$0xff] %v750_v30  ;;  %v6131_v39 = vld.sshfl [vmem:[#allocation1 + $0x20] sm:$0xff pattern:$0x75643120]  ;;  %v671_v30 = vrot.slane %v607_v63, 2 }
 0x18f   : > { %v1357_v44 = vld.sshfl [vmem:[#allocation1 + $0x10] sm:$0xff pattern:$0x75643120]  ;;  %1359 = vst [vmem:[#allocation1 + $0x20] ss:$2 sm:$0xff] %v708_v38  ;;  %1301 = vrot.lane.b32.xlu1 %v1257_v57, %s5737_s22  ;;  %v1395_v33 = vshrl.u32 %v6126_v34, 16 }
 0x190   : > { %1368 = vst [vmem:[#allocation1 + $0x10] ss:$2 sm:$0xff] %v753_v32  ;;  %v6135_v45 = vld.sshfl [vmem:[#allocation1 + $0x30] sm:$0xff pattern:$0x75643120]  ;;  %v1401_v47 = vshrl.u32 %v1357_v44, 16  ;;  %v715_v32 = vsel %vm678_vm10, %v584_v60, %v648_v14  ;;  %v852_v59 = vsel %vm674_vm9, %v607_v63, %v671_v30 }
 0x191   : > { %1363 = vst [vmem:[#allocation1 + $0x30] ss:$2 sm:$0xff] %v711_v27  ;;  %v1404_v51 = vshll.u32 %v1357_v44, 16  ;;  %v1397_v50 = vrot.slane %v1395_v33, 7  ;;  %v1398_v53 = vshll.u32 %v6126_v34, 16 }
 0x192   : > { %v1403_v56 = vrot.slane %v1401_v47, 7  ;;  %v6167_v47 = vld [vmem:[%s7384_s2] ss:$0 sm:$0xff] }
 0x193   : > { %v504_v48 = vadd.f32 %v6167_v47, %v5991_v54  ;;  %v522_v49 = vadd.f32 %v6167_v47, %v6025_v4  ;;  %v656_v4 = vrot.slane %v592_v46, 2  ;;  %v524_v35 = vadd.f32 %v6167_v47, %v6035_v18 }
 0x194   : > { %v1406_v61 = vor.u32 %v1404_v51, %v1403_v56  ;;  %v714_v56 = vsel %vm674_vm9, %v584_v60, %v648_v14  ;;  %v853_v51 = vsel %vm678_vm10, %v607_v63, %v671_v30 }
 0x195   : > { %v1366_v57 = vld.sshfl [vmem:[#allocation1] sm:$0xff pattern:$0x75643120]  ;;  %v855_v60 = vrot.slane %v853_v51, 2  ;;  %v763_v14 = vsel %vm678_vm10, %v592_v46, %v656_v4  ;;  %v569_v18 = vmax.f32 %v524_v35, 0.0 }
 0x196   : > { %1375 = vst [vmem:[#allocation1] ss:$2 sm:$0xff] %v798_v36  ;;  %v1360_v55 = vld.sshfl [vmem:[#allocation1 + $0x20] sm:$0xff pattern:$0x75643120]  ;;  %1493 = vrot.lane.b32.xlu2 %v1406_v61, %s5738_s23  ;;  %v1419_v1 = vshrl.u32 %v1366_v57, 16 }
 0x197   : > { %v6144_v5 = vld.sshfl [vmem:[#allocation1 + $0x10] sm:$0xff pattern:$0x75643120]  ;;  %1370 = vst [vmem:[#allocation1 + $0x20] ss:$2 sm:$0xff] %v756_v0  ;;  %1305 = vrot.lane.b32.xlu1 %v6099_v52, %s5737_s22  ;;  %v1422_v6 = vshll.u32 %v1366_v57, 16  ;;  %v846_v52 = vsel %vm674_vm9, %v606_v23, %v670_v58 }
 0x198   : > { %1378 = vst [vmem:[#allocation1 + $0x10] ss:$2 sm:$0xff] %v801_v21  ;;  %v1364_v8 = vld.sshfl [vmem:[#allocation1 + $0x30] sm:$0xff pattern:$0x75643120]  ;;  %v1421_v10 = vrot.slane %v1419_v1, 7  ;;  %v1400_v1 = vor.u32 %v1398_v53, %v1397_v50 }
 0x199   : > { %1373 = vst [vmem:[#allocation1 + $0x30] ss:$2 sm:$0xff] %v759_v40  ;;  %v1407_v15 = vshrl.u32 %v1360_v55, 16  ;;  %v1413_v22 = vshrl.u32 %v1364_v8, 16  ;;  %v1410_v25 = vshll.u32 %v1360_v55, 16  ;;  %v1416_v62 = vshll.u32 %v1364_v8, 16 }
 0x19a   : > { %v1424_v16 = vor.u32 %v1422_v6, %v1421_v10  ;;  %v717_v61 = vrot.slane %v715_v32, 2  ;;  %v649_v36 = vrot.slane %v6157_v43, 2  ;;  %v561_v57 = vmax.f32 %v504_v48, 0.0 }
 0x19b   : > { %v1409_v24 = vrot.slane %v1407_v15, 7  ;;  %v1415_v3 = vrot.slane %v1413_v22, 7  ;;  %v568_v58 = vmax.f32 %v522_v49, 0.0  ;;  %v1425_v2 = vshrl.u32 %v6144_v5, 16 }
 0x19c   : > { %1499 = vrot.lane.b32.xlu0 %v1424_v16, %s5738_s23  ;;  %v593_v10 = vpack.c.bf16 %v561_v57, %v561_v57  ;;  %v1428_v28 = vshll.u32 %v6144_v5, 16 }
 0x19d   : > { %v1376_v29 = vld.sshfl [vmem:[#allocation1] sm:$0xff pattern:$0x75643120]  ;;  %v1412_v31 = vor.u32 %v1410_v25, %v1409_v24  ;;  %v1418_v40 = vor.u32 %v1416_v62, %v1415_v3  ;;  %v600_v12 = vpack.c.bf16 %v568_v58, %v568_v58  ;;  %v1427_v22 = vrot.slane %v1425_v2, 7  ;;  %v541_v62 = vpop.f32.mrf.mxu1 }
 0x19e   : > { %v1371_v38 = vld.sshfl [vmem:[#allocation1 + $0x20] sm:$0xff pattern:$0x75643120]  ;;  %1385 = vst [vmem:[#allocation1] ss:$2 sm:$0xff] %v846_v52  ;;  %v1443_v21 = vshrl.u32 %v1376_v29, 16  ;;  %v721_v24 = vsel %vm678_vm10, %v6157_v43, %v649_v36  ;;  %v720_v3 = vsel %vm674_vm9, %v6157_v43, %v649_v36 }
 0x19f   : > { %1380 = vst [vmem:[#allocation1 + $0x20] ss:$2 sm:$0xff] %v804_v37  ;;  %v6159_v27 = vld.sshfl [vmem:[#allocation1 + $0x10] sm:$0xff pattern:$0x75643120]  ;;  %1309 = vrot.lane.b32.xlu1 %v6118_v19, %s5737_s22  ;;  %1495 = vrot.lane.b32.xlu2 %v1412_v31, %s5738_s23  ;;  %v1431_v44 = vshrl.u32 %v1371_v38, 16  ;;  %v1430_v37 = vor.u32 %v1428_v28, %v1427_v22 }
 0x1a0   : > { %v6173_v23 = vld.sshfl [vmem:[#allocation1 + $0x30] sm:$0xff pattern:$0x75643120]  ;;  %1388 = vst [vmem:[#allocation1 + $0x10] ss:$2 sm:$0xff] %v849_v26  ;;  %v1434_v54 = vshll.u32 %v1371_v38, 16  ;;  %v762_v26 = vsel %vm674_vm9, %v592_v46, %v656_v4 }
 0x1a1   : > { %1383 = vst [vmem:[#allocation1 + $0x30] ss:$2 sm:$0xff] %v807_v42  ;;  %v1433_v19 = vrot.slane %v1431_v44, 7  ;;  %v1445_v7 = vrot.slane %v1443_v21, 7  ;;  %v1446_v15 = vshll.u32 %v1376_v29, 16  ;;  %v1437_v52 = vshrl.u32 %v6173_v23, 16 }
 0x1a2   : > { %v765_v42 = vrot.slane %v763_v14, 2  ;;  %v657_v29 = vrot.slane %v593_v10, 2  ;;  %v664_v30 = vrot.slane %v600_v12, 2  ;;  %v1449_v38 = vshrl.u32 %v6159_v27, 16 }
 0x1a3   : > { %v1436_v55 = vor.u32 %v1434_v54, %v1433_v19  ;;  %v1448_v20 = vor.u32 %v1446_v15, %v1445_v7  ;;  %v1439_v5 = vrot.slane %v1437_v52, 7  ;;  %v723_v44 = vrot.slane %v721_v24, 2 }
 0x1a4   : > { %1497 = vrot.lane.b32.xlu0 %v1418_v40, %s5738_s23  ;;  %v1440_v49 = vshll.u32 %v6173_v23, 16  ;;  %v769_v43 = vsel %vm678_vm10, %v593_v10, %v657_v29  ;;  %v601_v19 = vpack.c.bf16 %v569_v18, %v569_v18  ;;  %v1451_v50 = vrot.slane %v1449_v38, 7 }
 0x1a5   : > { %v6181_v0 = vld.sshfl [vmem:[#allocation1] sm:$0xff pattern:$0x75643120]  ;;  %v811_v51 = vsel %vm678_vm10, %v600_v12, %v664_v30  ;;  %v771_v54 = vrot.slane %v769_v43, 2  ;;  %v810_v53 = vsel %vm674_vm9, %v600_v12, %v664_v30 }
 0x1a6   : > { %1589 = vst [vmem:[#allocation1] ss:$2 sm:$0xff] %v714_v56  ;;  %v1381_v6 = vld.sshfl [vmem:[#allocation1 + $0x20] sm:$0xff pattern:$0x75643120]  ;;  %v542_v56 = vadd.f32 %v6167_v47, %v541_v62  ;;  %v1442_v40 = vor.u32 %v1440_v49, %v1439_v5  ;;  %v813_v23 = vrot.slane %v811_v51, 2 }
 0x1a7   : > { %v6184_v8 = vld.sshfl [vmem:[#allocation1 + $0x10] sm:$0xff pattern:$0x75643120]  ;;  %1390 = vst [vmem:[#allocation1 + $0x20] ss:$2 sm:$0xff] %v852_v59  ;;  %1503 = vrot.lane.b32.xlu2 %v1436_v55, %s5738_s23  ;;  %1491 = vrot.lane.b32.xlu1 %v1400_v1, %s5738_s23  ;;  %v1455_v34 = vshrl.u32 %v1381_v6, 16 }
 0x1a8   : > { %1594 = vst [vmem:[#allocation1 + $0x10] ss:$2 sm:$0xff] %v717_v61  ;;  %v6188_v63 = vld.sshfl [vmem:[#allocation1 + $0x30] sm:$0xff pattern:$0x75643120]  ;;  %v1458_v25 = vshll.u32 %v1381_v6, 16 }
 0x1a9   : > { %1393 = vst [vmem:[#allocation1 + $0x30] ss:$2 sm:$0xff] %v855_v60  ;;  %v1457_v16 = vrot.slane %v1455_v34, 7  ;;  %v1461_v21 = vshrl.u32 %v6188_v63, 16  ;;  %v1452_v61 = vshll.u32 %v6159_v27, 16  ;;  %v576_v36 = vmax.f32 %v542_v56, 0.0  ;;  %v543_v34 = vpop.f32.mrf.mxu1 }
 0x1aa   : > { %v665_v4 = vrot.slane %v601_v19, 2  ;;  %v768_v60 = vsel %vm674_vm9, %v593_v10, %v657_v29  ;;  %v1464_v7 = vshll.u32 %v6188_v63, 16  ;;  %v544_v10 = vadd.f32 %v6167_v47, %v543_v34 }
 0x1ab   : > { %v1460_v33 = vor.u32 %v1458_v25, %v1457_v16  ;;  %v1454_v58 = vor.u32 %v1452_v61, %v1451_v50  ;;  %v608_v59 = vpack.c.bf16 %v576_v36, %v576_v36  ;;  %v1463_v1 = vrot.slane %v1461_v21, 7 }
 0x1ac   : > { %1507 = vrot.lane.b32.xlu0 %v1448_v20, %s5738_s23  ;;  %v817_v14 = vsel %vm678_vm10, %v601_v19, %v665_v4  ;;  %v577_v16 = vmax.f32 %v544_v10, 0.0  ;;  %v816_v24 = vsel %vm674_vm9, %v601_v19, %v665_v4  ;;  %v1467_v38 = vshrl.u32 %v6181_v0, 16 }
 0x1ad   : > { %v1590_v31 = vld.sshfl [vmem:[#allocation1] sm:$0xff pattern:$0x75643120]  ;;  %v672_v27 = vrot.slane %v608_v59, 2  ;;  %v1466_v15 = vor.u32 %v1464_v7, %v1463_v1  ;;  %v819_v63 = vrot.slane %v817_v14, 2  ;;  %v1470_v5 = vshll.u32 %v6181_v0, 16 }
 0x1ae   : > { %1606 = vst [vmem:[#allocation1] ss:$2 sm:$0xff] %v762_v26  ;;  %v6202_v32 = vld.sshfl [vmem:[#allocation1 + $0x20] sm:$0xff pattern:$0x75643120]  ;;  %v609_v52 = vpack.c.bf16 %v577_v16, %v577_v16 }
 0x1af   : > { %v6204_v46 = vld.sshfl [vmem:[#allocation1 + $0x10] sm:$0xff pattern:$0x75643120]  ;;  %1598 = vst [vmem:[#allocation1 + $0x20] ss:$2 sm:$0xff] %v720_v3  ;;  %1511 = vrot.lane.b32.xlu2 %v1460_v33, %s5738_s23  ;;  %1501 = vrot.lane.b32.xlu1 %v1430_v37, %s5738_s23  ;;  %v859_v12 = vsel %vm678_vm10, %v608_v59, %v672_v27  ;;  %v858_v35 = vsel %vm674_vm9, %v608_v59, %v672_v27  ;;  %v1476_v37 = vshll.u32 %v6184_v8, 16 }
 0x1b0   : > { %1610 = vst [vmem:[#allocation1 + $0x10] ss:$2 sm:$0xff] %v765_v42  ;;  %v6208_v48 = vld.sshfl [vmem:[#allocation1 + $0x30] sm:$0xff pattern:$0x75643120]  ;;  %v861_v22 = vrot.slane %v859_v12, 2 }
 0x1b1   : > { %1603 = vst [vmem:[#allocation1 + $0x30] ss:$2 sm:$0xff] %v723_v44  ;;  %v673_v28 = vrot.slane %v609_v52, 2  ;;  %v1469_v3 = vrot.slane %v1467_v38, 7  ;;  %v1482_v19 = vshll.u32 %v6202_v32, 16  ;;  %v1485_v50 = vshrl.u32 %v6208_v48, 16 }
 0x1b3   : > { %v865_v42 = vsel %vm678_vm10, %v609_v52, %v673_v28  ;;  %v864_v29 = vsel %vm674_vm9, %v609_v52, %v673_v28  ;;  %v1472_v44 = vor.u32 %v1470_v5, %v1469_v3  ;;  %v1487_v51 = vrot.slane %v1485_v50, 7 }
 0x1b4   : > { %1505 = vrot.lane.b32.xlu0 %v1442_v40, %s5738_s23  ;;  %v867_v30 = vrot.slane %v865_v42, 2  ;;  %v1488_v40 = vshll.u32 %v6208_v48, 16 }
 0x1b5   : > { %v1607_v57 = vld.sshfl [vmem:[#allocation1] sm:$0xff pattern:$0x75643120] }
 0x1b6   : > { %1620 = vst [vmem:[#allocation1] ss:$2 sm:$0xff] %v810_v53  ;;  %v1599_v55 = vld.sshfl [vmem:[#allocation1 + $0x20] sm:$0xff pattern:$0x75643120]  ;;  %v1490_v36 = vor.u32 %v1488_v40, %v1487_v51 }
 0x1b7   : > { %v1611_v2 = vld.sshfl [vmem:[#allocation1 + $0x10] sm:$0xff pattern:$0x75643120]  ;;  %1613 = vst [vmem:[#allocation1 + $0x20] ss:$2 sm:$0xff] %v768_v60  ;;  %1509 = vrot.lane.b32.xlu1 %v1454_v58, %s5738_s23  ;;  %1648 = vrot.lane.b32.xlu2 %v1590_v31, %s5739_s9  ;;  %v1473_v31 = vshrl.u32 %v6184_v8, 16 }
 0x1b8   : > { %1624 = vst [vmem:[#allocation1 + $0x10] ss:$2 sm:$0xff] %v813_v23  ;;  %v1604_v6 = vld.sshfl [vmem:[#allocation1 + $0x30] sm:$0xff pattern:$0x75643120]  ;;  %v1479_v8 = vshrl.u32 %v6202_v32, 16 }
 0x1b9   : > { %1617 = vst [vmem:[#allocation1 + $0x30] ss:$2 sm:$0xff] %v771_v54  ;;  %v1475_v33 = vrot.slane %v1473_v31, 7  ;;  %v871_v32 = vld [vmem:[#allocation2] sm:$0x7] }
 0x1ba   : > { %v1481_v43 = vrot.slane %v1479_v8, 7 }
 0x1bc   : > { %1513 = vrot.lane.b32.xlu0 %v1466_v15, %s5738_s23  ;;  %v1484_v56 = vor.u32 %v1482_v19, %v1481_v43  ;;  %v5568_v43 = vld [vmem:[%s7385_s3 + $0x78] sm:$0xff] }
 0x1bd   : > { %v1621_v20 = vld.sshfl [vmem:[#allocation1] sm:$0xff pattern:$0x75643120]  ;;  %v5576_v19 = vld [vmem:[%s7385_s3 + $0xb8] sm:$0xff]  ;;  %2619 = vmatpush.bf16.msra.mxu2 %v5568_v43 }
 0x1be   : > { %v1614_v25 = vld.sshfl [vmem:[#allocation1 + $0x20] sm:$0xff pattern:$0x75643120]  ;;  %1634 = vst [vmem:[#allocation1] ss:$2 sm:$0xff] %v858_v35  ;;  %2648 = vmatpush.bf16.msra.mxu3 %v5576_v19 }
 0x1bf   : > { %1627 = vst [vmem:[#allocation1 + $0x20] ss:$2 sm:$0xff] %v816_v24  ;;  %1652 = vrot.lane.b32.xlu1 %v1599_v55, %s5739_s9  ;;  %1315 = vrot.lane.b32.xlu2 %v6131_v39, %s5737_s22  ;;  %v1625_v47 = vld.sshfl [vmem:[#allocation1 + $0x10] sm:$0xff pattern:$0x75643120] }
 0x1c0   : > { %v1618_v26 = vld.sshfl [vmem:[#allocation1 + $0x30] sm:$0xff pattern:$0x75643120]  ;;  %1638 = vst [vmem:[#allocation1 + $0x10] ss:$2 sm:$0xff] %v861_v22 }
 0x1c1   : > { %1631 = vst [vmem:[#allocation1 + $0x30] ss:$2 sm:$0xff] %v819_v63 }
 0x1c4   : > { %1650 = vrot.lane.b32.xlu0 %v6204_v46, %s5739_s9  ;;  %v874_v46 = vld [vmem:[#allocation2 + $0x14] sm:$0x7] }
 0x1c5   : > { %v875_v0 = vsel %vm5871_vm8, 0, %v874_v46  ;;  %v1635_v12 = vld.sshfl [vmem:[#allocation1] sm:$0xff pattern:$0x75643120] }
 0x1c6   : > { %v1628_v18 = vld.sshfl [vmem:[#allocation1 + $0x20] sm:$0xff pattern:$0x75643120]  ;;  %876 = vst [vmem:[#allocation2 + $0x14] sm:$0x7] %v875_v0  ;;  %v5560_v0 = vld [vmem:[%s7385_s3 + $0x38] sm:$0xff] }
 0x1c7   : > { %1313 = vrot.lane.b32.xlu1 %v6114_v13, %s5737_s22  ;;  %1656 = vrot.lane.b32.xlu2 %v1607_v57, %s5739_s9  ;;  %1641 = vst [vmem:[#allocation1 + $0x20] ss:$2 sm:$0xff] %v864_v29  ;;  %v1478_v13 = vor.u32 %v1476_v37, %v1475_v33 }
 0x1c8   : > { %v1632_v39 = vld.sshfl [vmem:[#allocation1 + $0x30] sm:$0xff pattern:$0x75643120]  ;;  %2590 = vmatpush.bf16.msrb.mxu1 %v5560_v0 }
 0x1c9   : > { %1645 = vst [vmem:[#allocation1 + $0x30] ss:$2 sm:$0xff] %v867_v30 }
 0x1cc   : > { %1311 = vrot.lane.b32.xlu0 %v6110_v41, %s5737_s22 }
 0x1cd   : > { %v914_v54 = vld [vmem:[#allocation2 + $0x14] sm:$0x1]  ;;  %v976_v53 = vld [vmem:[#allocation2 + $0x14] sm:$0x4] }
 0x1ce   : > { %v915_v23 = vsel %vm5856_vm5, 0, %v914_v54  ;;  %v977_v48 = vsel %vm5861_vm7, 0, %v976_v53  ;;  %v1642_v4 = vld.sshfl [vmem:[#allocation1 + $0x20] sm:$0xff pattern:$0x75643120] }
 0x1cf   : > { %1660 = vrot.lane.b32.xlu1 %v1614_v25, %s5739_s9  ;;  %1654 = vrot.lane.b32.xlu2 %v1604_v6, %s5739_s9  ;;  %916 = vst [vmem:[#allocation2 + $0x14] sm:$0x1] %v915_v23  ;;  %v1639_v6 = vld.sshfl [vmem:[#allocation1 + $0x10] sm:$0xff pattern:$0x75643120] }
 0x1d0   : > { %978 = vst [vmem:[#allocation2 + $0x14] sm:$0x4] %v977_v48 }
 0x1d4   : > { %1658 = vrot.lane.b32.xlu0 %v1611_v2, %s5739_s9  ;;  %v877_v2 = vld [vmem:[#allocation2 + $0x28] sm:$0x7] }
 0x1d5   : > { %v878_v27 = vsel %vm5871_vm8, 0, %v877_v2 }
 0x1d6   : > { %879 = vst [vmem:[#allocation2 + $0x28] sm:$0x7] %v878_v27 }
 0x1d7   : > { %1517 = vrot.lane.b32.xlu1 %v1478_v13, %s5738_s23  ;;  %1664 = vrot.lane.b32.xlu2 %v1621_v20, %s5739_s9 }
 0x1d9   : > { %v1300_v41 = vpop.permute.xlu2 %1299 }
 0x1da   : > { %1342 = vst.msk [vmem:[#allocation2 + $0x20] sm:$0x3] %vm1335_vm14, %v1300_v41 }
 0x1dc   : > { %1515 = vrot.lane.b32.xlu0 %v1472_v44, %s5738_s23 }
 0x1dd   : > { %v929_v52 = vld [vmem:[#allocation2 + $0x28] sm:$0x1]  ;;  %v991_v24 = vld [vmem:[#allocation2 + $0x28] sm:$0x4] }
 0x1de   : > { %v930_v63 = vsel %vm5856_vm5, 0, %v929_v52  ;;  %v992_v25 = vsel %vm5861_vm7, 0, %v991_v24  ;;  %v5556_v52 = vld [vmem:[%s7385_s3 + $0x18] sm:$0xff] }
 0x1df   : > { %1668 = vrot.lane.b32.xlu1 %v1628_v18, %s5739_s9  ;;  %1662 = vrot.lane.b32.xlu2 %v1618_v26, %s5739_s9  ;;  %931 = vst [vmem:[#allocation2 + $0x28] sm:$0x1] %v930_v63  ;;  %v5564_v24 = vld [vmem:[%s7385_s3 + $0x58] sm:$0xff] }
 0x1e0   : > { %v1288_v49 = vpop.permute.xlu0 %1287  ;;  %993 = vst [vmem:[#allocation2 + $0x28] sm:$0x4] %v992_v25  ;;  %v5572_v63 = vld [vmem:[%s7385_s3 + $0x98] sm:$0xff] }
 0x1e1   : > { %v1308_v62 = vpop.permute.xlu2 %1307  ;;  %1336 = vst.msk [vmem:[#allocation2 + $0x4] sm:$0x3] %vm1335_vm14, %v1288_v49 }
 0x1e2   : > { %1346 = vst.msk [vmem:[#allocation2 + $0x34] sm:$0x3] %vm1335_vm14, %v1308_v62 }
 0x1e4   : > { %1666 = vrot.lane.b32.xlu0 %v1625_v47, %s5739_s9  ;;  %v1646_v47 = vld.sshfl [vmem:[#allocation1 + $0x30] sm:$0xff pattern:$0x75643120] }
 0x1e7   : > { %1317 = vrot.lane.b32.xlu1 %v6135_v45, %s5737_s22  ;;  %1519 = vrot.lane.b32.xlu2 %v1484_v56, %s5738_s23  ;;  %v872_v45 = vsel %vm5871_vm8, 0, %v871_v32  ;;  %v1565_v50 = vld [vmem:[#allocation2 + $0x28] sm:$0x7]  ;;  %s5165_s22 = sshll.u32 %s272_s21, 6 }
 0x1e8   : > { %v1290_v21 = vpop.permute.xlu0 %1289  ;;  %873 = vst [vmem:[#allocation2] sm:$0x7] %v872_v45  ;;  %v1544_v59 = vld [vmem:[#allocation2 + $0x4] sm:$0x7]  ;;  %v5575_v32 = vld [vmem:[%s7385_s3 + $0xb0] sm:$0xff] }
 0x1e9   : > { %v1292_v61 = vpop.permute.xlu1 %1291  ;;  %1337 = vst.msk [vmem:[#allocation2 + $0x8] sm:$0x3] %vm1335_vm14, %v1290_v21  ;;  %v5559_v21 = vld [vmem:[%s7385_s3 + $0x30] sm:$0xff]  ;;  %2649 = vmatpush.bf16.msra.mxu3 %v5575_v32 }
 0x1ea   : > { %1338 = vst.msk [vmem:[#allocation2 + $0xc] sm:$0x3] %vm1335_vm14, %v1292_v61  ;;  %v5567_v61 = vld [vmem:[%s7385_s3 + $0x70] sm:$0xff]  ;;  %2591 = vmatpush.bf16.msrb.mxu1 %v5559_v21 }
 0x1eb   : > { %2620 = vmatpush.bf16.msra.mxu2 %v5567_v61 }
 0x1ec   : > { %1521 = vrot.lane.b32.xlu0 %v1490_v36, %s5738_s23 }
 0x1ef   : > { %1676 = vrot.lane.b32.xlu1 %v1642_v4, %s5739_s9  ;;  %1670 = vrot.lane.b32.xlu2 %v1632_v39, %s5739_s9  ;;  %v899_v7 = vld [vmem:[#allocation2] sm:$0x1]  ;;  %v961_v34 = vld [vmem:[#allocation2] sm:$0x4]  ;;  %v1553_v39 = vld [vmem:[#allocation2 + $0x14] sm:$0x7] }
 0x1f0   : > { %v1494_v58 = vpop.permute.xlu2 %1493  ;;  %v1296_v60 = vpop.permute.xlu0 %1295  ;;  %v900_v10 = vsel %vm5856_vm5, 0, %v899_v7  ;;  %v962_v15 = vsel %vm5861_vm7, 0, %v961_v34  ;;  %v1547_v22 = vld [vmem:[#allocation2 + $0x8] sm:$0x7]  ;;  %v5558_v4 = vld [vmem:[%s7385_s3 + $0x28] sm:$0xff]  ;;  %v5557_v34 = vld [vmem:[%s7385_s3 + $0x20] sm:$0xff] }
 0x1f1   : > { %v1294_v55 = vpop.permute.xlu1 %1293  ;;  %v1545_v1 = vsel %vm6275_vm0, %v1494_v58, %v1544_v59  ;;  %1340 = vst.msk [vmem:[#allocation2 + $0x18] sm:$0x3] %vm1335_vm14, %v1296_v60  ;;  %v1550_v5 = vld [vmem:[#allocation2 + $0xc] sm:$0x7]  ;;  %v5566_v58 = vld [vmem:[%s7385_s3 + $0x68] sm:$0xff]  ;;  %2592 = vmatpush.bf16.msrb.mxu1 %v5558_v4  ;;  %v5553_v4 = vld [vmem:[%s7385_s3] sm:$0xff] }
 0x1f2   : > { %1339 = vst.msk [vmem:[#allocation2 + $0x10] sm:$0x3] %vm1335_vm14, %v1294_v55  ;;  %v5574_v59 = vld [vmem:[%s7385_s3 + $0xa8] sm:$0xff]  ;;  %v880_v55 = vld [vmem:[#allocation2 + $0x3c] sm:$0x7]  ;;  %2621 = vmatpush.bf16.msra.mxu2 %v5566_v58 }
 0x1f3   : > { %1546 = vst [vmem:[#allocation2 + $0x4] sm:$0x7] %v1545_v1  ;;  %v1562_v1 = vld [vmem:[#allocation2 + $0x20] sm:$0x7]  ;;  %v881_v27 = vsel %vm5871_vm8, 0, %v880_v55  ;;  %2650 = vmatpush.bf16.msra.mxu3 %v5574_v59  ;;  %v5561_v58 = vld [vmem:[%s7385_s3 + $0x40] sm:$0xff] }
 0x1f4   : > { %1674 = vrot.lane.b32.xlu0 %v1639_v6, %s5739_s9  ;;  %901 = vst [vmem:[#allocation2] sm:$0x1] %v900_v10  ;;  %v5573_v10 = vld [vmem:[%s7385_s3 + $0xa0] sm:$0xff]  ;;  %vm2806_vm8 = vcmask 518146  }
 0x1f5   : > { %963 = vst [vmem:[#allocation2] sm:$0x4] %v962_v15  ;;  %2593 = vmatpush.bf16.msrb.mxu1 %v5557_v34  ;;  %vm6576_vm13 = vmand %vm2806_vm8, %vm2807_vm11 }
 0x1f6   : > { %882 = vst [vmem:[#allocation2 + $0x3c] sm:$0x7] %v881_v27 }
 0x1f7   : > { %1672 = vrot.lane.b32.xlu2 %v1635_v12, %s5739_s9  ;;  %v5565_v12 = vld [vmem:[%s7385_s3 + $0x60] sm:$0xff]  ;;  %2651 = vmatpush.bf16.msra.mxu3 %v5573_v10 }
 0x1f8   : > { %v1304_v14 = vpop.permute.xlu0 %1303  ;;  %v1556_v54 = vld [vmem:[#allocation2 + $0x18] sm:$0x7]  ;;  %2622 = vmatpush.bf16.msra.mxu2 %v5565_v12 }
 0x1f9   : > { %v1298_v35 = vpop.permute.xlu1 %1297  ;;  %v1496_v16 = vpop.permute.xlu2 %1495  ;;  %1344 = vst.msk [vmem:[#allocation2 + $0x2c] sm:$0x3] %vm1335_vm14, %v1304_v14  ;;  %v1764_v56 = vld [vmem:[#allocation2 + $0x10] sm:$0x7]  ;;  %2594 = vmatpush.bf16.msrb.mxu1 %v5556_v52 }
 0x1fa   : > { %1341 = vst.msk [vmem:[#allocation2 + $0x1c] sm:$0x3] %vm1335_vm14, %v1298_v35  ;;  %v1548_v20 = vsel %vm6275_vm0, %v1496_v16, %v1547_v22  ;;  %v1956_v36 = vunpack.c.l.b16 %v1764_v56  ;;  %v5570_v56 = vld [vmem:[%s7385_s3 + $0x88] sm:$0xff] }
 0x1fb   : > { %1549 = vst [vmem:[#allocation2 + $0x8] sm:$0x7] %v1548_v20  ;;  %2652 = vmatpush.bf16.msra.mxu3 %v5572_v63 }
 0x1fc   : > { %v1541_v8 = vld [vmem:[#allocation2] sm:$0x7]  ;;  %v1972_v60 = vpack.c.b16 %v1956_v36, %v1956_v36  ;;  %2623 = vmatpush.bf16.msra.mxu2 %v5564_v24 }
 0x1fe   : > { %v2009_v17 = vshll.u32 %v1972_v60, 16 }
 0x1ff   : > { %1678 = vrot.lane.b32.xlu2 %v1646_v47, %s5739_s9 }
 0x200   : > { %v1568_v15 = vld [vmem:[#allocation2 + $0x2c] sm:$0x7]  ;;  %v2011_v25 = vrot.slane %v2009_v17, 1 }
 0x201   : > { %v1302_v28 = vpop.permute.xlu1 %1301  ;;  %v1559_v26 = vld [vmem:[#allocation2 + $0x1c] sm:$0x7]  ;;  %v1504_v42 = vpop.permute.xlu2 %1503 }
 0x202   : > { %1343 = vst.msk [vmem:[#allocation2 + $0x24] sm:$0x3] %vm1335_vm14, %v1302_v28  ;;  %v1560_v29 = vsel %vm6275_vm0, %v1504_v42, %v1559_v26  ;;  %v1574_v26 = vld [vmem:[#allocation2 + $0x34] sm:$0x7] }
 0x203   : > { %1561 = vst [vmem:[#allocation2 + $0x1c] sm:$0x7] %v1560_v29  ;;  %v944_v29 = vld [vmem:[#allocation2 + $0x3c] sm:$0x1] }
 0x209   : > { %v1306_v30 = vpop.permute.xlu1 %1305  ;;  %v1512_v18 = vpop.permute.xlu2 %1511  ;;  %v1768_v45 = vld [vmem:[#allocation2 + $0x24] sm:$0x7] }
 0x20a   : > { %1345 = vst.msk [vmem:[#allocation2 + $0x30] sm:$0x3] %vm1335_vm14, %v1306_v30  ;;  %v1960_v6 = vunpack.c.l.b16 %v1768_v45  ;;  %v2007_v30 = vshrl.u32 %v1972_v60, 16  ;;  %v1752_v59 = vld [vmem:[#allocation2 + $0x24] sm:$0x3] }
 0x20c   : > { %v1976_v20 = vpack.c.b16 %v1960_v6, %v1960_v6 }
 0x20e   : > { %v1500_v31 = vpop.permute.xlu0 %1499  ;;  %v2035_v21 = vshrl.u32 %v1976_v20, 16 }
 0x20f   : > { %v1554_v33 = vsel %vm6275_vm0, %v1500_v31, %v1553_v39  ;;  %v5555_v31 = vld [vmem:[%s7385_s3 + $0x10] sm:$0xff] }
 0x210   : > { %1555 = vst [vmem:[#allocation2 + $0x14] sm:$0x7] %v1554_v33  ;;  %v5563_v33 = vld [vmem:[%s7385_s3 + $0x50] sm:$0xff]  ;;  %2595 = vmatpush.bf16.msrb.mxu1 %v5555_v31 }
 0x211   : > { %v1571_v37 = vld [vmem:[#allocation2 + $0x30] sm:$0x7]  ;;  %v1310_v38 = vpop.permute.xlu1 %1309  ;;  %v1649_v13 = vpop.permute.xlu2 %1648  ;;  %2624 = vmatpush.bf16.msra.mxu2 %v5563_v33 }
 0x212   : > { %v1572_v3 = vsel %vm6275_vm0, %v1512_v18, %v1571_v37  ;;  %1347 = vst.msk [vmem:[#allocation2 + $0x38] sm:$0x3] %vm1335_vm14, %v1310_v38  ;;  %v2037_v18 = vshll.u32 %v1976_v20, 16  ;;  %v5571_v37 = vld [vmem:[%s7385_s3 + $0x90] sm:$0xff]  ;;  %v1006_v38 = vld [vmem:[#allocation2 + $0x3c] sm:$0x4] }
 0x213   : > { %1573 = vst [vmem:[#allocation2 + $0x30] sm:$0x7] %v1572_v3  ;;  %2653 = vmatpush.bf16.msra.mxu3 %v5571_v37 }
 0x214   : > { %v2039_v43 = vrot.slane %v2037_v18, 1  ;;  %2596 = vmatpush.bf16.msrb.mxu1 %v5554_v9 }
 0x216   : > { %v1498_v41 = vpop.permute.xlu0 %1497 }
 0x217   : > { %v1551_v44 = vsel %vm6275_vm0, %v1498_v41, %v1550_v5  ;;  %2654 = vmatpush.bf16.msra.mxu3 %v5570_v56 }
 0x218   : > { %1552 = vst [vmem:[#allocation2 + $0xc] sm:$0x7] %v1551_v44  ;;  %v945_v44 = vsel %vm5856_vm5, 0, %v944_v29  ;;  %2597 = vmatpush.bf16.msrb.mxu1 %v5553_v4  ;;  %vm2722_vm5 = vcmask 518144  }
 0x219   : > { %v1492_v46 = vpop.permute.xlu1 %1491  ;;  %v1316_v49 = vpop.permute.xlu2 %1315  ;;  %v1772_v47 = vld [vmem:[#allocation2 + $0x38] sm:$0x7]  ;;  %946 = vst [vmem:[#allocation2 + $0x3c] sm:$0x1] %v945_v44 }
 0x21a   : > { %v1542_v62 = vsel %vm6275_vm0, %v1492_v46, %v1541_v8  ;;  %1350 = vst.msk [vmem:[#allocation2 + $0x48] sm:$0x3] %vm1335_vm14, %v1316_v49  ;;  %v1964_v8 = vunpack.c.l.b16 %v1772_v47  ;;  %v6416_v10 = vld [vmem:[#allocation2 + $0x38] sm:$0x3] }
 0x21b   : > { %1543 = vst [vmem:[#allocation2] sm:$0x7] %v1542_v62  ;;  %v1007_v62 = vsel %vm5861_vm7, 0, %v1006_v38  ;;  %vm6570_vm7 = vmand %vm2732_vm6, %vm897_vm3 }
 0x21c   : > { %1697 = vst.msk [vmem:[#allocation2] sm:$0x3] %vm1696_vm1, %v1649_v13  ;;  %v2012_v13 = vor.u32 %v2011_v25, %v2007_v30  ;;  %v6402_v32 = vpack.c.b16 %v1964_v8, %v1964_v8  ;;  %vm6688_vm3 = vmand %vm2722_vm5, %vm1178_vm12 }
 0x21d   : > { %1008 = vst [vmem:[#allocation2 + $0x3c] sm:$0x4] %v1007_v62 }
 0x21e   : > { %v1508_v51 = vpop.permute.xlu0 %1507  ;;  %v2065_v17 = vshll.u32 %v6402_v32, 16 }
 0x21f   : > { %v1566_v40 = vsel %vm6275_vm0, %v1508_v51, %v1565_v50  ;;  %v5562_v50 = vld [vmem:[%s7385_s3 + $0x48] sm:$0xff]  ;;  %v1748_v51 = vld [vmem:[#allocation2 + $0x10] sm:$0x3] }
 0x220   : > { %1567 = vst [vmem:[#allocation2 + $0x28] sm:$0x7] %v1566_v40  ;;  %v2124_v40 = vrot.slane %v2012_v13, 2  ;;  %2625 = vmatpush.bf16.msra.mxu2 %v5562_v50  ;;  %v2067_v18 = vrot.slane %v2065_v17, 1 }
 0x221   : > { %v1502_v53 = vpop.permute.xlu1 %1501  ;;  %v1657_v23 = vpop.permute.xlu2 %1656 }
 0x222   : > { %v1557_v48 = vsel %vm6275_vm0, %v1502_v53, %v1556_v54  ;;  %1701 = vst.msk [vmem:[#allocation2 + $0x14] sm:$0x3] %vm1696_vm1, %v1657_v23  ;;  %v2123_v23 = vrot.slane %v1748_v51, 4 }
 0x223   : > { %1558 = vst [vmem:[#allocation2 + $0x18] sm:$0x7] %v1557_v48  ;;  %v1729_v16 = vld [vmem:[#allocation2] sm:$0x7]  ;;  %v2040_v48 = vor.u32 %v2039_v43, %v2035_v21 }
 0x224   : > { %v1793_v28 = vunpack.c.l.b16 %v1729_v16  ;;  %2626 = vmatpush.bf16.msra.mxu2 %v5561_v58 }
 0x226   : > { %v1506_v2 = vpop.permute.xlu0 %1505  ;;  %v6387_v46 = vpack.c.b16 %v1793_v28, %v1793_v28  ;;  %v2135_v28 = vrot.slane %v1752_v59, 4 }
 0x227   : > { %v1563_v7 = vsel %vm6275_vm0, %v1506_v2, %v1562_v1  ;;  %v5569_v1 = vld [vmem:[%s7385_s3 + $0x80] sm:$0xff]  ;;  %v2189_v2 = vsel %vm2164_vm2, %v2123_v23, %v2124_v40 }
 0x228   : > { %1564 = vst [vmem:[#allocation2 + $0x20] sm:$0x7] %v1563_v7  ;;  %v1828_v36 = vshll.u32 %v6387_v46, 16  ;;  %2655 = vmatpush.bf16.msra.mxu3 %v5569_v1  ;;  %v1826_v24 = vshrl.u32 %v6387_v46, 16 }
 0x229   : > { %v1510_v14 = vpop.permute.xlu1 %1509  ;;  %v1655_v35 = vpop.permute.xlu2 %1654  ;;  %v1733_v27 = vld [vmem:[#allocation2 + $0x14] sm:$0x7] }
 0x22a   : > { %v1569_v22 = vsel %vm6275_vm0, %v1510_v14, %v1568_v15  ;;  %1700 = vst.msk [vmem:[#allocation2 + $0xc] sm:$0x3] %vm1696_vm1, %v1655_v35  ;;  %v1830_v15 = vrot.slane %v1828_v36, 1  ;;  %v1797_v63 = vunpack.c.l.b16 %v1733_v27 }
 0x22b   : > { %1570 = vst [vmem:[#allocation2 + $0x2c] sm:$0x7] %v1569_v22  ;;  %v2136_v22 = vrot.slane %v2040_v48, 2 }
 0x22c   : > { %v6431_v46 = vpack.c.b16 %v1797_v63, %v1797_v63 }
 0x22d   : > { %v6427_v13 = vsel %vm2164_vm2, %v2135_v28, %v2136_v22 }
 0x22e   : > { %v1514_v42 = vpop.permute.xlu0 %1513  ;;  %v1856_v4 = vshll.u32 %v6431_v46, 16 }
 0x22f   : > { %v1575_v39 = vsel %vm6275_vm0, %v1514_v42, %v1574_v26  ;;  %v2147_v26 = vrot.slane %v6416_v10, 4 }
 0x230   : > { %1576 = vst [vmem:[#allocation2 + $0x34] sm:$0x7] %v1575_v39  ;;  %v6423_v39 = vor.u32 %v1830_v15, %v1826_v24  ;;  %v1854_v24 = vshrl.u32 %v6431_v46, 16  ;;  %v1858_v63 = vrot.slane %v1856_v4, 1 }
 0x231   : > { %v1732_v3 = vld [vmem:[#allocation2 + $0xc] sm:$0x7]  ;;  %v1653_v5 = vpop.permute.xlu1 %1652  ;;  %v1665_v41 = vpop.permute.xlu2 %1664 }
 0x232   : > { %v1763_v49 = vld [vmem:[#allocation2 + $0xc] sm:$0x7]  ;;  %v1796_v0 = vunpack.c.l.b16 %v1732_v3  ;;  %1699 = vst.msk [vmem:[#allocation2 + $0x8] sm:$0x3] %vm1696_vm1, %v1653_v5  ;;  %v2063_v3 = vshrl.u32 %v6402_v32, 16  ;;  %v2113_v21 = vrot.slane %v6423_v39, 6 }
 0x233   : > { %v1955_v19 = vunpack.c.l.b16 %v1763_v49  ;;  %1705 = vst.msk [vmem:[#allocation2 + $0x28] sm:$0x3] %vm1696_vm1, %v1665_v41  ;;  %v1716_v42 = vld [vmem:[#allocation2 + $0xc] sm:$0x3] }
 0x234   : > { %v1812_v11 = vpack.c.b16 %v1796_v0, %v1796_v0  ;;  %v1747_v5 = vld [vmem:[#allocation2 + $0xc] sm:$0x3]  ;;  %v6434_v40 = vor.u32 %v2067_v18, %v2063_v3 }
 0x235   : > { %v1971_v61 = vpack.c.b16 %v1955_v19, %v1955_v19 }
 0x236   : > { %v1849_v54 = vshll.u32 %v1812_v11, 16  ;;  %v1651_v53 = vpop.permute.xlu0 %1650  ;;  %v1847_v60 = vshrl.u32 %v1812_v11, 16  ;;  %v2148_v39 = vrot.slane %v6434_v40, 2 }
 0x237   : > { %v2002_v45 = vshll.u32 %v1971_v61, 16  ;;  %1698 = vst.msk [vmem:[#allocation2 + $0x4] sm:$0x3] %vm1696_vm1, %v1651_v53  ;;  %v2000_v20 = vshrl.u32 %v1971_v61, 16 }
 0x238   : > { %v1851_v55 = vrot.slane %v1849_v54, 1  ;;  %v2120_v54 = vrot.slane %v1747_v5, 4 }
 0x239   : > { %v2004_v6 = vrot.slane %v2002_v45, 1  ;;  %v1731_v7 = vld [vmem:[#allocation2 + $0x8] sm:$0x7]  ;;  %v1314_v34 = vpop.permute.xlu1 %1313  ;;  %v1663_v12 = vpop.permute.xlu2 %1662 }
 0x23a   : > { %v1852_v14 = vor.u32 %v1851_v55, %v1847_v60  ;;  %v1762_v35 = vld [vmem:[#allocation2 + $0x8] sm:$0x7]  ;;  %v1795_v16 = vunpack.c.l.b16 %v1731_v7  ;;  %1349 = vst.msk [vmem:[#allocation2 + $0x44] sm:$0x3] %vm1335_vm14, %v1314_v34 }
 0x23b   : > { %v1954_v52 = vunpack.c.l.b16 %v1762_v35  ;;  %1704 = vst.msk [vmem:[#allocation2 + $0x20] sm:$0x3] %vm1696_vm1, %v1663_v12  ;;  %v2005_v29 = vor.u32 %v2004_v6, %v2000_v20  ;;  %v1746_v49 = vld [vmem:[#allocation2 + $0x8] sm:$0x3] }
 0x23c   : > { %v2122_v25 = vrot.slane %v1852_v14, 6  ;;  %v1811_v47 = vpack.c.b16 %v1795_v16, %v1795_v16  ;;  %v2117_v58 = vrot.slane %v1746_v49, 4 }
 0x23d   : > { %v1970_v30 = vpack.c.b16 %v1954_v52, %v1954_v52  ;;  %v2121_v19 = vrot.slane %v2005_v29, 2 }
 0x23e   : > { %v2186_v31 = vsel %vm674_vm9, %v1716_v42, %v2122_v25  ;;  %v1842_v33 = vshll.u32 %v1811_v47, 16  ;;  %v1730_v37 = vld [vmem:[#allocation2 + $0x4] sm:$0x7]  ;;  %v1312_v38 = vpop.permute.xlu0 %1311  ;;  %v1840_v0 = vshrl.u32 %v1811_v47, 16 }
 0x23f   : > { %v2190_v41 = vsel %vm2168_vm4, %v2186_v31, %v2189_v2  ;;  %v1995_v44 = vshll.u32 %v1970_v30, 16  ;;  %v1761_v8 = vld [vmem:[#allocation2 + $0x4] sm:$0x7]  ;;  %v1794_v43 = vunpack.c.l.b16 %v1730_v37  ;;  %v1993_v9 = vshrl.u32 %v1970_v30, 16  ;;  %1348 = vst.msk [vmem:[#allocation2 + $0x40] sm:$0x3] %vm1335_vm14, %v1312_v38 }
 0x240   : > { %2349 = vst [vmem:[#allocation1 + $0x3] ss:$4 sm:$0xff] %v2190_v41  ;;  %v1844_v62 = vrot.slane %v1842_v33, 1  ;;  %v1953_v56 = vunpack.c.l.b16 %v1761_v8  ;;  %v2182_v1 = vsel %vm2164_vm2, %v2120_v54, %v2121_v19  ;;  %v1715_v2 = vld [vmem:[#allocation2 + $0x8] sm:$0x3] }
 0x241   : > { %v1997_v50 = vrot.slane %v1995_v44, 1  ;;  %v1661_v51 = vpop.permute.xlu1 %1660  ;;  %v1520_v11 = vpop.permute.xlu2 %1519  ;;  %v1810_v32 = vpack.c.b16 %v1794_v43, %v1794_v43  ;;  %v1583_v36 = vld [vmem:[#allocation2 + $0x44] sm:$0x7]  ;;  %v1713_v38 = vld [vmem:[#allocation2] sm:$0x3] }
 0x242   : > { %v1845_v61 = vor.u32 %v1844_v62, %v1840_v0  ;;  %1703 = vst.msk [vmem:[#allocation2 + $0x1c] sm:$0x3] %vm1696_vm1, %v1661_v51  ;;  %v1969_v23 = vpack.c.b16 %v1953_v56, %v1953_v56  ;;  %v1736_v48 = vld [vmem:[#allocation2 + $0x20] sm:$0x7]  ;;  %v1584_v45 = vsel %vm6275_vm0, %v1520_v11, %v1583_v36  ;;  %v1745_v12 = vld [vmem:[#allocation2 + $0x4] sm:$0x3] }
 0x243   : > { %v1998_v53 = vor.u32 %v1997_v50, %v1993_v9  ;;  %v1835_v60 = vshll.u32 %v1810_v32, 16  ;;  %v1767_v55 = vld [vmem:[#allocation2 + $0x20] sm:$0x7]  ;;  %v1800_v7 = vunpack.c.l.b16 %v1736_v48  ;;  %1585 = vst [vmem:[#allocation2 + $0x44] sm:$0x7] %v1584_v45  ;;  %v1833_v17 = vshrl.u32 %v1810_v32, 16 }
 0x244   : > { %v2119_v59 = vrot.slane %v1845_v61, 6  ;;  %v1988_v6 = vshll.u32 %v1969_v23, 16  ;;  %v1959_v14 = vunpack.c.l.b16 %v1767_v55  ;;  %v1986_v22 = vshrl.u32 %v1969_v23, 16  ;;  %v1714_v42 = vld [vmem:[#allocation2 + $0x4] sm:$0x3]  ;;  %v5584_v11 = vld [vmem:[%s7385_s3 + $0xf8] sm:$0xff] }
 0x245   : > { %v2118_v27 = vrot.slane %v1998_v53, 2  ;;  %v1837_v15 = vrot.slane %v1835_v60, 1  ;;  %v1816_v52 = vpack.c.b16 %v1800_v7, %v1800_v7  ;;  %v2114_v30 = vrot.slane %v1745_v12, 4  ;;  %v1577_v51 = vld [vmem:[#allocation2 + $0x3c] sm:$0x7]  ;;  %2677 = vmatpush.bf16.msra.mxu1 %v5584_v11  ;;  %v5583_v11 = vld [vmem:[%s7385_s3 + $0xf0] sm:$0xff] }
 0x246   : > { %v2179_v34 = vsel %vm674_vm9, %v1715_v2, %v2119_v59  ;;  %v1659_v35 = vpop.permute.xlu0 %1658  ;;  %v1990_v20 = vrot.slane %v1988_v6, 1  ;;  %v1975_v47 = vpack.c.b16 %v1959_v14, %v1959_v14  ;;  %v1580_v8 = vld [vmem:[#allocation2 + $0x40] sm:$0x7]  ;;  %v2163_v61 = vsel %vm674_vm9, %v1713_v38, %v2113_v21  ;;  %v1737_v32 = vld [vmem:[#allocation2 + $0x28] sm:$0x7] }
 0x247   : > { %v2183_v16 = vsel %vm2168_vm4, %v2179_v34, %v2182_v1  ;;  %1702 = vst.msk [vmem:[#allocation2 + $0x18] sm:$0x3] %vm1696_vm1, %v1659_v35  ;;  %v1838_v25 = vor.u32 %v1837_v15, %v1833_v17  ;;  %v2175_v28 = vsel %vm2164_vm2, %v2117_v58, %v2118_v27  ;;  %v1877_v18 = vshll.u32 %v1816_v52, 16  ;;  %v1720_v45 = vld [vmem:[#allocation2 + $0x20] sm:$0x3] }
 0x248   : > { %2347 = vst [vmem:[#allocation1 + $0x2] ss:$4 sm:$0xff] %v2183_v16  ;;  %v1991_v29 = vor.u32 %v1990_v20, %v1986_v22  ;;  %v1875_v5 = vshrl.u32 %v1816_v52, 16  ;;  %v2030_v41 = vshll.u32 %v1975_v47, 16  ;;  %v2028_v0 = vshrl.u32 %v1975_v47, 16 }
 0x249   : > { %v1735_v31 = vld [vmem:[#allocation2 + $0x1c] sm:$0x7]  ;;  %v1518_v33 = vpop.permute.xlu1 %1517  ;;  %v1671_v37 = vpop.permute.xlu2 %1670  ;;  %v2116_v3 = vrot.slane %v1838_v25, 6  ;;  %v1879_v49 = vrot.slane %v1877_v18, 1  ;;  %v6459_v23 = vor.u32 %v1858_v63, %v1854_v24  ;;  %v1801_v2 = vunpack.c.l.b16 %v1737_v32  ;;  %v1751_v27 = vld [vmem:[#allocation2 + $0x20] sm:$0x3]  ;;  %2678 = vmatpush.bf16.msra.mxu1 %v5583_v11 }
 0x24a   : > { %v1799_v44 = vunpack.c.l.b16 %v1735_v31  ;;  %v2115_v46 = vrot.slane %v1991_v29, 2  ;;  %v1766_v62 = vld [vmem:[#allocation2 + $0x1c] sm:$0x7]  ;;  %v1581_v43 = vsel %vm6275_vm0, %v1518_v33, %v1580_v8  ;;  %v2032_v9 = vrot.slane %v2030_v41, 1  ;;  %1708 = vst.msk [vmem:[#allocation2 + $0x34] sm:$0x3] %vm1696_vm1, %v1671_v37 }
 0x24b   : > { %v2172_v19 = vsel %vm674_vm9, %v1714_v42, %v2116_v3  ;;  %v1958_v56 = vunpack.c.l.b16 %v1766_v62  ;;  %1582 = vst [vmem:[#allocation2 + $0x40] sm:$0x7] %v1581_v43  ;;  %v1880_v53 = vor.u32 %v1879_v49, %v1875_v5  ;;  %v2125_v22 = vrot.slane %v6459_v23, 6  ;;  %v1750_v18 = vld [vmem:[#allocation2 + $0x1c] sm:$0x3] }
 0x24c   : > { %v1815_v50 = vpack.c.b16 %v1799_v44, %v1799_v44  ;;  %v2167_v36 = vsel %vm2164_vm2, %v2114_v30, %v2115_v46  ;;  %v2176_v54 = vsel %vm2168_vm4, %v2172_v19, %v2175_v28  ;;  %v2033_v4 = vor.u32 %v2032_v9, %v2028_v0  ;;  %v1719_v30 = vld [vmem:[#allocation2 + $0x1c] sm:$0x3]  ;;  %v1717_v37 = vld [vmem:[#allocation2 + $0x14] sm:$0x3] }
 0x24d   : > { %v2169_v48 = vsel %vm2168_vm4, %v2163_v61, %v2167_v36  ;;  %2345 = vst [vmem:[#allocation1 + $0x1] ss:$4 sm:$0xff] %v2176_v54  ;;  %v2134_v21 = vrot.slane %v1880_v53, 6  ;;  %v1974_v60 = vpack.c.b16 %v1958_v56, %v1958_v56  ;;  %v2132_v63 = vrot.slane %v1751_v27, 4 }
 0x24e   : > { %v1870_v58 = vshll.u32 %v1815_v50, 16  ;;  %v1516_v59 = vpop.permute.xlu0 %1515  ;;  %2343 = vst [vmem:[#allocation1] ss:$4 sm:$0xff] %v2169_v48  ;;  %v1734_v55 = vld [vmem:[#allocation2 + $0x18] sm:$0x7]  ;;  %v1868_v6 = vshrl.u32 %v1815_v50, 16  ;;  %v6470_v29 = vpack.c.b16 %v1801_v2, %v1801_v2  ;;  %v2193_v61 = vsel %vm674_vm9, %v1717_v37, %v2125_v22 }
 0x24f   : > { %v1578_v1 = vsel %vm6275_vm0, %v1516_v59, %v1577_v51  ;;  %v1765_v34 = vld [vmem:[#allocation2 + $0x18] sm:$0x7]  ;;  %v1798_v12 = vunpack.c.l.b16 %v1734_v55  ;;  %v2133_v17 = vrot.slane %v2033_v4, 2  ;;  %v2214_v15 = vsel %vm674_vm9, %v1720_v45, %v2134_v21 }
 0x250   : > { %v1872_v7 = vrot.slane %v1870_v58, 1  ;;  %v2023_v14 = vshll.u32 %v1974_v60, 16  ;;  %v1957_v35 = vunpack.c.l.b16 %v1765_v34  ;;  %1579 = vst [vmem:[#allocation2 + $0x3c] sm:$0x7] %v1578_v1  ;;  %v2218_v20 = vsel %vm2168_vm4, %v2214_v15, %v6427_v13  ;;  %v1749_v3 = vld [vmem:[#allocation2 + $0x18] sm:$0x3] }
 0x251   : > { %v1669_v16 = vpop.permute.xlu1 %1668  ;;  %v1814_v24 = vpack.c.b16 %v1798_v12, %v1798_v12  ;;  %2357 = vst [vmem:[#allocation1 + $0x23] ss:$4 sm:$0xff] %v2218_v20  ;;  %v2021_v25 = vshrl.u32 %v1974_v60, 16  ;;  %v1673_v42 = vpop.permute.xlu2 %1672  ;;  %v2210_v38 = vsel %vm2164_vm2, %v2132_v63, %v2133_v17  ;;  %v1740_v44 = vld [vmem:[#allocation2 + $0x34] sm:$0x7]  ;;  %v2129_v32 = vrot.slane %v1750_v18, 4 }
 0x252   : > { %v1873_v52 = vor.u32 %v1872_v7, %v1868_v6  ;;  %1707 = vst.msk [vmem:[#allocation2 + $0x30] sm:$0x3] %vm1696_vm1, %v1669_v16  ;;  %v2025_v47 = vrot.slane %v2023_v14, 1  ;;  %v1973_v28 = vpack.c.b16 %v1957_v35, %v1957_v35  ;;  %v1771_v0 = vld [vmem:[#allocation2 + $0x34] sm:$0x7]  ;;  %v1804_v62 = vunpack.c.l.b16 %v1740_v44 }
 0x253   : > { %v1863_v33 = vshll.u32 %v1814_v24, 16  ;;  %v1861_v5 = vshrl.u32 %v1814_v24, 16  ;;  %1709 = vst.msk [vmem:[#allocation2 + $0x3c] sm:$0x3] %vm1696_vm1, %v1673_v42  ;;  %v1963_v56 = vunpack.c.l.b16 %v1771_v0  ;;  %v1884_v53 = vshll.u32 %v6470_v29, 16 }
 0x254   : > { %v2131_v31 = vrot.slane %v1873_v52, 6  ;;  %v2026_v13 = vor.u32 %v2025_v47, %v2021_v25  ;;  %v2016_v41 = vshll.u32 %v1973_v28, 16  ;;  %v2014_v49 = vshrl.u32 %v1973_v28, 16  ;;  %v1718_v21 = vld [vmem:[#allocation2 + $0x18] sm:$0x3] }
 0x255   : > { %v1865_v46 = vrot.slane %v1863_v33, 1  ;;  %v2358_v51 = vld.sshfl [vmem:[#allocation1] sm:$0xff pattern:$0x73625140]  ;;  %v1820_v54 = vpack.c.b16 %v1804_v62, %v1804_v62  ;;  %v2126_v48 = vrot.slane %v1749_v3, 4  ;;  %v1979_v45 = vpack.c.b16 %v1963_v56, %v1963_v56 }
 0x256   : > { %v2207_v8 = vsel %vm674_vm9, %v1719_v30, %v2131_v31  ;;  %v1667_v43 = vpop.permute.xlu0 %1666  ;;  %v2130_v19 = vrot.slane %v2026_v13, 2  ;;  %v2018_v50 = vrot.slane %v2016_v41, 1  ;;  %2598 = vmatmul.bf16.vlgmr.msrb.gmra.mxu1 %v2358_v51  ;;  %v2359_v12 = vld.sshfl [vmem:[#allocation1 + $0x8] sm:$0xff pattern:$0x73625140]  ;;  %v1886_v25 = vrot.slane %v1884_v53, 1 }
 0x257   : > { %v2211_v9 = vsel %vm2168_vm4, %v2207_v8, %v2210_v38  ;;  %v1866_v36 = vor.u32 %v1865_v46, %v1861_v5  ;;  %v1905_v55 = vshll.u32 %v1820_v54, 16  ;;  %v1903_v6 = vshrl.u32 %v1820_v54, 16  ;;  %2627 = vmatmul.bf16.vlgmr.msra.gmra.mxu2 %v2359_v12  ;;  %v2360_v16 = vld.sshfl [vmem:[#allocation1 + $0x10] sm:$0xff pattern:$0x73625140]  ;;  %v5582_v13 = vld [vmem:[%s7385_s3 + $0xe8] sm:$0xff] }
 0x258   : > { %2355 = vst [vmem:[#allocation1 + $0x22] ss:$4 sm:$0xff] %v2211_v9  ;;  %v2019_v23 = vor.u32 %v2018_v50, %v2014_v49  ;;  %v2203_v59 = vsel %vm2164_vm2, %v2129_v32, %v2130_v19  ;;  %v2058_v7 = vshll.u32 %v1979_v45, 16  ;;  %v2056_v14 = vshrl.u32 %v1979_v45, 16  ;;  %2656 = vmatmul.bf16.vlgmr.msra.gmra.mxu3 %v2360_v16  ;;  %v1586_v30 = vld [vmem:[#allocation2 + $0x48] sm:$0x7]  ;;  %2679 = vmatpush.bf16.msra.mxu1 %v5582_v13 }
 0x259   : > { %v1739_v4 = vld [vmem:[#allocation2 + $0x30] sm:$0x7]  ;;  %v1318_v58 = vpop.permute.xlu1 %1317  ;;  %v2128_v60 = vrot.slane %v1866_v36, 6  ;;  %v1907_v15 = vrot.slane %v1905_v55, 1  ;;  %v1724_v31 = vld [vmem:[#allocation2 + $0x34] sm:$0x3]  ;;  %v2245_v8 = vsel %vm2164_vm2, %v2147_v26, %v2148_v39  ;;  %v1679_v57 = vpop.permute.xlu2 %1678 }
 0x25a   : > { %v1770_v1 = vld [vmem:[#allocation2 + $0x30] sm:$0x7]  ;;  %v1803_v2 = vunpack.c.l.b16 %v1739_v4  ;;  %v2127_v27 = vrot.slane %v2019_v23, 2  ;;  %v2060_v52 = vrot.slane %v2058_v7, 1  ;;  %v1741_v63 = vld [vmem:[#allocation2 + $0x3c] sm:$0x7] }
 0x25b   : > { %v1962_v34 = vunpack.c.l.b16 %v1770_v1  ;;  %v2200_v17 = vsel %vm674_vm9, %v1718_v21, %v2128_v60  ;;  %v1908_v28 = vor.u32 %v1907_v15, %v1903_v6  ;;  %v1805_v38 = vunpack.c.l.b16 %v1741_v63  ;;  %1706 = vst.msk [vmem:[#allocation2 + $0x2c] sm:$0x3] %vm1696_vm1, %v1667_v43  ;;  %v1755_v49 = vld [vmem:[#allocation2 + $0x34] sm:$0x3]  ;;  %v1723_v11 = vld [vmem:[#allocation2 + $0x30] sm:$0x3] }
 0x25c   : > { %v1819_v35 = vpack.c.b16 %v1803_v2, %v1803_v2  ;;  %v2196_v22 = vsel %vm2164_vm2, %v2126_v48, %v2127_v27  ;;  %v2204_v20 = vsel %vm2168_vm4, %v2200_v17, %v2203_v59  ;;  %v2061_v33 = vor.u32 %v2060_v52, %v2056_v14  ;;  %1351 = vst.msk [vmem:[#allocation2 + $0x4c] sm:$0x3] %vm1335_vm14, %v1318_v58  ;;  %v6503_v26 = vld.sshfl [vmem:[#allocation1 + $0x18] sm:$0xff pattern:$0x73625140]  ;;  %v5581_v53 = vld [vmem:[%s7385_s3 + $0xe0] sm:$0xff] }
 0x25d   : > { %v1978_v24 = vpack.c.b16 %v1962_v34, %v1962_v34  ;;  %v2197_v47 = vsel %vm2168_vm4, %v2193_v61, %v2196_v22  ;;  %2353 = vst [vmem:[#allocation1 + $0x21] ss:$4 sm:$0xff] %v2204_v20  ;;  %v2146_v3 = vrot.slane %v1908_v28, 6  ;;  %v1882_v46 = vshrl.u32 %v6470_v29, 16  ;;  %v1754_v48 = vld [vmem:[#allocation2 + $0x30] sm:$0x3]  ;;  %2680 = vmatpush.bf16.msra.mxu1 %v5581_v53 }
 0x25e   : > { %v1898_v42 = vshll.u32 %v1819_v35, 16  ;;  %v1522_v18 = vpop.permute.xlu0 %1521  ;;  %2351 = vst [vmem:[#allocation1 + $0x20] ss:$4 sm:$0xff] %v2197_v47  ;;  %v1896_v5 = vshrl.u32 %v1819_v35, 16  ;;  %v2145_v62 = vrot.slane %v2061_v33, 2  ;;  %v6501_v56 = vpack.c.b16 %v1805_v38, %v1805_v38  ;;  %v5580_v55 = vld [vmem:[%s7385_s3 + $0xd8] sm:$0xff] }
 0x25f   : > { %v2051_v37 = vshll.u32 %v1978_v24, 16  ;;  %v1587_v44 = vsel %vm6275_vm0, %v1522_v18, %v1586_v30  ;;  %v2242_v19 = vsel %vm674_vm9, %v1724_v31, %v2146_v3  ;;  %v2049_v9 = vshrl.u32 %v1978_v24, 16  ;;  %v1721_v6 = vld [vmem:[#allocation2 + $0x28] sm:$0x3] }
 0x260   : > { %v1900_v41 = vrot.slane %v1898_v42, 1  ;;  %1588 = vst [vmem:[#allocation2 + $0x48] sm:$0x7] %v1587_v44  ;;  %v1887_v40 = vor.u32 %v1886_v25, %v1882_v46  ;;  %v2246_v10 = vsel %vm2168_vm4, %v2242_v19, %v2245_v8  ;;  %v2144_v39 = vrot.slane %v1755_v49, 4  ;;  %v5579_v18 = vld [vmem:[%s7385_s3 + $0xd0] sm:$0xff] }
 0x261   : > { %v2053_v0 = vrot.slane %v2051_v37, 1  ;;  %v1677_v50 = vpop.permute.xlu1 %1676  ;;  %1712 = vst.msk [vmem:[#allocation2 + $0x48] sm:$0x3] %vm1696_vm1, %v1679_v57  ;;  %v1912_v4 = vshll.u32 %v6501_v56, 16  ;;  %v2141_v15 = vrot.slane %v1754_v48, 4  ;;  %2681 = vmatpush.bf16.msra.mxu1 %v5580_v55 }
 0x262   : > { %v1901_v43 = vor.u32 %v1900_v41, %v1896_v5  ;;  %2369 = vst [vmem:[#allocation1 + $0x3] ss:$4 sm:$0xff] %v2246_v10  ;;  %v2238_v61 = vsel %vm2164_vm2, %v2144_v39, %v2145_v62  ;;  %v2137_v23 = vrot.slane %v1887_v40, 6  ;;  %v1738_v58 = vld [vmem:[#allocation2 + $0x2c] sm:$0x7] }
 0x263   : > { %v2054_v29 = vor.u32 %v2053_v0, %v2049_v9  ;;  %1711 = vst.msk [vmem:[#allocation2 + $0x44] sm:$0x3] %vm1696_vm1, %v1677_v50  ;;  %v1769_v21 = vld [vmem:[#allocation2 + $0x2c] sm:$0x7]  ;;  %v1802_v60 = vunpack.c.l.b16 %v1738_v58  ;;  %v6523_v22 = vrot.slane %v1912_v4, 1 }
 0x264   : > { %v2143_v51 = vrot.slane %v1901_v43, 6  ;;  %v6517_v1 = vld [vmem:[#allocation2 + $0x2c] sm:$0x3]  ;;  %v1961_v2 = vunpack.c.l.b16 %v1769_v21  ;;  %v6521_v17 = vsel %vm674_vm9, %v1721_v6, %v2137_v23 }
 0x265   : > { %v2362_v36 = vld.sshfl [vmem:[#allocation1 + $0x20] sm:$0xff pattern:$0x73625140]  ;;  %v2142_v59 = vrot.slane %v2054_v29, 2  ;;  %v1776_v27 = vld [vmem:[#allocation2 + $0x4c] sm:$0x7]  ;;  %v1818_v7 = vpack.c.b16 %v1802_v60, %v1802_v60  ;;  %2682 = vmatpush.bf16.msra.mxu1 %v5579_v18 }
 0x266   : > { %v2235_v32 = vsel %vm674_vm9, %v1723_v11, %v2143_v51  ;;  %v1675_v54 = vpop.permute.xlu0 %1674  ;;  %2603 = vmatmul.bf16.gmra.mxu1 %v2362_v36  ;;  %v1968_v34 = vunpack.c.l.b16 %v1776_v27  ;;  %v1977_v14 = vpack.c.b16 %v1961_v2, %v1961_v2  ;;  %v2138_v52 = vrot.slane %v6517_v1, 4  ;;  %v1760_v8 = vld [vmem:[#allocation2 + $0x4c] sm:$0x3]  ;;  %v2363_v62 = vld.sshfl [vmem:[#allocation1 + $0x28] sm:$0xff pattern:$0x73625140] }
 0x267   : > { %v2239_v45 = vsel %vm2168_vm4, %v2235_v32, %v2238_v61  ;;  %1710 = vst.msk [vmem:[#allocation2 + $0x40] sm:$0x3] %vm1696_vm1, %v1675_v54  ;;  %v1891_v20 = vshll.u32 %v1818_v7, 16  ;;  %v2231_v63 = vsel %vm2164_vm2, %v2141_v15, %v2142_v59  ;;  %v1889_v31 = vshrl.u32 %v1818_v7, 16  ;;  %2632 = vmatmul.bf16.gmra.mxu2 %v2363_v62  ;;  %v5578_v51 = vld [vmem:[%s7385_s3 + $0xc8] sm:$0xff]  ;;  %v5577_v2 = vld [vmem:[%s7385_s3 + $0xc0] sm:$0xff] }
 0x268   : > { %2368 = vst [vmem:[#allocation1 + $0x2] ss:$4 sm:$0xff] %v2239_v45  ;;  %v1744_v12 = vld [vmem:[#allocation2 + $0x48] sm:$0x7]  ;;  %v1984_v24 = vpack.c.b16 %v1968_v34, %v1968_v34  ;;  %v2044_v25 = vshll.u32 %v1977_v14, 16  ;;  %v2042_v37 = vshrl.u32 %v1977_v14, 16 }
 0x269   : > { %v1775_v35 = vld [vmem:[#allocation2 + $0x48] sm:$0x7]  ;;  %v1808_v16 = vunpack.c.l.b16 %v1744_v12  ;;  %v1893_v33 = vrot.slane %v1891_v20, 1  ;;  %v1722_v11 = vld [vmem:[#allocation2 + $0x2c] sm:$0x3]  ;;  %v2159_v23 = vrot.slane %v1760_v8, 4  ;;  %2683 = vmatpush.bf16.msra.mxu1 %v5578_v51 }
 0x26a   : > { %v1967_v28 = vunpack.c.l.b16 %v1775_v35  ;;  %v1743_v42 = vld [vmem:[#allocation2 + $0x44] sm:$0x7]  ;;  %v2093_v38 = vshll.u32 %v1984_v24, 16  ;;  %v2046_v13 = vrot.slane %v2044_v25, 1  ;;  %v2091_v3 = vshrl.u32 %v1984_v24, 16 }
 0x26b   : > { %v1824_v47 = vpack.c.b16 %v1808_v16, %v1808_v16  ;;  %v1774_v30 = vld [vmem:[#allocation2 + $0x44] sm:$0x7]  ;;  %v1894_v44 = vor.u32 %v1893_v33, %v1889_v31  ;;  %v1807_v49 = vunpack.c.l.b16 %v1743_v42  ;;  %v2364_v50 = vld.sshfl [vmem:[#allocation1 + $0x30] sm:$0xff pattern:$0x73625140]  ;;  %v1910_v42 = vshrl.u32 %v6501_v56, 16 }
 0x26c   : > { %v1983_v41 = vpack.c.b16 %v1967_v28, %v1967_v28  ;;  %v2095_v46 = vrot.slane %v2093_v38, 1  ;;  %v1966_v0 = vunpack.c.l.b16 %v1774_v30  ;;  %v2047_v19 = vor.u32 %v2046_v13, %v2042_v37  ;;  %2661 = vmatmul.bf16.gmra.mxu3 %v2364_v50  ;;  %v1759_v21 = vld [vmem:[#allocation2 + $0x48] sm:$0x3]  ;;  %v1727_v33 = vld [vmem:[#allocation2 + $0x44] sm:$0x3] }
 0x26d   : > { %v1933_v5 = vshll.u32 %v1824_v47, 16  ;;  %v1931_v43 = vshrl.u32 %v1824_v47, 16  ;;  %v2140_v40 = vrot.slane %v1894_v44, 6  ;;  %v1823_v29 = vpack.c.b16 %v1807_v49, %v1807_v49  ;;  %v1728_v7 = vld [vmem:[#allocation2 + $0x48] sm:$0x3]  ;;  %2684 = vmatpush.bf16.msra.mxu1 %v5577_v2 }
 0x26e   : > { %v2086_v57 = vshll.u32 %v1983_v41, 16  ;;  %v2096_v10 = vor.u32 %v2095_v46, %v2091_v3  ;;  %v2084_v39 = vshrl.u32 %v1983_v41, 16  ;;  %v2139_v61 = vrot.slane %v2047_v19, 2  ;;  %v1742_v4 = vld [vmem:[#allocation2 + $0x40] sm:$0x7] }
 0x26f   : > { %v1935_v9 = vrot.slane %v1933_v5, 1  ;;  %v1982_v54 = vpack.c.b16 %v1966_v0, %v1966_v0  ;;  %v2228_v53 = vsel %vm674_vm9, %v1722_v11, %v2140_v40  ;;  %v1926_v45 = vshll.u32 %v1823_v29, 16  ;;  %v1773_v1 = vld [vmem:[#allocation2 + $0x40] sm:$0x7]  ;;  %v1758_v3 = vld [vmem:[#allocation2 + $0x44] sm:$0x3] }
 0x270   : > { %v2088_v36 = vrot.slane %v2086_v57, 1  ;;  %v2160_v48 = vrot.slane %v2096_v10, 2  ;;  %v2224_v58 = vsel %vm2164_vm2, %v2138_v52, %v2139_v61  ;;  %v2232_v59 = vsel %vm2168_vm4, %v2228_v53, %v2231_v63  ;;  %v2365_v63 = vld.sshfl [vmem:[#allocation1 + $0x38] sm:$0xff pattern:$0x73625140] }
 0x271   : > { %v1936_v32 = vor.u32 %v1935_v9, %v1931_v43  ;;  %v2225_v27 = vsel %vm2168_vm4, %v6521_v17, %v2224_v58  ;;  %2367 = vst [vmem:[#allocation1 + $0x1] ss:$4 sm:$0xff] %v2232_v59  ;;  %v1924_v34 = vshrl.u32 %v1823_v29, 16  ;;  %v1928_v12 = vrot.slane %v1926_v45, 1  ;;  %v1757_v49 = vld [vmem:[#allocation2 + $0x40] sm:$0x3] }
 0x272   : > { %v2089_v60 = vor.u32 %v2088_v36, %v2084_v39  ;;  %v2273_v6 = vsel %vm2164_vm2, %v2159_v23, %v2160_v48  ;;  %2366 = vst [vmem:[#allocation1] ss:$4 sm:$0xff] %v2225_v27  ;;  %v2079_v35 = vshll.u32 %v1982_v54, 16  ;;  %v1806_v16 = vunpack.c.l.b16 %v1742_v4  ;;  %v1726_v39 = vld [vmem:[#allocation2 + $0x40] sm:$0x3] }
 0x273   : > { %v2158_v55 = vrot.slane %v1936_v32, 6  ;;  %v2156_v20 = vrot.slane %v1759_v21, 4  ;;  %v1929_v24 = vor.u32 %v1928_v12, %v1924_v34  ;;  %v1965_v25 = vunpack.c.l.b16 %v1773_v1  ;;  %v1725_v11 = vld [vmem:[#allocation2 + $0x3c] sm:$0x3] }
 0x274   : > { %v2157_v15 = vrot.slane %v2089_v60, 2  ;;  %v2077_v47 = vshrl.u32 %v1982_v54, 16  ;;  %v2081_v17 = vrot.slane %v2079_v35, 1  ;;  %v1822_v28 = vpack.c.b16 %v1806_v16, %v1806_v16 }
 0x275   : > { %v2270_v14 = vsel %vm674_vm9, %v1728_v7, %v2158_v55  ;;  %v2155_v30 = vrot.slane %v1929_v24, 6  ;;  %v1981_v31 = vpack.c.b16 %v1965_v25, %v1965_v25  ;;  %v1915_v13 = vor.u32 %v6523_v22, %v1910_v42 }
 0x276   : > { %v2274_v52 = vsel %vm2168_vm4, %v2270_v14, %v2273_v6  ;;  %v2266_v18 = vsel %vm2164_vm2, %v2156_v20, %v2157_v15  ;;  %v2082_v37 = vor.u32 %v2081_v17, %v2077_v47  ;;  %v1919_v38 = vshll.u32 %v1822_v28, 16 }
 0x277   : > { %2373 = vst [vmem:[#allocation1 + $0x23] ss:$4 sm:$0xff] %v2274_v52  ;;  %v2263_v5 = vsel %vm674_vm9, %v1727_v33, %v2155_v30  ;;  %v1917_v41 = vshrl.u32 %v1822_v28, 16  ;;  %v2072_v44 = vshll.u32 %v1981_v31, 16  ;;  %v2070_v56 = vshrl.u32 %v1981_v31, 16 }
 0x278   : > { %v2154_v8 = vrot.slane %v2082_v37, 2  ;;  %v2267_v46 = vsel %vm2168_vm4, %v2263_v5, %v2266_v18  ;;  %v1921_v0 = vrot.slane %v1919_v38, 1  ;;  %v2149_v50 = vrot.slane %v1915_v13, 6 }
 0x279   : > { %2372 = vst [vmem:[#allocation1 + $0x22] ss:$4 sm:$0xff] %v2267_v46  ;;  %v2074_v62 = vrot.slane %v2072_v44, 1  ;;  %v2374_v19 = vld.sshfl [vmem:[#allocation1] sm:$0xff pattern:$0x73625140] }
 0x27a   : > { %v1922_v43 = vor.u32 %v1921_v0, %v1917_v41  ;;  %2608 = vmatmul.bf16.gmra.mxu1 %v2374_v19  ;;  %v2375_v9 = vld.sshfl [vmem:[#allocation1 + $0x8] sm:$0xff pattern:$0x73625140]  ;;  %v2376_v57 = vld.sshfl [vmem:[#allocation1 + $0x10] sm:$0xff pattern:$0x73625140]  ;;  %v2249_v36 = vsel %vm674_vm9, %v1725_v11, %v2149_v50 }
 0x27b   : > { %v2075_v22 = vor.u32 %v2074_v62, %v2070_v56  ;;  %v2153_v40 = vrot.slane %v1758_v3, 4  ;;  %2637 = vmatmul.bf16.gmra.mxu2 %v2375_v9  ;;  %v2150_v29 = vrot.slane %v1757_v49, 4  ;;  %v2377_v58 = vld.sshfl [vmem:[#allocation1 + $0x18] sm:$0xff pattern:$0x73625140]  ;;  %v5740_v1 = vmov 0  }
 0x27c   : > { %v2152_v10 = vrot.slane %v1922_v43, 6  ;;  %2666 = vmatmul.bf16.gmra.mxu3 %v2376_v57  ;;  %2723 = vst.msk [vmem:[#allocation3] sm:$0x7] %vm2722_vm5, %v5740_v1 }
 0x27d   : > { %v2151_v51 = vrot.slane %v2075_v22, 2  ;;  %v2259_v61 = vsel %vm2164_vm2, %v2153_v40, %v2154_v8  ;;  %2724 = vst.msk [vmem:[#allocation3 + $0x18] sm:$0x7] %vm2722_vm5, %v5740_v1 }
 0x27e   : > { %v2256_v32 = vsel %vm674_vm9, %v1726_v39, %v2152_v10  ;;  %2725 = vst.msk [vmem:[#allocation3 + $0x30] sm:$0x7] %vm2722_vm5, %v5740_v1 }
 0x27f   : > { %v2252_v54 = vsel %vm2164_vm2, %v2150_v29, %v2151_v51  ;;  %v2260_v53 = vsel %vm2168_vm4, %v2256_v32, %v2259_v61  ;;  %2726 = vst.msk [vmem:[#allocation3 + $0x48] sm:$0x7] %vm2722_vm5, %v5740_v1 }
 0x280   : > { %v2253_v23 = vsel %vm2168_vm4, %v2249_v36, %v2252_v54  ;;  %2371 = vst [vmem:[#allocation1 + $0x21] ss:$4 sm:$0xff] %v2260_v53 }
 0x281   : > { %2370 = vst [vmem:[#allocation1 + $0x20] ss:$4 sm:$0xff] %v2253_v23 }
 0x282   : > { %2728 = vst.msk [vmem:[#allocation3 + $0x14] sm:$0x7] %vm2722_vm5, %v5740_v1 }
 0x283   : > { %2729 = vst.msk [vmem:[#allocation3 + $0x2c] sm:$0x7] %vm2722_vm5, %v5740_v1  ;;  %v2734_v27 = vld [vmem:[#allocation3] sm:$0x1]  ;;  %v2809_v7 = vld [vmem:[#allocation3] sm:$0x4] }
 0x284   : > { %2730 = vst.msk [vmem:[#allocation3 + $0x44] sm:$0x7] %vm2722_vm5, %v5740_v1  ;;  %v2735_v34 = vsel %vm6570_vm7, 0, %v2734_v27  ;;  %v2810_v12 = vsel %vm6576_vm13, 0, %v2809_v7  ;;  %v2752_v28 = vld [vmem:[#allocation3 + $0x18] sm:$0x1] }
 0x285   : > { %2731 = vst.msk [vmem:[#allocation3 + $0x5c] sm:$0x7] %vm2722_vm5, %v5740_v1  ;;  %v2753_v30 = vsel %vm6570_vm7, 0, %v2752_v28  ;;  %v2827_v18 = vld [vmem:[#allocation3 + $0x18] sm:$0x4] }
 0x286   : > { %2736 = vst [vmem:[#allocation3] sm:$0x1] %v2735_v34  ;;  %v2828_v33 = vsel %vm6576_vm13, 0, %v2827_v18  ;;  %v2770_v37 = vld [vmem:[#allocation3 + $0x30] sm:$0x1] }
 0x287   : > { %2811 = vst [vmem:[#allocation3] sm:$0x4] %v2810_v12  ;;  %v2771_v13 = vsel %vm6570_vm7, 0, %v2770_v37  ;;  %v2845_v3 = vld [vmem:[#allocation3 + $0x30] sm:$0x4] }
 0x288   : > { %v2378_v48 = vld.sshfl [vmem:[#allocation1 + $0x20] sm:$0xff pattern:$0x73625140]  ;;  %v2379_v45 = vld.sshfl [vmem:[#allocation1 + $0x28] sm:$0xff pattern:$0x73625140] }
 0x289   : > { %v2380_v4 = vld.sshfl [vmem:[#allocation1 + $0x30] sm:$0xff pattern:$0x73625140]  ;;  %v2381_v59 = vld.sshfl [vmem:[#allocation1 + $0x38] sm:$0xff pattern:$0x73625140] }
 0x28a   : > { %2613 = vmatmul.bf16.gmra.mxu1 %v2378_v48  ;;  %v2749_v14 = vld [vmem:[#allocation3 + $0x14] sm:$0x1]  ;;  %v2824_v35 = vld [vmem:[#allocation3 + $0x14] sm:$0x4]  ;;  %v2767_v52 = vld [vmem:[#allocation3 + $0x2c] sm:$0x1] }
 0x28b   : > { %2642 = vmatmul.bf16.gmra.mxu2 %v2379_v45  ;;  %v2750_v16 = vsel %vm6570_vm7, 0, %v2749_v14  ;;  %v2825_v20 = vsel %vm6576_vm13, 0, %v2824_v35  ;;  %v2842_v24 = vld [vmem:[#allocation3 + $0x2c] sm:$0x4]  ;;  %v2768_v25 = vsel %vm6570_vm7, 0, %v2767_v52  ;;  %v2846_v41 = vsel %vm6576_vm13, 0, %v2845_v3 }
 0x28c   : > { %2671 = vmatmul.bf16.gmra.mxu3 %v2380_v4  ;;  %2751 = vst [vmem:[#allocation3 + $0x14] sm:$0x1] %v2750_v16  ;;  %v2843_v47 = vsel %vm6576_vm13, 0, %v2842_v24  ;;  %v2788_v0 = vld [vmem:[#allocation3 + $0x48] sm:$0x1] }
 0x28d   : > { %2826 = vst [vmem:[#allocation3 + $0x14] sm:$0x4] %v2825_v20  ;;  %v2863_v56 = vld [vmem:[#allocation3 + $0x48] sm:$0x4]  ;;  %v2789_v43 = vsel %vm6570_vm7, 0, %v2788_v0 }
 0x28e   : > { %v3167_v17 = vld [vmem:[#allocation3] sm:$0x7]  ;;  %2769 = vst [vmem:[#allocation3 + $0x2c] sm:$0x1] %v2768_v25  ;;  %v2864_v9 = vsel %vm6576_vm13, 0, %v2863_v56 }
 0x28f   : > { %v3312_v42 = vunpack.c.l.b16 %v3167_v17  ;;  %2844 = vst [vmem:[#allocation3 + $0x2c] sm:$0x4] %v2843_v47  ;;  %v2785_v50 = vld [vmem:[#allocation3 + $0x44] sm:$0x1]  ;;  %v2860_v51 = vld [vmem:[#allocation3 + $0x44] sm:$0x4] }
 0x290   : > { %2754 = vst [vmem:[#allocation3 + $0x18] sm:$0x1] %v2753_v30  ;;  %v2786_v29 = vsel %vm6570_vm7, 0, %v2785_v50  ;;  %v2861_v36 = vsel %vm6576_vm13, 0, %v2860_v51  ;;  %v2803_v23 = vld [vmem:[#allocation3 + $0x5c] sm:$0x1] }
 0x291   : > { %v3328_v38 = vpack.c.b16 %v3312_v42, %v3312_v42  ;;  %2829 = vst [vmem:[#allocation3 + $0x18] sm:$0x4] %v2828_v33  ;;  %v2804_v4 = vsel %vm6570_vm7, 0, %v2803_v23  ;;  %v2737_v34 = vld [vmem:[#allocation3 + $0x4] sm:$0x1] }
 0x292   : > { %2772 = vst [vmem:[#allocation3 + $0x30] sm:$0x1] %v2771_v13  ;;  %v2738_v16 = vsel %vm6570_vm7, 0, %v2737_v34  ;;  %v2812_v20 = vld [vmem:[#allocation3 + $0x4] sm:$0x4] }
 0x293   : > { %v3347_v8 = vshll.u32 %v3328_v38, 16  ;;  %2847 = vst [vmem:[#allocation3 + $0x30] sm:$0x4] %v2846_v41  ;;  %v3345_v49 = vshrl.u32 %v3328_v38, 16  ;;  %v2813_v47 = vsel %vm6576_vm13, 0, %v2812_v20 }
 0x294   : > { %v3267_v5 = vld [vmem:[#allocation3 + $0x14] sm:$0x7]  ;;  %2790 = vst [vmem:[#allocation3 + $0x48] sm:$0x1] %v2789_v43  ;;  %v2740_v17 = vld [vmem:[#allocation3 + $0x8] sm:$0x1] }
 0x295   : > { %v3907_v46 = vunpack.c.l.b16 %v3267_v5  ;;  %v3349_v62 = vrot.slane %v3347_v8, 1  ;;  %2865 = vst [vmem:[#allocation3 + $0x48] sm:$0x4] %v2864_v9  ;;  %v2741_v38 = vsel %vm6570_vm7, 0, %v2740_v17  ;;  %v2815_v13 = vld [vmem:[#allocation3 + $0x8] sm:$0x4] }
 0x296   : > { %v3271_v57 = vld [vmem:[#allocation3 + $0x2c] sm:$0x7]  ;;  %2787 = vst [vmem:[#allocation3 + $0x44] sm:$0x1] %v2786_v29 }
 0x297   : > { %v3923_v19 = vpack.c.b16 %v3907_v46, %v3907_v46  ;;  %v3350_v40 = vor.u32 %v3349_v62, %v3345_v49  ;;  %v3911_v39 = vunpack.c.l.b16 %v3271_v57  ;;  %2862 = vst [vmem:[#allocation3 + $0x44] sm:$0x4] %v2861_v36  ;;  %v2816_v57 = vsel %vm6576_vm13, 0, %v2815_v13  ;;  %v2818_v50 = vld [vmem:[#allocation3 + $0xc] sm:$0x4] }
 0x298   : > { %v3171_v32 = vld [vmem:[#allocation3 + $0x18] sm:$0x7]  ;;  %2805 = vst [vmem:[#allocation3 + $0x5c] sm:$0x1] %v2804_v4 }
 0x299   : > { %v3960_v10 = vshll.u32 %v3923_v19, 16  ;;  %v3958_v61 = vshrl.u32 %v3923_v19, 16  ;;  %3456 = vrot.lane.b32.xlu0 %v3350_v40, %s5738_s23  ;;  %v3927_v53 = vpack.c.b16 %v3911_v39, %v3911_v39  ;;  %v3316_v48 = vunpack.c.l.b16 %v3171_v32  ;;  %2739 = vst [vmem:[#allocation3 + $0x4] sm:$0x1] %v2738_v16  ;;  %v2743_v19 = vld [vmem:[#allocation3 + $0xc] sm:$0x1] }
 0x29a   : > { %2685 = vmatmul.bf16.vlgmr.msra.gmra.mxu1 %v6503_v26  ;;  %v3175_v45 = vld [vmem:[#allocation3 + $0x30] sm:$0x7]  ;;  %2814 = vst [vmem:[#allocation3 + $0x4] sm:$0x4] %v2813_v47  ;;  %v2744_v29 = vsel %vm6570_vm7, 0, %v2743_v19 }
 0x29b   : > { %v3962_v54 = vrot.slane %v3960_v10, 1  ;;  %v3988_v27 = vshll.u32 %v3927_v53, 16  ;;  %v3320_v7 = vunpack.c.l.b16 %v3175_v45  ;;  %v3986_v12 = vshrl.u32 %v3927_v53, 16  ;;  %2742 = vst [vmem:[#allocation3 + $0x8] sm:$0x1] %v2741_v38 }
 0x29c   : > { %v3332_v14 = vpack.c.b16 %v3316_v48, %v3316_v48  ;;  %v3179_v30 = vld [vmem:[#allocation3 + $0x48] sm:$0x7]  ;;  %2817 = vst [vmem:[#allocation3 + $0x8] sm:$0x4] %v2816_v57  ;;  %v2746_v39 = vld [vmem:[#allocation3 + $0x10] sm:$0x1] }
 0x29d   : > { %v3963_v1 = vor.u32 %v3962_v54, %v3958_v61  ;;  %v3990_v24 = vrot.slane %v3988_v27, 1  ;;  %v3336_v25 = vpack.c.b16 %v3320_v7, %v3320_v7  ;;  %v3324_v37 = vunpack.c.l.b16 %v3179_v30  ;;  %v2821_v54 = vld [vmem:[#allocation3 + $0x10] sm:$0x4]  ;;  %2745 = vst [vmem:[#allocation3 + $0xc] sm:$0x1] %v2744_v29 }
 0x29e   : > { %v3373_v28 = vshrl.u32 %v3332_v14, 16  ;;  %v3375_v42 = vshll.u32 %v3332_v14, 16  ;;  %v3275_v8 = vld [vmem:[#allocation3 + $0x44] sm:$0x7]  ;;  %v2747_v36 = vsel %vm6570_vm7, 0, %v2746_v39  ;;  %v2822_v23 = vsel %vm6576_vm13, 0, %v2821_v54 }
 0x29f   : > { %4054 = vrot.lane.b32.xlu2 %v3963_v1, %s5738_s23  ;;  %v3991_v18 = vor.u32 %v3990_v24, %v3986_v12  ;;  %v3403_v33 = vshll.u32 %v3336_v25, 16  ;;  %v3401_v41 = vshrl.u32 %v3336_v25, 16  ;;  %v3340_v62 = vpack.c.b16 %v3324_v37, %v3324_v37  ;;  %2748 = vst [vmem:[#allocation3 + $0x10] sm:$0x1] %v2747_v36  ;;  %v2830_v57 = vld [vmem:[#allocation3 + $0x1c] sm:$0x4] }
 0x2a0   : > { %v3377_v5 = vrot.slane %v3375_v42, 1  ;;  %v3915_v9 = vunpack.c.l.b16 %v3275_v8  ;;  %v2819_v48 = vsel %vm6576_vm13, 0, %v2818_v50  ;;  %2823 = vst [vmem:[#allocation3 + $0x10] sm:$0x4] %v2822_v23  ;;  %v2758_v8 = vld [vmem:[#allocation3 + $0x20] sm:$0x1] }
 0x2a1   : > { %4062 = vrot.lane.b32.xlu0 %v3991_v18, %s5738_s23  ;;  %v3405_v56 = vrot.slane %v3403_v33, 1  ;;  %v3429_v51 = vshrl.u32 %v3340_v62, 16  ;;  %2820 = vst [vmem:[#allocation3 + $0xc] sm:$0x4] %v2819_v48 }
 0x2a2   : > { %v3378_v43 = vor.u32 %v3377_v5, %v3373_v28  ;;  %v3931_v61 = vpack.c.b16 %v3915_v9, %v3915_v9  ;;  %v2755_v9 = vld [vmem:[#allocation3 + $0x1c] sm:$0x1] }
 0x2a3   : > { %v3406_v10 = vor.u32 %v3405_v56, %v3401_v41 }
 0x2a4   : > { %3464 = vrot.lane.b32.xlu1 %v3378_v43, %s5738_s23  ;;  %v4014_v45 = vshrl.u32 %v3931_v61, 16  ;;  %v4016_v4 = vshll.u32 %v3931_v61, 16 }
 0x2a6   : > { %v4018_v12 = vrot.slane %v4016_v4, 1 }
 0x2a7   : > { %3472 = vrot.lane.b32.xlu2 %v3406_v10, %s5738_s23 }
 0x2a8   : > { %v4019_v24 = vor.u32 %v4018_v12, %v4014_v45 }
 0x2aa   : > { %2690 = vmatmul.bf16.gmra.mxu1 %v2365_v63 }
 0x2ac   : > { %4070 = vrot.lane.b32.xlu1 %v4019_v24, %s5738_s23 }
 0x2ba   : > { %2695 = vmatmul.bf16.gmra.mxu1 %v2377_v58  ;;  %v2878_v58 = vld [vmem:[#allocation3 + $0x5c] sm:$0x4] }
 0x2bb   : > { %v2879_v35 = vsel %vm6576_vm13, 0, %v2878_v58 }
 0x2bc   : > { %2880 = vst [vmem:[#allocation3 + $0x5c] sm:$0x4] %v2879_v35 }
 0x2c3   : > { %v3279_v32 = vld [vmem:[#allocation3 + $0x5c] sm:$0x7] }
 0x2ca   : > { %2700 = vmatmul.bf16.gmra.mxu1 %v2381_v59  ;;  %v6627_v59 = vld [vmem:[%s7386_s4] ss:$0 sm:$0xff] }
 0x2d3   : > { %v6556_v21 = vpop.f32.mrf.mxu1 }
 0x2d4   : > { %v2600_v46 = vadd.f32 %v6627_v59, %v6556_v21  ;;  %v3431_v21 = vshll.u32 %v3340_v62, 16 }
 0x2d6   : > { %v3433_v53 = vrot.slane %v3431_v21, 1 }
 0x2d8   : > { %v3434_v27 = vor.u32 %v3433_v53, %v3429_v51 }
 0x2da   : > { %v6591_v63 = vpop.f32.mrf.mxu2  ;;  %3480 = vrot.lane.b32.xlu0 %v3434_v27, %s5738_s23 }
 0x2db   : > { %v6558_v60 = vpop.f32.mrf.mxu1  ;;  %v6607_v44 = vpop.f32.mrf.mxu3  ;;  %v2629_v40 = vadd.f32 %v6591_v63, %v2600_v46  ;;  %v3919_v63 = vunpack.c.l.b16 %v3279_v32  ;;  %v2759_v46 = vsel %vm6570_vm7, 0, %v2758_v8 }
 0x2dc   : > { %v2602_v14 = vadd.f32 %v6627_v59, %v6558_v60  ;;  %2760 = vst [vmem:[#allocation3 + $0x20] sm:$0x1] %v2759_v46  ;;  %v3112_v46 = vld [vmem:[#allocation3 + $0x10] sm:$0x7] }
 0x2dd   : > { %v2658_v58 = vadd.f32 %v6607_v44, %v2629_v40  ;;  %v3935_v7 = vpack.c.b16 %v3919_v63, %v3919_v63  ;;  %v2831_v40 = vsel %vm6576_vm13, 0, %v2830_v57 }
 0x2de   : > { %2832 = vst [vmem:[#allocation3 + $0x1c] sm:$0x4] %v2831_v40 }
 0x2df   : > { %v4042_v16 = vshrl.u32 %v3935_v7, 16  ;;  %v4044_v20 = vshll.u32 %v3935_v7, 16 }
 0x2e1   : > { %v4046_v17 = vrot.slane %v4044_v20, 1 }
 0x2e2   : > { %v6613_v22 = vpop.f32.mrf.mxu2 }
 0x2e3   : > { %v6560_v55 = vpop.f32.mrf.mxu1  ;;  %v6633_v52 = vpop.f32.mrf.mxu3  ;;  %v2631_v25 = vadd.f32 %v6613_v22, %v2602_v14  ;;  %v4047_v42 = vor.u32 %v4046_v17, %v4042_v16 }
 0x2e4   : > { %v2605_v33 = vadd.f32 %v6627_v59, %v6560_v55 }
 0x2e5   : > { %v2660_v30 = vadd.f32 %v6633_v52, %v2631_v25  ;;  %4078 = vrot.lane.b32.xlu2 %v4047_v42, %s5738_s23  ;;  %v2833_v52 = vld [vmem:[#allocation3 + $0x20] sm:$0x4] }
 0x2e6   : > { %v2834_v55 = vsel %vm6576_vm13, 0, %v2833_v52 }
 0x2e7   : > { %2835 = vst [vmem:[#allocation3 + $0x20] sm:$0x4] %v2834_v55 }
 0x2ea   : > { %v6642_v49 = vpop.f32.mrf.mxu2 }
 0x2eb   : > { %v6563_v2 = vpop.f32.mrf.mxu1  ;;  %v2634_v5 = vadd.f32 %v6642_v49, %v2605_v33  ;;  %v2756_v49 = vsel %vm6570_vm7, 0, %v2755_v9 }
 0x2ec   : > { %v2607_v10 = vadd.f32 %v6627_v59, %v6563_v2  ;;  %2757 = vst [vmem:[#allocation3 + $0x1c] sm:$0x1] %v2756_v49 }
 0x2ef   : > { %v2662_v1 = vpop.f32.mrf.mxu3 }
 0x2f0   : > { %v2663_v19 = vadd.f32 %v2662_v1, %v2634_v5  ;;  %v3109_v5 = vld [vmem:[#allocation3 + $0xc] sm:$0x7] }
 0x2f2   : > { %v2635_v47 = vpop.f32.mrf.mxu2 }
 0x2f3   : > { %v2636_v36 = vadd.f32 %v2635_v47, %v2607_v10 }
 0x2f7   : > { %v6585_v15 = vpop.f32.mrf.mxu1  ;;  %v2664_v37 = vpop.f32.mrf.mxu3 }
 0x2f8   : > { %v2610_v25 = vadd.f32 %v6627_v59, %v6585_v15 }
 0x2fe   : > { %v2638_v56 = vpop.f32.mrf.mxu2 }
 0x2ff   : > { %v6599_v31 = vpop.f32.mrf.mxu1  ;;  %v2667_v54 = vpop.f32.mrf.mxu3 }
 0x300   : > { %v2612_v9 = vadd.f32 %v6627_v59, %v6599_v31 }
 0x306   : > { %v2640_v12 = vpop.f32.mrf.mxu2 }
 0x307   : > { %v6617_v11 = vpop.f32.mrf.mxu1 }
 0x30f   : > { %v2616_v3 = vpop.f32.mrf.mxu1 }
 0x310   : > { %v6645_v0 = vadd.f32 %v6627_v59, %v2616_v3 }
 0x316   : > { %v6877_v2 = vpop.permute.xlu1 %3464 }
 0x317   : > { %v2686_v34 = vpop.f32.mrf.mxu1 }
 0x318   : > { %v2687_v35 = vadd.f32 %v2686_v34, %v2658_v58  ;;  %v3103_v58 = vld [vmem:[#allocation3 + $0x4] sm:$0x7]  ;;  %v2665_v34 = vadd.f32 %v2664_v37, %v2636_v36  ;;  %v2764_v36 = vld [vmem:[#allocation3 + $0x28] sm:$0x1] }
 0x31a   : > { %v2706_v44 = vmax.f32 %v2687_v35, 0.0  ;;  %v3106_v35 = vld [vmem:[#allocation3 + $0x8] sm:$0x7] }
 0x31c   : > { %v2714_v28 = vpack.c.bf16 %v2706_v44, %v2706_v44 }
 0x31e   : > { %v2889_v18 = vrot.slane %v2714_v28, 2 }
 0x31f   : > { %v2688_v60 = vpop.f32.mrf.mxu1 }
 0x320   : > { %v2899_v38 = vsel %vm674_vm9, %v2714_v28, %v2889_v18  ;;  %v2900_v22 = vsel %vm678_vm10, %v2714_v28, %v2889_v18  ;;  %v2689_v13 = vadd.f32 %v2688_v60, %v2660_v30  ;;  %v2639_v60 = vadd.f32 %v2638_v56, %v2610_v25 }
 0x321   : > { %v2902_v3 = vrot.slane %v2900_v22, 2  ;;  %2945 = vst [vmem:[#allocation1] ss:$2 sm:$0xff] %v2899_v38 }
 0x322   : > { %v2707_v41 = vmax.f32 %v2689_v13, 0.0  ;;  %v2669_v13 = vpop.f32.mrf.mxu3 }
 0x323   : > { %2949 = vst [vmem:[#allocation1 + $0x10] ss:$2 sm:$0xff] %v2902_v3 }
 0x324   : > { %v2715_v62 = vpack.c.bf16 %v2707_v41, %v2707_v41  ;;  %v2761_v41 = vld [vmem:[#allocation3 + $0x24] sm:$0x1] }
 0x326   : > { %v2890_v43 = vrot.slane %v2715_v62, 2 }
 0x327   : > { %v2691_v50 = vpop.f32.mrf.mxu1 }
 0x328   : > { %v2946_v21 = vld.sshfl [vmem:[#allocation1] sm:$0xff pattern:$0x75643120]  ;;  %v2905_v39 = vsel %vm674_vm9, %v2715_v62, %v2890_v43  ;;  %v2906_v29 = vsel %vm678_vm10, %v2715_v62, %v2890_v43  ;;  %v2692_v51 = vadd.f32 %v2691_v50, %v2663_v19  ;;  %v2762_v62 = vsel %vm6570_vm7, 0, %v2761_v41  ;;  %v2836_v43 = vld [vmem:[#allocation3 + $0x24] sm:$0x4] }
 0x329   : > { %v2908_v61 = vrot.slane %v2906_v29, 2  ;;  %2952 = vst [vmem:[#allocation1 + $0x20] ss:$2 sm:$0xff] %v2905_v39  ;;  %v2988_v32 = vshrl.u32 %v2946_v21, 16  ;;  %v2991_v48 = vshll.u32 %v2946_v21, 16  ;;  %v2668_v19 = vadd.f32 %v2667_v54, %v2639_v60  ;;  %v2643_v21 = vpop.f32.mrf.mxu2 }
 0x32a   : > { %v2708_v53 = vmax.f32 %v2692_v51, 0.0  ;;  %v2950_v63 = vld.sshfl [vmem:[#allocation1 + $0x10] sm:$0xff pattern:$0x75643120]  ;;  %2763 = vst [vmem:[#allocation3 + $0x24] sm:$0x1] %v2762_v62  ;;  %v2641_v54 = vadd.f32 %v2640_v12, %v2612_v9 }
 0x32b   : > { %2956 = vst [vmem:[#allocation1 + $0x30] ss:$2 sm:$0xff] %v2908_v61  ;;  %v2990_v23 = vrot.slane %v2988_v32, 7  ;;  %v2994_v45 = vshrl.u32 %v2950_v63, 16  ;;  %v2997_v7 = vshll.u32 %v2950_v63, 16 }
 0x32c   : > { %v2716_v4 = vpack.c.bf16 %v2708_v53, %v2708_v53 }
 0x32d   : > { %v2993_v1 = vor.u32 %v2991_v48, %v2990_v23  ;;  %v2996_v27 = vrot.slane %v2994_v45, 7  ;;  %v2837_v23 = vsel %vm6576_vm13, 0, %v2836_v43 }
 0x32e   : > { %v2891_v14 = vrot.slane %v2716_v4, 2  ;;  %2838 = vst [vmem:[#allocation3 + $0x24] sm:$0x4] %v2837_v23 }
 0x32f   : > { %v2693_v16 = vpop.f32.mrf.mxu1  ;;  %v3104_v20 = vsel %vm6688_vm3, %v2993_v1, %v3103_v58  ;;  %v2999_v24 = vor.u32 %v2997_v7, %v2996_v27 }
 0x330   : > { %v2953_v47 = vld.sshfl [vmem:[#allocation1 + $0x20] sm:$0xff pattern:$0x75643120]  ;;  %v2911_v44 = vsel %vm674_vm9, %v2716_v4, %v2891_v14  ;;  %v2912_v17 = vsel %vm678_vm10, %v2716_v4, %v2891_v14  ;;  %v2694_v28 = vadd.f32 %v2693_v16, %v2665_v34  ;;  %3105 = vst [vmem:[#allocation3 + $0x4] sm:$0x7] %v3104_v20  ;;  %v2765_v34 = vsel %vm6570_vm7, 0, %v2764_v36 }
 0x331   : > { %v2914_v42 = vrot.slane %v2912_v17, 2  ;;  %2958 = vst [vmem:[#allocation1] ss:$2 sm:$0xff] %v2911_v44  ;;  %v3107_v30 = vsel %vm6688_vm3, %v2999_v24, %v3106_v35  ;;  %v3000_v18 = vshrl.u32 %v2953_v47, 16  ;;  %v3003_v22 = vshll.u32 %v2953_v47, 16  ;;  %v2672_v24 = vpop.f32.mrf.mxu3 }
 0x332   : > { %v2709_v33 = vmax.f32 %v2694_v28, 0.0  ;;  %3108 = vst [vmem:[#allocation3 + $0x8] sm:$0x7] %v3107_v30  ;;  %v2957_v37 = vld.sshfl [vmem:[#allocation1 + $0x30] sm:$0xff pattern:$0x75643120]  ;;  %v2670_v20 = vadd.f32 %v2669_v13, %v2641_v54  ;;  %v2615_v17 = vadd.f32 %v6627_v59, %v6617_v11 }
 0x333   : > { %2961 = vst [vmem:[#allocation1 + $0x10] ss:$2 sm:$0xff] %v2914_v42  ;;  %v3006_v38 = vshrl.u32 %v2957_v37, 16  ;;  %v3002_v15 = vrot.slane %v3000_v18, 7  ;;  %v3009_v52 = vshll.u32 %v2957_v37, 16 }
 0x334   : > { %v2717_v3 = vpack.c.bf16 %v2709_v33, %v2709_v33  ;;  %2766 = vst [vmem:[#allocation3 + $0x28] sm:$0x1] %v2765_v34 }
 0x335   : > { %v3008_v8 = vrot.slane %v3006_v38, 7  ;;  %v3005_v55 = vor.u32 %v3003_v22, %v3002_v15 }
 0x336   : > { %v2892_v56 = vrot.slane %v2717_v3, 2 }
 0x337   : > { %v2696_v57 = vpop.f32.mrf.mxu1  ;;  %v3199_v50 = vld [vmem:[#allocation3 + $0x4] sm:$0x3]  ;;  %v3011_v49 = vor.u32 %v3009_v52, %v3008_v8  ;;  %v3110_v40 = vsel %vm6688_vm3, %v3005_v55, %v3109_v5  ;;  %v2645_v5 = vpop.f32.mrf.mxu2 }
 0x338   : > { %v3168_v10 = vld [vmem:[#allocation3 + $0x4] sm:$0x7]  ;;  %v2917_v39 = vsel %vm674_vm9, %v2717_v3, %v2892_v56  ;;  %v2918_v29 = vsel %vm678_vm10, %v2717_v3, %v2892_v56  ;;  %v2697_v51 = vadd.f32 %v2696_v57, %v2668_v19  ;;  %v3568_v61 = vunpack.c.l.b16 %v3199_v50  ;;  %3111 = vst [vmem:[#allocation3 + $0xc] sm:$0x7] %v3110_v40 }
 0x339   : > { %v3231_v32 = vld [vmem:[#allocation3 + $0x4] sm:$0x6]  ;;  %v2920_v53 = vrot.slane %v2918_v29, 2  ;;  %2963 = vst [vmem:[#allocation1 + $0x20] ss:$2 sm:$0xff] %v2917_v39  ;;  %v3113_v63 = vsel %vm6688_vm3, %v3011_v49, %v3112_v46  ;;  %v3313_v1 = vunpack.c.l.b16 %v3168_v10  ;;  %v2644_v3 = vadd.f32 %v2643_v21, %v2615_v17 }
 0x33a   : > { %v3200_v31 = vld [vmem:[#allocation3 + $0x8] sm:$0x3]  ;;  %v2710_v48 = vmax.f32 %v2697_v51, 0.0  ;;  %v3584_v45 = vpack.c.b16 %v3568_v61, %v3568_v61  ;;  %3114 = vst [vmem:[#allocation3 + $0x10] sm:$0x7] %v3113_v63  ;;  %v3808_v35 = vunpack.c.l.b16 %v3231_v32  ;;  %v2646_v57 = vadd.f32 %v2645_v5, %v6645_v0 }
 0x33b   : > { %v3569_v4 = vunpack.c.l.b16 %v3200_v31  ;;  %v3232_v58 = vld [vmem:[#allocation3 + $0x8] sm:$0x6]  ;;  %2966 = vst [vmem:[#allocation1 + $0x30] ss:$2 sm:$0xff] %v2920_v53  ;;  %v6716_v47 = vpack.c.b16 %v3313_v1, %v3313_v1  ;;  %v2673_v40 = vadd.f32 %v2672_v24, %v2644_v3  ;;  %v2674_v53 = vpop.f32.mrf.mxu3  ;;  %v3115_v5 = vld [vmem:[#allocation3 + $0x1c] sm:$0x7] }
 0x33c   : > { %v3809_v27 = vunpack.c.l.b16 %v3232_v58  ;;  %v3264_v7 = vld [vmem:[#allocation3 + $0x8] sm:$0x7]  ;;  %v2718_v12 = vpack.c.bf16 %v2710_v48, %v2710_v48  ;;  %3600 = vrot.lane.b32.xlu0 %v3584_v45, %s5738_s23  ;;  %v3824_v37 = vpack.c.b16 %v3808_v35, %v3808_v35  ;;  %v6726_v56 = vld.sshfl [vmem:[#allocation1 + $0x10] sm:$0xff pattern:$0x75643120] }
 0x33d   : > { %v3585_v14 = vpack.c.b16 %v3569_v4, %v3569_v4  ;;  %v3904_v44 = vunpack.c.l.b16 %v3264_v7  ;;  %v6720_v28 = vld.sshfl [vmem:[#allocation1] sm:$0xff pattern:$0x75643120]  ;;  %v3354_v41 = vshll.u32 %v6716_v47, 16  ;;  %v3352_v48 = vshrl.u32 %v6716_v47, 16 }
 0x33e   : > { %v3825_v16 = vpack.c.b16 %v3809_v27, %v3809_v27  ;;  %v2893_v25 = vrot.slane %v2718_v12, 2  ;;  %v3169_v52 = vld [vmem:[#allocation3 + $0x8] sm:$0x7]  ;;  %v3840_v9 = vrot.slane %v3824_v37, 1  ;;  %v3012_v39 = vshrl.u32 %v6720_v28, 16 }
 0x33f   : > { %3602 = vrot.lane.b32.xlu1 %v3585_v14, %s5738_s23  ;;  %v2698_v42 = vpop.f32.mrf.mxu1  ;;  %v3201_v38 = vld [vmem:[#allocation3 + $0xc] sm:$0x3]  ;;  %v3920_v8 = vpack.c.b16 %v3904_v44, %v3904_v44  ;;  %v3314_v49 = vunpack.c.l.b16 %v3169_v52  ;;  %v3356_v32 = vrot.slane %v3354_v41, 1  ;;  %v2675_v4 = vadd.f32 %v2674_v53, %v2646_v57 }
 0x340   : > { %v3841_v30 = vrot.slane %v3825_v16, 1  ;;  %v2923_v18 = vsel %vm674_vm9, %v2718_v12, %v2893_v25  ;;  %v2924_v60 = vsel %vm678_vm10, %v2718_v12, %v2893_v25  ;;  %v2699_v33 = vadd.f32 %v2698_v42, %v2670_v20  ;;  %v3233_v15 = vld [vmem:[#allocation3 + $0xc] sm:$0x6] }
 0x341   : > { %v2926_v22 = vrot.slane %v2924_v60, 2  ;;  %2968 = vst [vmem:[#allocation1] ss:$2 sm:$0xff] %v2923_v18  ;;  %v3265_v13 = vld [vmem:[#allocation3 + $0xc] sm:$0x7]  ;;  %v3570_v55 = vunpack.c.l.b16 %v3201_v38  ;;  %v3810_v62 = vunpack.c.l.b16 %v3233_v15  ;;  %v3939_v21 = vshll.u32 %v3920_v8, 16 }
 0x342   : > { %3858 = vrot.lane.b32.xlu2 %v3841_v30, %s5738_s23  ;;  %v2711_v11 = vmax.f32 %v2699_v33, 0.0  ;;  %v3202_v59 = vld [vmem:[#allocation3 + $0x10] sm:$0x3]  ;;  %v3905_v19 = vunpack.c.l.b16 %v3265_v13  ;;  %v6734_v0 = vld.sshfl [vmem:[#allocation1 + $0x20] sm:$0xff pattern:$0x75643120]  ;;  %v6740_v27 = vpack.c.b16 %v3314_v49, %v3314_v49  ;;  %v3357_v24 = vor.u32 %v3356_v32, %v3352_v48 }
 0x343   : > { %v3571_v46 = vunpack.c.l.b16 %v3202_v59  ;;  %2971 = vst [vmem:[#allocation1 + $0x10] ss:$2 sm:$0xff] %v2926_v22  ;;  %v3586_v51 = vpack.c.b16 %v3570_v55, %v3570_v55  ;;  %v3826_v61 = vpack.c.b16 %v3810_v62, %v3810_v62  ;;  %v3234_v54 = vld [vmem:[#allocation3 + $0x10] sm:$0x6]  ;;  %v3937_v1 = vshrl.u32 %v3920_v8, 16 }
 0x344   : > { %v2719_v43 = vpack.c.bf16 %v2711_v11, %v2711_v11  ;;  %v6732_v36 = vpack.c.b16 %v3905_v19, %v3905_v19  ;;  %v3266_v45 = vld [vmem:[#allocation3 + $0x10] sm:$0x7]  ;;  %v3170_v7 = vld [vmem:[#allocation3 + $0xc] sm:$0x7]  ;;  %v3941_v12 = vrot.slane %v3939_v21, 1  ;;  %v3811_v14 = vunpack.c.l.b16 %v3234_v54 }
 0x345   : > { %v3587_v50 = vpack.c.b16 %v3571_v46, %v3571_v46  ;;  %v3018_v35 = vshrl.u32 %v6726_v56, 16  ;;  %v6743_v16 = vld.sshfl [vmem:[#allocation1 + $0x30] sm:$0xff pattern:$0x75643120]  ;;  %v3842_v20 = vrot.slane %v3826_v61, 1  ;;  %v3906_v47 = vunpack.c.l.b16 %v3266_v45 }
 0x346   : > { %v2894_v10 = vrot.slane %v2719_v43, 2  ;;  %v3944_v25 = vshrl.u32 %v6732_v36, 16  ;;  %v3946_v17 = vshll.u32 %v6732_v36, 16  ;;  %v3315_v42 = vunpack.c.l.b16 %v3170_v7  ;;  %v3118_v60 = vld [vmem:[#allocation3 + $0x20] sm:$0x7] }
 0x347   : > { %3856 = vrot.lane.b32.xlu1 %v3840_v9, %s5738_s23  ;;  %3606 = vrot.lane.b32.xlu0 %v3587_v50, %s5738_s23  ;;  %v2701_v29 = vpop.f32.mrf.mxu1  ;;  %v3020_v30 = vrot.slane %v3018_v35, 7  ;;  %v3021_v18 = vshll.u32 %v6726_v56, 16  ;;  %v3014_v33 = vrot.slane %v3012_v39, 7  ;;  %v3015_v37 = vshll.u32 %v6720_v28, 16  ;;  %v2839_v11 = vld [vmem:[#allocation3 + $0x28] sm:$0x4] }
 0x348   : > { %v2929_v31 = vsel %vm674_vm9, %v2719_v43, %v2894_v10  ;;  %v2930_v63 = vsel %vm678_vm10, %v2719_v43, %v2894_v10  ;;  %v2702_v23 = vadd.f32 %v2701_v29, %v2673_v40  ;;  %v3024_v38 = vshrl.u32 %v6734_v0, 16  ;;  %v3121_v55 = vld [vmem:[#allocation3 + $0x24] sm:$0x7]  ;;  %v2776_v28 = vld [vmem:[#allocation3 + $0x38] sm:$0x1] }
 0x349   : > { %v2932_v58 = vrot.slane %v2930_v63, 2  ;;  %2973 = vst [vmem:[#allocation1 + $0x20] ss:$2 sm:$0xff] %v2929_v31  ;;  %v3942_v22 = vor.u32 %v3941_v12, %v3937_v1  ;;  %v3827_v13 = vpack.c.b16 %v3811_v14, %v3811_v14  ;;  %v3361_v3 = vshll.u32 %v6740_v27, 16  ;;  %v2851_v9 = vld [vmem:[#allocation3 + $0x38] sm:$0x4] }
 0x34a   : > { %3604 = vrot.lane.b32.xlu2 %v3586_v51, %s5738_s23  ;;  %v2712_v34 = vmax.f32 %v2702_v23, 0.0  ;;  %v3922_v41 = vpack.c.b16 %v3906_v47, %v3906_v47  ;;  %v3023_v8 = vor.u32 %v3021_v18, %v3020_v30  ;;  %v3017_v52 = vor.u32 %v3015_v37, %v3014_v33  ;;  %v6757_v57 = vld.sshfl [vmem:[#allocation1] sm:$0xff pattern:$0x75643120]  ;;  %v2848_v47 = vld [vmem:[#allocation3 + $0x34] sm:$0x4] }
 0x34b   : > { %2976 = vst [vmem:[#allocation1 + $0x30] ss:$2 sm:$0xff] %v2932_v58  ;;  %v3026_v46 = vrot.slane %v3024_v38, 7  ;;  %v6754_v56 = vpack.c.b16 %v3315_v42, %v3315_v42  ;;  %v3027_v43 = vshll.u32 %v6734_v0, 16  ;;  %v3948_v49 = vrot.slane %v3946_v17, 1 }
 0x34c   : > { %v2720_v44 = vpack.c.bf16 %v2712_v34, %v2712_v34  ;;  %v3119_v40 = vsel %vm6688_vm3, %v3023_v8, %v3118_v60  ;;  %v3116_v10 = vsel %vm6688_vm3, %v3017_v52, %v3115_v5  ;;  %v2972_v21 = vld.sshfl [vmem:[#allocation1 + $0x10] sm:$0xff pattern:$0x75643120]  ;;  %v3363_v29 = vrot.slane %v3361_v3, 1  ;;  %v2782_v17 = vld [vmem:[#allocation3 + $0x40] sm:$0x1] }
 0x34d   : > { %3120 = vst [vmem:[#allocation3 + $0x20] sm:$0x7] %v3119_v40  ;;  %v3029_v51 = vor.u32 %v3027_v43, %v3026_v46  ;;  %v2840_v61 = vsel %vm6576_vm13, 0, %v2839_v11  ;;  %v3843_v32 = vrot.slane %v3827_v13, 1  ;;  %v3953_v36 = vshll.u32 %v3922_v41, 16 }
 0x34e   : > { %v2895_v15 = vrot.slane %v2720_v44, 2  ;;  %3117 = vst [vmem:[#allocation3 + $0x1c] sm:$0x7] %v3116_v10  ;;  %v3030_v54 = vshrl.u32 %v6743_v16, 16  ;;  %v2777_v53 = vsel %vm6570_vm7, 0, %v2776_v28  ;;  %v2852_v23 = vsel %vm6576_vm13, 0, %v2851_v9 }
 0x34f   : > { %3458 = vrot.lane.b32.xlu1 %v3357_v24, %s5738_s23  ;;  %3860 = vrot.lane.b32.xlu0 %v3842_v20, %s5738_s23  ;;  %v2703_v59 = vpop.f32.mrf.mxu1  ;;  %v3122_v63 = vsel %vm6688_vm3, %v3029_v51, %v3121_v55  ;;  %2841 = vst [vmem:[#allocation3 + $0x28] sm:$0x4] %v2840_v61  ;;  %v3949_v48 = vor.u32 %v3948_v49, %v3944_v25  ;;  %v3359_v45 = vshrl.u32 %v6740_v27, 16  ;;  %v3033_v1 = vshll.u32 %v6743_v16, 16  ;;  %v2773_v27 = vld [vmem:[#allocation3 + $0x34] sm:$0x1] }
 0x350   : > { %v2935_v62 = vsel %vm674_vm9, %v2720_v44, %v2895_v15  ;;  %v2704_v19 = vadd.f32 %v2703_v59, %v2675_v4  ;;  %v2936_v50 = vsel %vm678_vm10, %v2720_v44, %v2895_v15  ;;  %v3368_v4 = vshll.u32 %v6754_v56, 16  ;;  %3123 = vst [vmem:[#allocation3 + $0x24] sm:$0x7] %v3122_v63  ;;  %v2857_v33 = vld [vmem:[#allocation3 + $0x40] sm:$0x4] }
 0x351   : > { %2978 = vst [vmem:[#allocation1] ss:$2 sm:$0xff] %v2935_v62  ;;  %v2938_v0 = vrot.slane %v2936_v50, 2  ;;  %v3032_v58 = vrot.slane %v3030_v54, 7  ;;  %v3042_v7 = vshrl.u32 %v2972_v21, 16  ;;  %v3364_v34 = vor.u32 %v3363_v29, %v3359_v45 }
 0x352   : > { %4048 = vrot.lane.b32.xlu2 %v3942_v22, %s5738_s23  ;;  %v2713_v39 = vmax.f32 %v2704_v19, 0.0  ;;  %2778 = vst [vmem:[#allocation3 + $0x38] sm:$0x1] %v2777_v53  ;;  %v3955_v12 = vrot.slane %v3953_v36, 1  ;;  %v3370_v20 = vrot.slane %v3368_v4, 1  ;;  %v3951_v24 = vshrl.u32 %v3922_v41, 16 }
 0x353   : > { %2853 = vst [vmem:[#allocation3 + $0x38] sm:$0x4] %v2852_v23  ;;  %v3035_v35 = vor.u32 %v3033_v1, %v3032_v58  ;;  %v3044_v16 = vrot.slane %v3042_v7, 7  ;;  %v3366_v42 = vshrl.u32 %v6754_v56, 16  ;;  %v3045_v13 = vshll.u32 %v2972_v21, 16 }
 0x354   : > { %v6770_v31 = vpack.c.bf16 %v2713_v39, %v2713_v39  ;;  %2981 = vst [vmem:[#allocation1 + $0x10] ss:$2 sm:$0xff] %v2938_v0  ;;  %v3204_v25 = vld [vmem:[#allocation3 + $0x20] sm:$0x3]  ;;  %v3956_v30 = vor.u32 %v3955_v12, %v3951_v24  ;;  %v2774_v3 = vsel %vm6570_vm7, 0, %v2773_v27  ;;  %v2849_v41 = vsel %vm6576_vm13, 0, %v2848_v47 }
 0x355   : > { %v3236_v44 = vld [vmem:[#allocation3 + $0x20] sm:$0x6]  ;;  %v3573_v18 = vunpack.c.l.b16 %v3204_v25  ;;  %v3235_v38 = vld [vmem:[#allocation3 + $0x1c] sm:$0x6]  ;;  %v3371_v5 = vor.u32 %v3370_v20, %v3366_v42  ;;  %v3047_v8 = vor.u32 %v3045_v13, %v3044_v16  ;;  %v3036_v52 = vshrl.u32 %v6757_v57, 16 }
 0x356   : > { %v2896_v14 = vrot.slane %v6770_v31, 2  ;;  %v3124_v60 = vld [vmem:[#allocation3 + $0x28] sm:$0x7]  ;;  %v3172_v22 = vld [vmem:[#allocation3 + $0x1c] sm:$0x7]  ;;  %v3813_v11 = vunpack.c.l.b16 %v3236_v44  ;;  %v2783_v46 = vsel %vm6570_vm7, 0, %v2782_v17  ;;  %v3812_v19 = vunpack.c.l.b16 %v3235_v38 }
 0x357   : > { %3862 = vrot.lane.b32.xlu1 %v3843_v32, %s5738_s23  ;;  %4050 = vrot.lane.b32.xlu0 %v3949_v48, %s5738_s23  ;;  %v3125_v15 = vsel %vm6688_vm3, %v3035_v35, %v3124_v60  ;;  %v3203_v59 = vld [vmem:[#allocation3 + $0x1c] sm:$0x3]  ;;  %v2858_v55 = vsel %vm6576_vm13, 0, %v2857_v33  ;;  %v3589_v62 = vpack.c.b16 %v3573_v18, %v3573_v18  ;;  %v3317_v56 = vunpack.c.l.b16 %v3172_v22  ;;  %2775 = vst [vmem:[#allocation3 + $0x34] sm:$0x1] %v2774_v3 }
 0x358   : > { %v2942_v37 = vsel %vm678_vm10, %v6770_v31, %v2896_v14  ;;  %3126 = vst [vmem:[#allocation3 + $0x28] sm:$0x7] %v3125_v15  ;;  %v3572_v43 = vunpack.c.l.b16 %v3203_v59  ;;  %v2779_v50 = vld [vmem:[#allocation3 + $0x3c] sm:$0x1]  ;;  %v3829_v49 = vpack.c.b16 %v3813_v11, %v3813_v11  ;;  %v3268_v10 = vld [vmem:[#allocation3 + $0x20] sm:$0x7]  ;;  %v3828_v21 = vpack.c.b16 %v3812_v19, %v3812_v19 }
 0x359   : > { %v2944_v28 = vrot.slane %v2942_v37, 2  ;;  %2850 = vst [vmem:[#allocation3 + $0x34] sm:$0x4] %v2849_v41  ;;  %v2977_v40 = vld.sshfl [vmem:[#allocation1 + $0x30] sm:$0xff pattern:$0x75643120]  ;;  %v3333_v29 = vpack.c.b16 %v3317_v56, %v3317_v56  ;;  %v2941_v53 = vsel %vm674_vm9, %v6770_v31, %v2896_v14  ;;  %v3908_v23 = vunpack.c.l.b16 %v3268_v10 }
 0x35a   : > { %3460 = vrot.lane.b32.xlu2 %v3364_v34, %s5738_s23  ;;  %v3130_v9 = vld [vmem:[#allocation3 + $0x38] sm:$0x7]  ;;  %2784 = vst [vmem:[#allocation3 + $0x40] sm:$0x1] %v2783_v46  ;;  %v3205_v39 = vld [vmem:[#allocation3 + $0x24] sm:$0x3]  ;;  %v3588_v32 = vpack.c.b16 %v3572_v43, %v3572_v43 }
 0x35b   : > { %2859 = vst [vmem:[#allocation3 + $0x40] sm:$0x4] %v2858_v55  ;;  %v3131_v51 = vsel %vm6688_vm3, %v3047_v8, %v3130_v9  ;;  %v3038_v61 = vrot.slane %v3036_v52, 7  ;;  %v3039_v36 = vshll.u32 %v6757_v57, 16  ;;  %v2780_v54 = vsel %vm6570_vm7, 0, %v2779_v50 }
 0x35c   : > { %2986 = vst [vmem:[#allocation1 + $0x30] ss:$2 sm:$0xff] %v2944_v28  ;;  %v3845_v0 = vrot.slane %v3829_v49, 1  ;;  %v3054_v48 = vshrl.u32 %v2977_v40, 16  ;;  %v3574_v45 = vunpack.c.l.b16 %v3205_v39  ;;  %v3844_v58 = vrot.slane %v3828_v21, 1 }
 0x35d   : > { %3132 = vst [vmem:[#allocation3 + $0x38] sm:$0x7] %v3131_v51  ;;  %v2974_v4 = vld.sshfl [vmem:[#allocation1 + $0x20] sm:$0xff pattern:$0x75643120]  ;;  %v3382_v1 = vshll.u32 %v3333_v29, 16  ;;  %v3041_v57 = vor.u32 %v3039_v36, %v3038_v61  ;;  %v3924_v31 = vpack.c.b16 %v3908_v23, %v3908_v23 }
 0x35e   : > { %2781 = vst [vmem:[#allocation3 + $0x3c] sm:$0x1] %v2780_v54  ;;  %v3237_v34 = vld [vmem:[#allocation3 + $0x24] sm:$0x6]  ;;  %v3056_v35 = vrot.slane %v3054_v48, 7  ;;  %v3590_v20 = vpack.c.b16 %v3574_v45, %v3574_v45  ;;  %v3057_v42 = vshll.u32 %v2977_v40, 16 }
 0x35f   : > { %4052 = vrot.lane.b32.xlu1 %v3956_v30, %s5738_s23  ;;  %3462 = vrot.lane.b32.xlu0 %v3371_v5, %s5738_s23  ;;  %v3206_v63 = vld [vmem:[#allocation3 + $0x28] sm:$0x3]  ;;  %2983 = vst [vmem:[#allocation1 + $0x20] ss:$2 sm:$0xff] %v2941_v53  ;;  %v3269_v14 = vld [vmem:[#allocation3 + $0x24] sm:$0x7]  ;;  %v3814_v47 = vunpack.c.l.b16 %v3237_v34 }
 0x360   : > { %v3575_v7 = vunpack.c.l.b16 %v3206_v63  ;;  %v3127_v12 = vld [vmem:[#allocation3 + $0x34] sm:$0x7]  ;;  %v2854_v27 = vld [vmem:[#allocation3 + $0x3c] sm:$0x4]  ;;  %v3173_v24 = vld [vmem:[#allocation3 + $0x20] sm:$0x7]  ;;  %v3909_v18 = vunpack.c.l.b16 %v3269_v14  ;;  %v3059_v13 = vor.u32 %v3057_v42, %v3056_v35 }
 0x361   : > { %v3384_v25 = vrot.slane %v3382_v1, 1  ;;  %v3238_v44 = vld [vmem:[#allocation3 + $0x28] sm:$0x6]  ;;  %v3128_v17 = vsel %vm6688_vm3, %v3041_v57, %v3127_v12  ;;  %v2855_v33 = vsel %vm6576_vm13, 0, %v2854_v27  ;;  %v3048_v37 = vshrl.u32 %v2974_v4, 16  ;;  %v6828_v27 = vpop.permute.xlu2 %4054 }
 0x362   : > { %3610 = vrot.lane.b32.xlu2 %v3589_v62, %s5738_s23  ;;  %v3270_v16 = vld [vmem:[#allocation3 + $0x28] sm:$0x7]  ;;  %v3591_v30 = vpack.c.b16 %v3575_v7, %v3575_v7  ;;  %3129 = vst [vmem:[#allocation3 + $0x34] sm:$0x7] %v3128_v17  ;;  %v3136_v60 = vld [vmem:[#allocation3 + $0x40] sm:$0x7]  ;;  %v3318_v22 = vunpack.c.l.b16 %v3173_v24  ;;  %v3815_v11 = vunpack.c.l.b16 %v3238_v44  ;;  %v3830_v52 = vpack.c.b16 %v3814_v47, %v3814_v47 }
 0x363   : > { %v3380_v38 = vshrl.u32 %v3333_v29, 16  ;;  %v3967_v15 = vshll.u32 %v3924_v31, 16  ;;  %2856 = vst [vmem:[#allocation3 + $0x3c] sm:$0x4] %v2855_v33  ;;  %v3050_v3 = vrot.slane %v3048_v37, 7  ;;  %v3910_v59 = vunpack.c.l.b16 %v3270_v16 }
 0x364   : > { %v3137_v41 = vsel %vm6688_vm3, %v3059_v13, %v3136_v60  ;;  %v2794_v8 = vld [vmem:[#allocation3 + $0x50] sm:$0x1]  ;;  %v3925_v46 = vpack.c.b16 %v3909_v18, %v3909_v18  ;;  %v3051_v55 = vshll.u32 %v2974_v4, 16  ;;  %v2869_v28 = vld [vmem:[#allocation3 + $0x50] sm:$0x4]  ;;  %v3334_v19 = vpack.c.b16 %v3318_v22, %v3318_v22 }
 0x365   : > { %v3385_v5 = vor.u32 %v3384_v25, %v3380_v38  ;;  %3138 = vst [vmem:[#allocation3 + $0x40] sm:$0x7] %v3137_v41  ;;  %v3969_v62 = vrot.slane %v3967_v15, 1  ;;  %v3174_v56 = vld [vmem:[#allocation3 + $0x24] sm:$0x7]  ;;  %v2795_v9 = vsel %vm6570_vm7, 0, %v2794_v8  ;;  %v3831_v49 = vpack.c.b16 %v3815_v11, %v3815_v11 }
 0x366   : > { %v3053_v43 = vor.u32 %v3051_v55, %v3050_v3  ;;  %v3965_v50 = vshrl.u32 %v3924_v31, 16  ;;  %v3926_v40 = vpack.c.b16 %v3910_v59, %v3910_v59  ;;  %v2870_v10 = vsel %vm6576_vm13, 0, %v2869_v28  ;;  %2796 = vst [vmem:[#allocation3 + $0x50] sm:$0x1] %v2795_v9  ;;  %v2866_v24 = vld [vmem:[#allocation3 + $0x4c] sm:$0x4] }
 0x367   : > { %3608 = vrot.lane.b32.xlu1 %v3588_v32, %s5738_s23  ;;  %3866 = vrot.lane.b32.xlu0 %v3845_v0, %s5738_s23  ;;  %v3846_v21 = vrot.slane %v3830_v52, 1  ;;  %v3974_v39 = vshll.u32 %v3925_v46, 16  ;;  %v3319_v29 = vunpack.c.l.b16 %v3174_v56  ;;  %v3389_v61 = vshll.u32 %v3334_v19, 16  ;;  %v2982_v36 = vld.sshfl [vmem:[#allocation1 + $0x10] sm:$0xff pattern:$0x75643120] }
 0x368   : > { %v3970_v51 = vor.u32 %v3969_v62, %v3965_v50  ;;  %2871 = vst [vmem:[#allocation3 + $0x50] sm:$0x4] %v2870_v10  ;;  %v3847_v53 = vrot.slane %v3831_v49, 1  ;;  %v3981_v0 = vshll.u32 %v3926_v40, 16  ;;  %v3066_v48 = vshrl.u32 %v2982_v36, 16 }
 0x369   : > { %v3976_v63 = vrot.slane %v3974_v39, 1  ;;  %v3335_v23 = vpack.c.b16 %v3319_v29, %v3319_v29  ;;  %v3391_v45 = vrot.slane %v3389_v61, 1  ;;  %v3972_v4 = vshrl.u32 %v3925_v46, 16  ;;  %v3208_v25 = vld [vmem:[#allocation3 + $0x38] sm:$0x3]  ;;  %v6841_v49 = vpop.permute.xlu2 %3472 }
 0x36a   : > { %3864 = vrot.lane.b32.xlu2 %v3844_v58, %s5738_s23  ;;  %v3133_v32 = vld [vmem:[#allocation3 + $0x3c] sm:$0x7]  ;;  %v2791_v58 = vld [vmem:[#allocation3 + $0x4c] sm:$0x1]  ;;  %v3387_v1 = vshrl.u32 %v3334_v19, 16  ;;  %v3983_v57 = vrot.slane %v3981_v0, 1  ;;  %v3577_v60 = vunpack.c.l.b16 %v3208_v25 }
 0x36b   : > { %v3134_v54 = vsel %vm6688_vm3, %v3053_v43, %v3133_v32  ;;  %v3977_v7 = vor.u32 %v3976_v63, %v3972_v4  ;;  %v3396_v34 = vshll.u32 %v3335_v23, 16  ;;  %v3068_v12 = vrot.slane %v3066_v48, 7  ;;  %v2979_v17 = vld.sshfl [vmem:[#allocation1] sm:$0xff pattern:$0x75643120] }
 0x36c   : > { %3135 = vst [vmem:[#allocation3 + $0x3c] sm:$0x7] %v3134_v54  ;;  %v3069_v31 = vshll.u32 %v2982_v36, 16  ;;  %v3392_v14 = vor.u32 %v3391_v45, %v3387_v1  ;;  %v3979_v35 = vshrl.u32 %v3926_v40, 16  ;;  %v2867_v18 = vsel %vm6576_vm13, 0, %v2866_v24 }
 0x36d   : > { %v3398_v42 = vrot.slane %v3396_v34, 1  ;;  %v3240_v33 = vld [vmem:[#allocation3 + $0x38] sm:$0x6]  ;;  %v3239_v37 = vld [vmem:[#allocation3 + $0x34] sm:$0x6]  ;;  %v3394_v15 = vshrl.u32 %v3335_v23, 16  ;;  %v3593_v55 = vpack.c.b16 %v3577_v60, %v3577_v60 }
 0x36e   : > { %v3071_v47 = vor.u32 %v3069_v31, %v3068_v12  ;;  %v3984_v16 = vor.u32 %v3983_v57, %v3979_v35  ;;  %v3176_v22 = vld [vmem:[#allocation3 + $0x34] sm:$0x7]  ;;  %v3060_v13 = vshrl.u32 %v2979_v17, 16  ;;  %2868 = vst [vmem:[#allocation3 + $0x4c] sm:$0x4] %v2867_v18  ;;  %v3817_v8 = vunpack.c.l.b16 %v3240_v33 }
 0x36f   : > { %3614 = vrot.lane.b32.xlu1 %v3591_v30, %s5738_s23  ;;  %3612 = vrot.lane.b32.xlu0 %v3590_v20, %s5738_s23  ;;  %v2792_v20 = vsel %vm6570_vm7, 0, %v2791_v58  ;;  %v3142_v44 = vld [vmem:[#allocation3 + $0x50] sm:$0x7]  ;;  %v3207_v30 = vld [vmem:[#allocation3 + $0x34] sm:$0x3]  ;;  %v3399_v41 = vor.u32 %v3398_v42, %v3394_v15  ;;  %v3816_v52 = vunpack.c.l.b16 %v3239_v37  ;;  %v3321_v28 = vunpack.c.l.b16 %v3176_v22 }
 0x370   : > { %2793 = vst [vmem:[#allocation3 + $0x4c] sm:$0x1] %v2792_v20  ;;  %v3143_v38 = vsel %vm6688_vm3, %v3071_v47, %v3142_v44  ;;  %v3283_v3 = vld [vmem:[#allocation3 + $0x14] sm:$0x6]  ;;  %v3576_v11 = vunpack.c.l.b16 %v3207_v30  ;;  %v3281_v59 = vld [vmem:[#allocation3 + $0xc] sm:$0x6]  ;;  %v3833_v39 = vpack.c.b16 %v3817_v8, %v3817_v8 }
 0x371   : > { %3144 = vst [vmem:[#allocation3 + $0x50] sm:$0x7] %v3143_v38  ;;  %v3282_v46 = vld [vmem:[#allocation3 + $0x10] sm:$0x6]  ;;  %v3062_v62 = vrot.slane %v3060_v13, 7  ;;  %v3063_v19 = vshll.u32 %v2979_v17, 16  ;;  %v4099_v56 = vunpack.c.l.b16 %v3283_v3  ;;  %v4097_v9 = vunpack.c.l.b16 %v3281_v59 }
 0x372   : > { %3466 = vrot.lane.b32.xlu2 %v3385_v5, %s5738_s23  ;;  %v3280_v5 = vld [vmem:[#allocation3 + $0x8] sm:$0x6]  ;;  %v3592_v50 = vpack.c.b16 %v3576_v11, %v3576_v11  ;;  %v2797_v10 = vld [vmem:[#allocation3 + $0x54] sm:$0x1]  ;;  %v3832_v29 = vpack.c.b16 %v3816_v52, %v3816_v52  ;;  %v2800_v61 = vld [vmem:[#allocation3 + $0x58] sm:$0x1]  ;;  %v6844_v36 = vpack.c.b16 %v3321_v28, %v3321_v28 }
 0x373   : > { %v4096_v43 = vunpack.c.l.b16 %v3280_v5  ;;  %v3065_v40 = vor.u32 %v3063_v19, %v3062_v62  ;;  %v2875_v32 = vld [vmem:[#allocation3 + $0x58] sm:$0x4]  ;;  %v2798_v63 = vsel %vm6570_vm7, 0, %v2797_v10  ;;  %v6852_v23 = vpack.c.b16 %v4099_v56, %v4099_v56  ;;  %v3241_v45 = vld [vmem:[#allocation3 + $0x3c] sm:$0x6]  ;;  %v6863_v5 = vpop.permute.xlu2 %4078 }
 0x374   : > { %v3272_v54 = vld [vmem:[#allocation3 + $0x38] sm:$0x7]  ;;  %v2876_v0 = vsel %vm6576_vm13, 0, %v2875_v32  ;;  %v2872_v58 = vld [vmem:[#allocation3 + $0x54] sm:$0x4]  ;;  %v4113_v1 = vpack.c.b16 %v4097_v9, %v4097_v9  ;;  %v3849_v31 = vrot.slane %v3833_v39, 1  ;;  %v3818_v18 = vunpack.c.l.b16 %v3241_v45 }
 0x375   : > { %v4112_v48 = vpack.c.b16 %v4096_v43, %v4096_v43  ;;  %2877 = vst [vmem:[#allocation3 + $0x58] sm:$0x4] %v2876_v0  ;;  %v2987_v34 = vld.sshfl [vmem:[#allocation1 + $0x30] sm:$0xff pattern:$0x75643120]  ;;  %v2873_v12 = vsel %vm6576_vm13, 0, %v2872_v58  ;;  %v3912_v26 = vunpack.c.l.b16 %v3272_v54 }
 0x376   : > { %v3078_v35 = vshrl.u32 %v2987_v34, 16  ;;  %v3848_v24 = vrot.slane %v3832_v29, 1  ;;  %v3209_v25 = vld [vmem:[#allocation3 + $0x3c] sm:$0x3]  ;;  %v3410_v47 = vshll.u32 %v6844_v36, 16  ;;  %v4131_v44 = vrot.slane %v6852_v23, 1 }
 0x377   : > { %3868 = vrot.lane.b32.xlu1 %v3846_v21, %s5738_s23  ;;  %4056 = vrot.lane.b32.xlu0 %v3970_v51, %s5738_s23  ;;  %v4098_v21 = vunpack.c.l.b16 %v3282_v46  ;;  %v3210_v51 = vld [vmem:[#allocation3 + $0x40] sm:$0x3]  ;;  %v3139_v4 = vld [vmem:[#allocation3 + $0x4c] sm:$0x7]  ;;  %2799 = vst [vmem:[#allocation3 + $0x54] sm:$0x1] %v2798_v63  ;;  %v3578_v37 = vunpack.c.l.b16 %v3209_v25  ;;  %v3928_v38 = vpack.c.b16 %v3912_v26, %v3912_v26  ;;  %v3834_v62 = vpack.c.b16 %v3818_v18, %v3818_v18 }
 0x378   : > { %v3579_v57 = vunpack.c.l.b16 %v3210_v51  ;;  %v3080_v17 = vrot.slane %v3078_v35, 7  ;;  %v3081_v42 = vshll.u32 %v2987_v34, 16  ;;  %2874 = vst [vmem:[#allocation3 + $0x54] sm:$0x4] %v2873_v12  ;;  %v4129_v6 = vrot.slane %v4113_v1, 1  ;;  %v5600_v25 = vld [vmem:[%s7387_s5 + $0x78] sm:$0xff] }
 0x379   : > { %v4114_v20 = vpack.c.b16 %v4098_v21, %v4098_v21  ;;  %v2984_v33 = vld.sshfl [vmem:[#allocation1 + $0x20] sm:$0xff pattern:$0x75643120]  ;;  %v3177_v15 = vld [vmem:[#allocation3 + $0x38] sm:$0x7]  ;;  %v3412_v11 = vrot.slane %v3410_v47, 1  ;;  %v3594_v43 = vpack.c.b16 %v3578_v37, %v3578_v37  ;;  %4949 = vmatpush.bf16.msrb.mxu3 %v5600_v25 }
 0x37a   : > { %3870 = vrot.lane.b32.xlu2 %v3847_v53, %s5738_s23  ;;  %v2801_v53 = vsel %vm6570_vm7, 0, %v2800_v61  ;;  %v3595_v30 = vpack.c.b16 %v3579_v57, %v3579_v57  ;;  %v3083_v22 = vor.u32 %v3081_v42, %v3080_v17  ;;  %v3072_v13 = vshrl.u32 %v2984_v33, 16  ;;  %v3242_v59 = vld [vmem:[#allocation3 + $0x40] sm:$0x6]  ;;  %4617 = vst [vmem:[#allocation1 + $0x21] ss:$4 sm:$0xff] %v4129_v6 }
 0x37b   : > { %2802 = vst [vmem:[#allocation3 + $0x58] sm:$0x1] %v2801_v53  ;;  %v4130_v3 = vrot.slane %v4114_v20, 1  ;;  %v3075_v46 = vshll.u32 %v2984_v33, 16  ;;  %v3408_v28 = vshrl.u32 %v6844_v36, 16  ;;  %v3995_v9 = vshll.u32 %v3928_v38, 16 }
 0x37c   : > { %v3074_v52 = vrot.slane %v3072_v13, 7  ;;  %v3819_v39 = vunpack.c.l.b16 %v3242_v59  ;;  %4623 = vst [vmem:[#allocation1 + $0x23] ss:$4 sm:$0xff] %v4131_v44  ;;  %v3850_v32 = vrot.slane %v3834_v62, 1  ;;  %v3287_v26 = vld [vmem:[#allocation3 + $0x2c] sm:$0x6] }
 0x37d   : > { %4620 = vst [vmem:[#allocation1 + $0x22] ss:$4 sm:$0xff] %v4130_v3  ;;  %v3413_v21 = vor.u32 %v3412_v11, %v3408_v28  ;;  %v3997_v53 = vrot.slane %v3995_v9, 1  ;;  %v5608_v47 = vld [vmem:[%s7387_s5 + $0xb8] sm:$0xff]  ;;  %v3295_v44 = vld [vmem:[#allocation3 + $0x5c] sm:$0x6]  ;;  %v4103_v6 = vunpack.c.l.b16 %v3287_v26 }
 0x37e   : > { %v3077_v10 = vor.u32 %v3075_v46, %v3074_v52  ;;  %v3835_v63 = vpack.c.b16 %v3819_v39, %v3819_v39  ;;  %v3284_v17 = vld [vmem:[#allocation3 + $0x20] sm:$0x6]  ;;  %v3285_v18 = vld [vmem:[#allocation3 + $0x24] sm:$0x6]  ;;  %4978 = vmatpush.bf16.msrb.mxu1 %v5608_v47  ;;  %v4111_v37 = vunpack.c.l.b16 %v3295_v44  ;;  %v3216_v11 = vld [vmem:[#allocation3 + $0x8] sm:$0x7] }
 0x37f   : > { %4058 = vrot.lane.b32.xlu1 %v3977_v7, %s5738_s23  ;;  %3468 = vrot.lane.b32.xlu0 %v3392_v14, %s5738_s23  ;;  %v3140_v7 = vsel %vm6688_vm3, %v3065_v40, %v3139_v4  ;;  %v3273_v14 = vld [vmem:[#allocation3 + $0x3c] sm:$0x7]  ;;  %v3145_v51 = vld [vmem:[#allocation3 + $0x54] sm:$0x7]  ;;  %v3215_v13 = vld [vmem:[#allocation3 + $0x4] sm:$0x7]  ;;  %v4100_v3 = vunpack.c.l.b16 %v3284_v17  ;;  %v4101_v52 = vunpack.c.l.b16 %v3285_v18  ;;  %v6904_v9 = vpack.c.b16 %v4103_v6, %v4103_v6 }
 0x380   : > { %3141 = vst [vmem:[#allocation3 + $0x4c] sm:$0x7] %v3140_v7  ;;  %v3913_v60 = vunpack.c.l.b16 %v3273_v14  ;;  %v3178_v40 = vld [vmem:[#allocation3 + $0x3c] sm:$0x7]  ;;  %v3146_v61 = vsel %vm6688_vm3, %v3077_v10, %v3145_v51  ;;  %v3851_v34 = vrot.slane %v3835_v63, 1  ;;  %v3648_v39 = vunpack.c.l.b16 %v3215_v13  ;;  %v5598_v63 = vld [vmem:[%s7387_s5 + $0x68] sm:$0xff] }
 0x381   : > { %v3323_v54 = vunpack.c.l.b16 %v3178_v40  ;;  %3147 = vst [vmem:[#allocation3 + $0x54] sm:$0x7] %v3146_v61  ;;  %v3291_v14 = vld [vmem:[#allocation3 + $0x44] sm:$0x6]  ;;  %v6909_v40 = vpop.permute.xlu1 %4070  ;;  %v3183_v10 = vld [vmem:[#allocation3] sm:$0x6]  ;;  %v3649_v51 = vunpack.c.l.b16 %v3216_v11 }
 0x382   : > { %4060 = vrot.lane.b32.xlu2 %v3984_v16, %s5738_s23  ;;  %v4128_v16 = vrot.slane %v4112_v48, 1  ;;  %v3148_v8 = vld [vmem:[#allocation3 + $0x58] sm:$0x7]  ;;  %v3929_v19 = vpack.c.b16 %v3913_v60, %v3913_v60  ;;  %v3993_v48 = vshrl.u32 %v3928_v38, 16  ;;  %v3286_v60 = vld [vmem:[#allocation3 + $0x28] sm:$0x6] }
 0x383   : > { %v3149_v56 = vsel %vm6688_vm3, %v3083_v22, %v3148_v8  ;;  %v3339_v58 = vpack.c.b16 %v3323_v54, %v3323_v54  ;;  %v3244_v8 = vld [vmem:[#allocation3 + $0x50] sm:$0x6]  ;;  %v4102_v46 = vunpack.c.l.b16 %v3286_v60  ;;  %vm4144_vm10 = vcmask 523264   ;;  %v3290_v47 = vld [vmem:[#allocation3 + $0x40] sm:$0x6] }
 0x384   : > { %4614 = vst [vmem:[#allocation1 + $0x20] ss:$4 sm:$0xff] %v4128_v16  ;;  %v4002_v36 = vshll.u32 %v3929_v19, 16  ;;  %v3998_v1 = vor.u32 %v3997_v53, %v3993_v48  ;;  %v4000_v12 = vshrl.u32 %v3929_v19, 16  ;;  %v5591_v19 = vld [vmem:[%s7387_s5 + $0x30] sm:$0xff]  ;;  %v5590_v54 = vld [vmem:[%s7387_s5 + $0x28] sm:$0xff]  ;;  %v4116_v53 = vpack.c.b16 %v4100_v3, %v4100_v3 }
 0x385   : > { %3150 = vst [vmem:[#allocation3 + $0x58] sm:$0x7] %v3149_v56  ;;  %v3424_v20 = vshll.u32 %v3339_v58, 16  ;;  %v3422_v62 = vshrl.u32 %v3339_v58, 16  ;;  %v5599_v56 = vld [vmem:[%s7387_s5 + $0x70] sm:$0xff]  ;;  %v4117_v48 = vpack.c.b16 %v4101_v52, %v4101_v52  ;;  %v3504_v58 = vunpack.c.l.b16 %v3183_v10  ;;  %v5605_v52 = vld [vmem:[%s7387_s5 + $0xa0] sm:$0xff] }
 0x386   : > { %v4004_v4 = vrot.slane %v4002_v36, 1  ;;  %v3821_v36 = vunpack.c.l.b16 %v3244_v8  ;;  %4950 = vmatpush.bf16.msrb.mxu3 %v5599_v56  ;;  %v4132_v25 = vrot.slane %v4116_v53, 1  ;;  %v3276_v17 = vld [vmem:[#allocation3 + $0x50] sm:$0x7]  ;;  %v4106_v13 = vunpack.c.l.b16 %v3290_v47  ;;  %v5597_v8 = vld [vmem:[%s7387_s5 + $0x60] sm:$0xff] }
 0x387   : > { %3470 = vrot.lane.b32.xlu1 %v3399_v41, %s5738_s23  ;;  %3618 = vrot.lane.b32.xlu0 %v3593_v55, %s5738_s23  ;;  %v3274_v41 = vld [vmem:[#allocation3 + $0x40] sm:$0x7]  ;;  %v6865_v55 = vpop.permute.xlu0 %3456  ;;  %v3426_v22 = vrot.slane %v3424_v20, 1 }
 0x388   : > { %v3914_v29 = vunpack.c.l.b16 %v3274_v41  ;;  %v4005_v35 = vor.u32 %v4004_v4, %v4000_v12  ;;  %v3212_v41 = vld [vmem:[#allocation3 + $0x50] sm:$0x3]  ;;  %v6925_v4 = vpack.c.b16 %v4102_v46, %v4102_v46  ;;  %v6929_v12 = vpack.c.b16 %v3648_v39, %v3648_v39  ;;  %v3277_v53 = vld [vmem:[#allocation3 + $0x54] sm:$0x7] }
 0x38a   : > { %3616 = vrot.lane.b32.xlu2 %v3592_v50, %s5738_s23  ;;  %v3322_v50 = vunpack.c.l.b16 %v3177_v15  ;;  %v3930_v23 = vpack.c.b16 %v3914_v29, %v3914_v29  ;;  %v6911_v29 = vpack.c.b16 %v4111_v37, %v4111_v37  ;;  %4951 = vmatpush.bf16.msrb.mxu3 %v5598_v63  ;;  %v4134_v6 = vrot.slane %v6925_v4, 1 }
 0x38b   : > { %v6966_v63 = vpack.c.b16 %v4106_v13, %v4106_v13 }
 0x38c   : > { %v3338_v0 = vpack.c.b16 %v3322_v50, %v3322_v50  ;;  %v4007_v15 = vshrl.u32 %v3930_v23, 16  ;;  %v4143_v26 = vrot.slane %v6911_v29, 1  ;;  %v3214_v37 = vld [vmem:[#allocation3 + $0x58] sm:$0x3]  ;;  %v3153_v29 = vld [vmem:[#allocation3 + $0x8] sm:$0x3] }
 0x38d   : > { %v3278_v56 = vld [vmem:[#allocation3 + $0x58] sm:$0x7]  ;;  %v3583_v39 = vunpack.c.l.b16 %v3214_v37 }
 0x38e   : > { %v3417_v57 = vshll.u32 %v3338_v0, 16  ;;  %v3415_v33 = vshrl.u32 %v3338_v0, 16  ;;  %v3581_v0 = vunpack.c.l.b16 %v3212_v41  ;;  %v5589_v41 = vld [vmem:[%s7387_s5 + $0x20] sm:$0xff]  ;;  %4952 = vmatpush.bf16.msrb.mxu3 %v5597_v8  ;;  %v3918_v47 = vunpack.c.l.b16 %v3278_v56  ;;  %v7004_v56 = vld [vmem:[#allocation3 + $0x4] sm:$0x6] }
 0x38f   : > { %3874 = vrot.lane.b32.xlu1 %v3849_v31, %s5738_s23  ;;  %3872 = vrot.lane.b32.xlu0 %v3848_v24, %s5738_s23  ;;  %v6879_v7 = vpop.permute.xlu0 %4062  ;;  %v4009_v31 = vshll.u32 %v3930_v23, 16  ;;  %v5592_v24 = vld [vmem:[%s7387_s5 + $0x38] sm:$0xff]  ;;  %v5606_v23 = vld [vmem:[%s7387_s5 + $0xa8] sm:$0xff] }
 0x390   : > { %v3419_v16 = vrot.slane %v3417_v57, 1  ;;  %4920 = vmatpush.bf16.msrb.mxu2 %v5592_v24  ;;  %v3243_v57 = vld [vmem:[#allocation3 + $0x4c] sm:$0x6]  ;;  %v3837_v24 = vpack.c.b16 %v3821_v36, %v3821_v36  ;;  %v3597_v44 = vpack.c.b16 %v3581_v0, %v3581_v0  ;;  %v5596_v0 = vld [vmem:[%s7387_s5 + $0x58] sm:$0xff] }
 0x391   : > { %v4011_v42 = vrot.slane %v4009_v31, 1 }
 0x392   : > { %3622 = vrot.lane.b32.xlu2 %v3595_v30, %s5738_s23  ;;  %v4107_v30 = vunpack.c.l.b16 %v3291_v14  ;;  %v3420_v59 = vor.u32 %v3419_v16, %v3415_v33  ;;  %v3288_v14 = vld [vmem:[#allocation3 + $0x38] sm:$0x6]  ;;  %v3820_v16 = vunpack.c.l.b16 %v3243_v57  ;;  %v6938_v33 = vld [vmem:[#allocation3 + $0x3c] sm:$0x6]  ;;  %v3853_v11 = vrot.slane %v3837_v24, 1  ;;  %v5604_v57 = vld [vmem:[%s7387_s5 + $0x98] sm:$0xff]  ;;  %4953 = vmatpush.bf16.msrb.mxu3 %v5596_v0 }
 0x393   : > { %v4012_v28 = vor.u32 %v4011_v42, %v4007_v15  ;;  %v4133_v42 = vrot.slane %v4117_v48, 1  ;;  %v4104_v60 = vunpack.c.l.b16 %v3288_v14  ;;  %v3683_v15 = vshll.u32 %v6929_v12, 16 }
 0x394   : > { %v6906_v50 = vpack.c.b16 %v4107_v30, %v4107_v30  ;;  %4921 = vmatpush.bf16.msrb.mxu2 %v5591_v19  ;;  %v3520_v30 = vpack.c.b16 %v3504_v58, %v3504_v58  ;;  %v3246_v19 = vld [vmem:[#allocation3 + $0x58] sm:$0x6]  ;;  %v3681_v24 = vshrl.u32 %v6929_v12, 16 }
 0x395   : > { %v6961_v36 = vpack.c.b16 %v4104_v60, %v4104_v60  ;;  %v3248_v60 = vld [vmem:[#allocation3 + $0x8] sm:$0x3] }
 0x396   : > { %v4139_v31 = vrot.slane %v6906_v50, 1  ;;  %v3536_v10 = vrot.slane %v3520_v30, 1  ;;  %v3917_v30 = vunpack.c.l.b16 %v3277_v53 }
 0x397   : > { %3620 = vrot.lane.b32.xlu1 %v3594_v43, %s5738_s23  ;;  %3474 = vrot.lane.b32.xlu0 %v3413_v21, %s5738_s23  ;;  %v5607_v43 = vld [vmem:[%s7387_s5 + $0xb0] sm:$0xff]  ;;  %v3211_v21 = vld [vmem:[#allocation3 + $0x4c] sm:$0x3]  ;;  %v6913_v61 = vpop.permute.xlu0 %3480 }
 0x398   : > { %4979 = vmatpush.bf16.msrb.mxu1 %v5607_v43  ;;  %4922 = vmatpush.bf16.msrb.mxu2 %v5590_v54  ;;  %v3151_v43 = vld [vmem:[#allocation3] sm:$0x3]  ;;  %v3685_v54 = vrot.slane %v3683_v15, 1 }
 0x39a   : > { %3876 = vrot.lane.b32.xlu2 %v3850_v32, %s5738_s23  ;;  %v3427_v32 = vor.u32 %v3426_v22, %v3422_v62  ;;  %v6942_v22 = vld.sshfl [vmem:[#allocation1 + $0x20] sm:$0xff pattern:$0x73625140]  ;;  %v3213_v62 = vld [vmem:[#allocation3 + $0x54] sm:$0x3]  ;;  %v3686_v12 = vor.u32 %v3685_v54, %v3681_v24 }
 0x39b   : > { %4634 = vst [vmem:[#allocation1 + $0x20] ss:$4 sm:$0xff] %v4132_v25  ;;  %v3582_v4 = vunpack.c.l.b16 %v3213_v62  ;;  %v3823_v25 = vunpack.c.l.b16 %v3246_v19  ;;  %v3180_v62 = vld [vmem:[#allocation3 + $0x4c] sm:$0x7]  ;;  %v4138_v19 = vrot.slane %v6966_v63, 1 }
 0x39c   : > { %v6875_v45 = vpop.permute.xlu2 %3858  ;;  %4980 = vmatpush.bf16.msrb.mxu1 %v5606_v23  ;;  %4923 = vmatpush.bf16.msrb.mxu2 %v5589_v41  ;;  %4636 = vst [vmem:[#allocation1 + $0x21] ss:$4 sm:$0xff] %v4133_v42  ;;  %v4105_v23 = vunpack.c.l.b16 %v6938_v33  ;;  %v6984_v33 = vld [vmem:[#allocation3 + $0xc] sm:$0x7] }
 0x39d   : > { %4638 = vst [vmem:[#allocation1 + $0x22] ss:$4 sm:$0xff] %v4134_v6  ;;  %v4147_v6 = vsel %vm4144_vm10, %v3151_v43, %v6865_v55  ;;  %v5587_v55 = vld [vmem:[%s7387_s5 + $0x10] sm:$0xff]  ;;  %v3650_v0 = vunpack.c.l.b16 %v6984_v33 }
 0x39f   : > { %4064 = vrot.lane.b32.xlu1 %v3998_v1, %s5738_s23  ;;  %3878 = vrot.lane.b32.xlu0 %v3851_v34, %s5738_s23  ;;  %v3580_v1 = vunpack.c.l.b16 %v3211_v21  ;;  %v4135_v34 = vrot.slane %v6904_v9, 1 }
 0x3a0   : > { %4981 = vmatpush.bf16.msrb.mxu1 %v5605_v52  ;;  %v3839_v52 = vpack.c.b16 %v3823_v25, %v3823_v25 }
 0x3a1   : > { %v3596_v18 = vpack.c.b16 %v3580_v1, %v3580_v1  ;;  %v3218_v1 = vld [vmem:[#allocation3 + $0x10] sm:$0x7]  ;;  %4640 = vst [vmem:[#allocation1 + $0x23] ss:$4 sm:$0xff] %v4135_v34  ;;  %v3598_v34 = vpack.c.b16 %v3582_v4, %v3582_v4  ;;  %v3182_v4 = vld [vmem:[#allocation3 + $0x54] sm:$0x7] }
 0x3a2   : > { %4066 = vrot.lane.b32.xlu2 %v4005_v35, %s5738_s23  ;;  %v6933_v35 = vpack.c.b16 %v3649_v51, %v3649_v51  ;;  %v3245_v51 = vld [vmem:[#allocation3 + $0x54] sm:$0x6]  ;;  %v3651_v37 = vunpack.c.l.b16 %v3218_v1 }
 0x3a3   : > { %v3822_v42 = vunpack.c.l.b16 %v3245_v51  ;;  %v5586_v51 = vld [vmem:[%s7387_s5 + $0x8] sm:$0xff] }
 0x3a4   : > { %v6893_v38 = vpop.permute.xlu2 %3604  ;;  %v3690_v3 = vshll.u32 %v6933_v35, 16  ;;  %4982 = vmatpush.bf16.msrb.mxu1 %v5604_v57  ;;  %v5594_v1 = vld [vmem:[%s7387_s5 + $0x48] sm:$0xff] }
 0x3a5   : > { %v3292_v57 = vld [vmem:[#allocation3 + $0x50] sm:$0x6] }
 0x3a7   : > { %3476 = vrot.lane.b32.xlu1 %v3420_v59, %s5738_s23  ;;  %4068 = vrot.lane.b32.xlu0 %v4012_v28, %s5738_s23  ;;  %v3916_v59 = vunpack.c.l.b16 %v3276_v17  ;;  %v3836_v28 = vpack.c.b16 %v3820_v16, %v3820_v16  ;;  %v3599_v17 = vpack.c.b16 %v3583_v39, %v3583_v39  ;;  %v7010_v39 = vpack.c.b16 %v3917_v30, %v3917_v30 }
 0x3a8   : > { %v3855_v30 = vrot.slane %v3839_v52, 1  ;;  %v5601_v52 = vld [vmem:[%s7387_s5 + $0x80] sm:$0xff] }
 0x3a9   : > { %v6971_v58 = vpack.c.b16 %v3916_v59, %v3916_v59  ;;  %v3852_v14 = vrot.slane %v3836_v28, 1  ;;  %v5603_v59 = vld [vmem:[%s7387_s5 + $0x90] sm:$0xff]  ;;  %v7001_v28 = vpack.c.b16 %v3918_v47, %v3918_v47 }
 0x3aa   : > { %3478 = vrot.lane.b32.xlu2 %v3427_v32, %s5738_s23  ;;  %v5588_v32 = vld [vmem:[%s7387_s5 + $0x18] sm:$0xff]  ;;  %4983 = vmatpush.bf16.msrb.mxu1 %v5603_v59  ;;  %v4108_v59 = vunpack.c.l.b16 %v3292_v57 }
 0x3ab   : > { %4924 = vmatpush.bf16.msrb.mxu2 %v5588_v32  ;;  %v4023_v15 = vshll.u32 %v6971_v58, 16  ;;  %v7015_v32 = vld [vmem:[#allocation3 + $0x8] sm:$0x6]  ;;  %v4021_v24 = vshrl.u32 %v6971_v58, 16 }
 0x3ac   : > { %v6935_v20 = vpop.permute.xlu2 %4048 }
 0x3ad   : > { %v4291_v9 = vsel %vm4144_vm10, %v3248_v60, %v6935_v20  ;;  %v6999_v20 = vpack.c.b16 %v4105_v23, %v4105_v23  ;;  %v7018_v23 = vpack.c.b16 %v3651_v37, %v3651_v37  ;;  %v4025_v25 = vrot.slane %v4023_v15, 1 }
 0x3ae   : > { %v3601_v21 = vpop.permute.xlu0 %3600  ;;  %v4387_v54 = vrot.slane %v4291_v9, 2  ;;  %v4037_v60 = vshll.u32 %v7001_v28, 16  ;;  %v4030_v37 = vshll.u32 %v7010_v39, 16  ;;  %v3327_v9 = vunpack.c.l.b16 %v3182_v4 }
 0x3af   : > { %3626 = vrot.lane.b32.xlu1 %v3597_v44, %s5738_s23  ;;  %3624 = vrot.lane.b32.xlu0 %v3596_v18, %s5738_s23  ;;  %v3181_v44 = vld [vmem:[#allocation3 + $0x50] sm:$0x7]  ;;  %v4195_v16 = vsel %vm4144_vm10, %v3536_v10, %v3601_v21  ;;  %v4136_v18 = vrot.slane %v6961_v36, 1  ;;  %v3838_v21 = vpack.c.b16 %v3822_v42, %v3822_v42  ;;  %v3505_v15 = vunpack.c.l.b16 %v7004_v56 }
 0x3b0   : > { %v3326_v13 = vunpack.c.l.b16 %v3181_v44  ;;  %v4385_v41 = vrot.slane %v4195_v16, 6  ;;  %4925 = vmatpush.bf16.msrb.mxu2 %v5587_v55  ;;  %v3325_v44 = vunpack.c.l.b16 %v3180_v62  ;;  %v5602_v16 = vld [vmem:[%s7387_s5 + $0x88] sm:$0xff]  ;;  %v5593_v55 = vld [vmem:[%s7387_s5 + $0x40] sm:$0xff]  ;;  %v7055_v56 = vpack.c.b16 %v3650_v0, %v3650_v0 }
 0x3b1   : > { %v6955_v46 = vpop.permute.xlu1 %3602  ;;  %v3854_v33 = vrot.slane %v3838_v21, 1  ;;  %4984 = vmatpush.bf16.msrb.mxu1 %v5602_v16  ;;  %v3186_v62 = vld [vmem:[#allocation3 + $0xc] sm:$0x6]  ;;  %v4039_v21 = vrot.slane %v4037_v60, 1  ;;  %v7064_v36 = vpack.c.b16 %v3327_v9, %v3327_v9  ;;  %v3521_v0 = vpack.c.b16 %v3505_v15, %v3505_v15 }
 0x3b2   : > { %3882 = vrot.lane.b32.xlu2 %v3853_v11, %s5738_s23  ;;  %v5595_v11 = vld [vmem:[%s7387_s5 + $0x50] sm:$0xff]  ;;  %v7026_v47 = vpack.c.b16 %v3326_v13, %v3326_v13  ;;  %v3293_v13 = vld [vmem:[#allocation3 + $0x54] sm:$0x6]  ;;  %v3697_v63 = vshll.u32 %v7055_v56, 16  ;;  %v3695_v9 = vshrl.u32 %v7055_v56, 16 }
 0x3b3   : > { %4954 = vmatpush.bf16.msrb.mxu3 %v5595_v11  ;;  %v3506_v11 = vunpack.c.l.b16 %v7015_v32  ;;  %v7058_v32 = vpack.c.b16 %v3325_v44, %v3325_v44  ;;  %v3507_v44 = vunpack.c.l.b16 %v3186_v62  ;;  %v3452_v50 = vshll.u32 %v7064_v36, 16 }
 0x3b4   : > { %v6969_v48 = vpop.permute.xlu2 %3460  ;;  %4926 = vmatpush.bf16.msrb.mxu2 %v5586_v51  ;;  %v3704_v51 = vshll.u32 %v7018_v23, 16  ;;  %v3443_v60 = vshrl.u32 %v7026_v47, 16 }
 0x3b5   : > { %4985 = vmatpush.bf16.msrb.mxu1 %v5601_v52  ;;  %v3454_v56 = vrot.slane %v3452_v50, 1 }
 0x3b7   : > { %3880 = vrot.lane.b32.xlu1 %v3852_v14, %s5738_s23  ;;  %3630 = vrot.lane.b32.xlu0 %v3599_v17, %s5738_s23  ;;  %v4434_v17 = vsel %vm674_vm9, %v4147_v6, %v4385_v41  ;;  %v4137_v6 = vrot.slane %v6999_v20, 1  ;;  %v3294_v41 = vld [vmem:[#allocation3 + $0x58] sm:$0x6]  ;;  %v3445_v20 = vshll.u32 %v7026_v47, 16 }
 0x3b8   : > { %4955 = vmatpush.bf16.msrb.mxu3 %v5594_v1  ;;  %v4032_v1 = vrot.slane %v4030_v37, 1  ;;  %v4110_v57 = vunpack.c.l.b16 %v3294_v41 }
 0x3b9   : > { %v3857_v8 = vpop.permute.xlu1 %3856  ;;  %v7007_v10 = vpop.permute.xlu0 %3606 }
 0x3ba   : > { %v4243_v43 = vsel %vm4144_vm10, %v3686_v12, %v3857_v8  ;;  %3628 = vrot.lane.b32.xlu2 %v3598_v34, %s5738_s23  ;;  %v7034_v12 = vld.sshfl [vmem:[#allocation1 + $0x20] sm:$0xff pattern:$0x73625140]  ;;  %v4026_v8 = vor.u32 %v4025_v25, %v4021_v24  ;;  %v4035_v24 = vshrl.u32 %v7001_v28, 16  ;;  %v4124_v25 = vpack.c.b16 %v4108_v59, %v4108_v59 }
 0x3bb   : > { %v4386_v53 = vrot.slane %v4243_v43, 4  ;;  %v5585_v34 = vld [vmem:[%s7387_s5] sm:$0xff]  ;;  %4651 = vst [vmem:[#allocation1 + $0x20] ss:$4 sm:$0xff] %v4136_v18  ;;  %v3692_v18 = vrot.slane %v3690_v3, 1  ;;  %v3706_v3 = vrot.slane %v3704_v51, 1  ;;  %v4126_v37 = vpack.c.b16 %v4110_v57, %v4110_v57 }
 0x3bc   : > { %v7023_v14 = vpop.permute.xlu2 %3610  ;;  %4653 = vst [vmem:[#allocation1 + $0x21] ss:$4 sm:$0xff] %v4137_v6  ;;  %4927 = vmatpush.bf16.msrb.mxu2 %v5585_v34  ;;  %4956 = vmatpush.bf16.msrb.mxu3 %v5593_v55  ;;  %v3702_v34 = vshrl.u32 %v7018_v23, 16  ;;  %v4140_v47 = vrot.slane %v4124_v25, 1  ;;  %v3152_v55 = vld [vmem:[#allocation3 + $0x4] sm:$0x3] }
 0x3bd   : > { %v4437_v42 = vsel %vm2164_vm2, %v4386_v53, %v4387_v54  ;;  %v3688_v54 = vshrl.u32 %v6933_v35, 16  ;;  %v4109_v53 = vunpack.c.l.b16 %v3293_v13  ;;  %4655 = vst [vmem:[#allocation1 + $0x22] ss:$4 sm:$0xff] %v4138_v19  ;;  %v4040_v35 = vor.u32 %v4039_v21, %v4035_v24  ;;  %v3251_v21 = vld [vmem:[#allocation3 + $0x14] sm:$0x3] }
 0x3be   : > { %v4438_v58 = vsel %vm2168_vm4, %v4434_v17, %v4437_v42  ;;  %4657 = vst [vmem:[#allocation1 + $0x23] ss:$4 sm:$0xff] %v4139_v31  ;;  %v4028_v17 = vshrl.u32 %v7010_v39, 16  ;;  %v3447_v42 = vrot.slane %v3445_v20, 1  ;;  %v3438_v19 = vshll.u32 %v7058_v32, 16 }
 0x3bf   : > { %4605 = vst [vmem:[#allocation1] ss:$4 sm:$0xff] %v4438_v58  ;;  %3886 = vrot.lane.b32.xlu1 %v3855_v30, %s5738_s23  ;;  %3884 = vrot.lane.b32.xlu0 %v3854_v33, %s5738_s23  ;;  %v4125_v30 = vpack.c.b16 %v4109_v53, %v4109_v53  ;;  %v3693_v31 = vor.u32 %v3692_v18, %v3688_v54  ;;  %v3537_v33 = vrot.slane %v3521_v0, 1  ;;  %v3699_v20 = vrot.slane %v3697_v63, 1 }
 0x3c0   : > { %v4033_v28 = vor.u32 %v4032_v1, %v4028_v17  ;;  %v3522_v58 = vpack.c.b16 %v3506_v11, %v3506_v11  ;;  %v3523_v39 = vpack.c.b16 %v3507_v44, %v3507_v44  ;;  %v3448_v6 = vor.u32 %v3447_v42, %v3443_v60  ;;  %v3249_v11 = vld [vmem:[#allocation3 + $0xc] sm:$0x3] }
 0x3c1   : > { %v3459_v43 = vpop.permute.xlu1 %3458  ;;  %v7061_v4 = vpop.permute.xlu0 %3860  ;;  %v4246_v15 = vsel %vm4144_vm10, %v3693_v31, %v6875_v45  ;;  %v4198_v13 = vsel %vm4144_vm10, %v3537_v33, %v6955_v46  ;;  %v3440_v41 = vrot.slane %v3438_v19, 1  ;;  %v3707_v62 = vor.u32 %v3706_v3, %v3702_v34  ;;  %v3154_v31 = vld [vmem:[#allocation3 + $0xc] sm:$0x3] }
 0x3c2   : > { %4072 = vrot.lane.b32.xlu2 %v4026_v8, %s5738_s23  ;;  %v4141_v8 = vrot.slane %v4125_v30, 1  ;;  %v4142_v51 = vrot.slane %v4126_v37, 1  ;;  %v4150_v45 = vsel %vm4144_vm10, %v3152_v55, %v3459_v43  ;;  %v3436_v46 = vshrl.u32 %v7058_v32, 16 }
 0x3c3   : > { %v4389_v53 = vrot.slane %v4246_v15, 4  ;;  %v4388_v1 = vrot.slane %v4198_v13, 6  ;;  %v3450_v57 = vshrl.u32 %v7064_v36, 16  ;;  %v3538_v24 = vrot.slane %v3522_v58, 1 }
 0x3c4   : > { %v7073_v16 = vpop.permute.xlu2 %3864  ;;  %v3539_v25 = vrot.slane %v3523_v39, 1  ;;  %v3441_v17 = vor.u32 %v3440_v41, %v3436_v46  ;;  %v3700_v43 = vor.u32 %v3699_v20, %v3695_v9  ;;  %v3219_v9 = vld [vmem:[#allocation3 + $0x1c] sm:$0x7]  ;;  %v3221_v41 = vld [vmem:[#allocation3 + $0x24] sm:$0x7] }
 0x3c5   : > { %v7089_v23 = vld.sshfl [vmem:[#allocation1 + $0x20] sm:$0xff pattern:$0x73625140]  ;;  %v4440_v42 = vsel %vm674_vm9, %v4150_v45, %v4388_v1  ;;  %v3455_v63 = vor.u32 %v3454_v56, %v3450_v57  ;;  %v4201_v19 = vsel %vm4144_vm10, %v3538_v24, %v6893_v38 }
 0x3c6   : > { %4668 = vst [vmem:[#allocation1 + $0x20] ss:$4 sm:$0xff] %v4140_v47  ;;  %v4204_v36 = vsel %vm4144_vm10, %v3539_v25, %v7007_v10  ;;  %v4249_v30 = vsel %vm4144_vm10, %v3700_v43, %v7061_v4  ;;  %v4153_v10 = vsel %vm4144_vm10, %v3153_v29, %v6969_v48  ;;  %v4391_v38 = vrot.slane %v4201_v19, 6  ;;  %v3222_v45 = vld [vmem:[#allocation3 + $0x28] sm:$0x7] }
 0x3c7   : > { %4076 = vrot.lane.b32.xlu1 %v4040_v35, %s5738_s23  ;;  %4074 = vrot.lane.b32.xlu0 %v4033_v28, %s5738_s23  ;;  %4670 = vst [vmem:[#allocation1 + $0x21] ss:$4 sm:$0xff] %v4141_v8  ;;  %v4300_v35 = vsel %vm4144_vm10, %v3251_v21, %v6828_v27  ;;  %v4394_v50 = vrot.slane %v4204_v36, 6  ;;  %v4392_v37 = vrot.slane %v4249_v30, 4  ;;  %v3654_v21 = vunpack.c.l.b16 %v3221_v41  ;;  %v3189_v43 = vld [vmem:[#allocation3 + $0x20] sm:$0x6] }
 0x3c8   : > { %4672 = vst [vmem:[#allocation1 + $0x22] ss:$4 sm:$0xff] %v4142_v51  ;;  %v4396_v60 = vrot.slane %v4300_v35, 2  ;;  %v4446_v47 = vsel %vm674_vm9, %v4153_v10, %v4391_v38  ;;  %v3655_v25 = vunpack.c.l.b16 %v3222_v45 }
 0x3c9   : > { %v3863_v59 = vpop.permute.xlu1 %3862  ;;  %v4051_v52 = vpop.permute.xlu0 %4050  ;;  %4674 = vst [vmem:[#allocation1 + $0x23] ss:$4 sm:$0xff] %v4143_v26  ;;  %v3250_v26 = vld [vmem:[#allocation3 + $0x10] sm:$0x3]  ;;  %v3670_v57 = vpack.c.b16 %v3654_v21, %v3654_v21 }
 0x3ca   : > { %3484 = vrot.lane.b32.xlu2 %v3448_v6, %s5738_s23  ;;  %v4294_v54 = vsel %vm4144_vm10, %v3249_v11, %v4051_v52  ;;  %v4252_v44 = vsel %vm4144_vm10, %v3707_v62, %v3863_v59  ;;  %v3652_v11 = vunpack.c.l.b16 %v3219_v9  ;;  %v3187_v59 = vld [vmem:[#allocation3 + $0x18] sm:$0x6]  ;;  %v3220_v62 = vld [vmem:[#allocation3 + $0x20] sm:$0x7]  ;;  %v3671_v30 = vpack.c.b16 %v3655_v25, %v3655_v25 }
 0x3cb   : > { %v4390_v18 = vrot.slane %v4294_v54, 2  ;;  %v4395_v28 = vrot.slane %v4252_v44, 4  ;;  %v3508_v56 = vunpack.c.l.b16 %v3187_v59  ;;  %v3653_v54 = vunpack.c.l.b16 %v3220_v62 }
 0x3cc   : > { %v7094_v0 = vpop.permute.xlu2 %3466  ;;  %v3668_v52 = vpack.c.b16 %v3652_v11, %v3652_v11  ;;  %v3725_v36 = vshll.u32 %v3670_v57, 16  ;;  %v3723_v38 = vshrl.u32 %v3670_v57, 16 }
 0x3cd   : > { %v4443_v32 = vsel %vm2164_vm2, %v4389_v53, %v4390_v18  ;;  %v4455_v34 = vsel %vm2164_vm2, %v4395_v28, %v4396_v60  ;;  %v3524_v1 = vpack.c.b16 %v3508_v56, %v3508_v56  ;;  %v3510_v28 = vunpack.c.l.b16 %v3189_v43 }
 0x3ce   : > { %v4444_v3 = vsel %vm2168_vm4, %v4440_v42, %v4443_v32  ;;  %v3711_v53 = vshll.u32 %v3668_v52, 16  ;;  %v3188_v32 = vld [vmem:[#allocation3 + $0x1c] sm:$0x6]  ;;  %v3709_v19 = vshrl.u32 %v3668_v52, 16  ;;  %v3727_v10 = vrot.slane %v3725_v36, 1 }
 0x3cf   : > { %3482 = vrot.lane.b32.xlu1 %v3441_v17, %s5738_s23  ;;  %4607 = vst [vmem:[#allocation1 + $0x1] ss:$4 sm:$0xff] %v4444_v3  ;;  %3486 = vrot.lane.b32.xlu0 %v3455_v63, %s5738_s23  ;;  %v3669_v17 = vpack.c.b16 %v3653_v54, %v3653_v54  ;;  %v3540_v35 = vrot.slane %v3524_v1, 1  ;;  %v3509_v29 = vunpack.c.l.b16 %v3188_v32  ;;  %v3224_v1 = vld [vmem:[#allocation3 + $0x38] sm:$0x7]  ;;  %s7322_s23 = scalar_lea.vmem [#allocation4], %s5165_s22 }
 0x3d0   : > { %v3713_v63 = vrot.slane %v3711_v53, 1  ;;  %s5096_s14 = sshll.u32 %s7322_s23, 4  ;;  %s5097_s14 = int_to_ptr.vmem [resolvable:$true] %s5096_s14 }
 0x3d1   : > { %v4053_v27 = vpop.permute.xlu1 %4052  ;;  %v3463_v58 = vpop.permute.xlu0 %3462  ;;  %v3716_v11 = vshrl.u32 %v3669_v17, 16 }
 0x3d2   : > { %v4297_v33 = vsel %vm4144_vm10, %v3250_v26, %v4053_v27  ;;  %v4156_v4 = vsel %vm4144_vm10, %v3154_v31, %v3463_v58  ;;  %v3718_v26 = vshll.u32 %v3669_v17, 16  ;;  %v3714_v27 = vor.u32 %v3713_v63, %v3709_v19  ;;  %v3253_v19 = vld [vmem:[#allocation3 + $0x24] sm:$0x3] }
 0x3d3   : > { %v4393_v39 = vrot.slane %v4297_v33, 2  ;;  %v4452_v6 = vsel %vm674_vm9, %v4156_v4, %v4394_v50  ;;  %v3732_v31 = vshll.u32 %v3671_v30, 16  ;;  %v3526_v58 = vpack.c.b16 %v3510_v28, %v3510_v28  ;;  %v3190_v33 = vld [vmem:[#allocation3 + $0x24] sm:$0x6]  ;;  %v3155_v4 = vld [vmem:[#allocation3 + $0x18] sm:$0x3] }
 0x3d4   : > { %v7119_v15 = vpop.permute.xlu2 %3870  ;;  %v4456_v48 = vsel %vm2168_vm4, %v4452_v6, %v4455_v34  ;;  %v4255_v50 = vsel %vm4144_vm10, %v3714_v27, %v7073_v16  ;;  %v3720_v9 = vrot.slane %v3718_v26, 1  ;;  %v3252_v6 = vld [vmem:[#allocation3 + $0x20] sm:$0x3]  ;;  %v3511_v59 = vunpack.c.l.b16 %v3190_v33 }
 0x3d5   : > { %v4449_v13 = vsel %vm2164_vm2, %v4392_v37, %v4393_v39  ;;  %4611 = vst [vmem:[#allocation1 + $0x3] ss:$4 sm:$0xff] %v4456_v48  ;;  %v3525_v39 = vpack.c.b16 %v3509_v29, %v3509_v29  ;;  %v4159_v16 = vsel %vm4144_vm10, %v3155_v4, %v6877_v2  ;;  %v3734_v52 = vrot.slane %v3732_v31, 1  ;;  %v3157_v26 = vld [vmem:[#allocation3 + $0x20] sm:$0x3] }
 0x3d6   : > { %v4450_v55 = vsel %vm2168_vm4, %v4446_v47, %v4449_v13  ;;  %v3728_v13 = vor.u32 %v3727_v10, %v3723_v38  ;;  %v3542_v62 = vrot.slane %v3526_v58, 1  ;;  %v3721_v45 = vor.u32 %v3720_v9, %v3716_v11  ;;  %v3192_v11 = vld [vmem:[#allocation3 + $0x34] sm:$0x6] }
 0x3d7   : > { %4609 = vst [vmem:[#allocation1 + $0x2] ss:$4 sm:$0xff] %v4450_v55  ;;  %v4398_v55 = vrot.slane %v4255_v50, 4  ;;  %v3541_v21 = vrot.slane %v3525_v39, 1  ;;  %v3527_v32 = vpack.c.b16 %v3511_v59, %v3511_v59  ;;  %v3158_v59 = vld [vmem:[#allocation3 + $0x24] sm:$0x3] }
 0x3d9   : > { %v3609_v8 = vpop.permute.xlu1 %3608  ;;  %v7125_v20 = vpop.permute.xlu0 %3866  ;;  %v4210_v17 = vsel %vm4144_vm10, %v3541_v21, %v7023_v14  ;;  %v3543_v33 = vrot.slane %v3527_v32, 1  ;;  %v3513_v21 = vunpack.c.l.b16 %v3192_v11  ;;  %v3225_v32 = vld [vmem:[#allocation3 + $0x3c] sm:$0x7] }
 0x3da   : > { %v4207_v60 = vsel %vm4144_vm10, %v3540_v35, %v3609_v8  ;;  %v4258_v43 = vsel %vm4144_vm10, %v3721_v45, %v7125_v20  ;;  %v3156_v35 = vld [vmem:[#allocation3 + $0x1c] sm:$0x3]  ;;  %v4400_v10 = vrot.slane %v4210_v17, 6 }
 0x3db   : > { %v4397_v34 = vrot.slane %v4207_v60, 6  ;;  %v4162_v28 = vsel %vm4144_vm10, %v3156_v35, %v7094_v0  ;;  %v3255_v60 = vld [vmem:[#allocation3 + $0x2c] sm:$0x3]  ;;  %v4401_v20 = vrot.slane %v4258_v43, 4 }
 0x3dc   : > { %v4061_v51 = vpop.permute.xlu2 %4060  ;;  %v4464_v4 = vsel %vm674_vm9, %v4162_v28, %v4400_v10 }
 0x3dd   : > { %v4458_v54 = vsel %vm674_vm9, %v4159_v16, %v4397_v34  ;;  %v4312_v34 = vsel %vm4144_vm10, %v3255_v60, %v6879_v7 }
 0x3de   : > { %v4624_v46 = vld.sshfl [vmem:[#allocation1] sm:$0xff pattern:$0x73625140]  ;;  %v4625_v18 = vld.sshfl [vmem:[#allocation1 + $0x8] sm:$0xff pattern:$0x73625140] }
 0x3df   : > { %4928 = vmatmul.bf16.vlgmr.msrb.gmra.mxu2 %v4624_v46  ;;  %4957 = vmatmul.bf16.vlgmr.msrb.gmra.mxu3 %v4625_v18  ;;  %v4626_v24 = vld.sshfl [vmem:[#allocation1 + $0x10] sm:$0xff pattern:$0x73625140]  ;;  %v3254_v46 = vld [vmem:[#allocation3 + $0x28] sm:$0x3]  ;;  %v3730_v18 = vshrl.u32 %v3671_v30, 16 }
 0x3e0   : > { %4986 = vmatmul.bf16.vlgmr.msrb.gmra.mxu1 %v4626_v24  ;;  %v4309_v57 = vsel %vm4144_vm10, %v3254_v46, %v4061_v51  ;;  %v7143_v24 = vld.sshfl [vmem:[#allocation1 + $0x18] sm:$0xff pattern:$0x73625140]  ;;  %v3657_v51 = vunpack.c.l.b16 %v3224_v1  ;;  %v3191_v1 = vld [vmem:[#allocation3 + $0x30] sm:$0x6] }
 0x3e1   : > { %v7127_v44 = vpop.permute.xlu1 %3614  ;;  %v3613_v42 = vpop.permute.xlu0 %3612  ;;  %v3735_v36 = vor.u32 %v3734_v52, %v3730_v18  ;;  %v3512_v43 = vunpack.c.l.b16 %v3191_v1 }
 0x3e2   : > { %v4213_v25 = vsel %vm4144_vm10, %v3542_v62, %v3613_v42  ;;  %v4405_v42 = vrot.slane %v4309_v57, 2  ;;  %v3529_v57 = vpack.c.b16 %v3513_v21, %v3513_v21  ;;  %v3259_v21 = vld [vmem:[#allocation3 + $0x44] sm:$0x3] }
 0x3e3   : > { %v4403_v29 = vrot.slane %v4213_v25, 6  ;;  %v4264_v58 = vsel %vm4144_vm10, %v3735_v36, %v7119_v15 }
 0x3e4   : > { %v7129_v3 = vpop.permute.xlu2 %3616 }
 0x3e9   : > { %v3869_v37 = vpop.permute.xlu1 %3868  ;;  %v4057_v47 = vpop.permute.xlu0 %4056 }
 0x3ea   : > { %v4303_v48 = vsel %vm4144_vm10, %v3252_v6, %v4057_v47  ;;  %v4261_v56 = vsel %vm4144_vm10, %v3728_v13, %v3869_v37  ;;  %v4216_v6 = vsel %vm4144_vm10, %v3543_v33, %v7127_v44  ;;  %v4407_v47 = vrot.slane %v4264_v58, 4  ;;  %v3223_v44 = vld [vmem:[#allocation3 + $0x34] sm:$0x7]  ;;  %v5616_v33 = vld [vmem:[%s7387_s5 + $0xf8] sm:$0xff] }
 0x3eb   : > { %v4399_v41 = vrot.slane %v4303_v48, 2  ;;  %v4404_v63 = vrot.slane %v4261_v56, 4  ;;  %v3673_v48 = vpack.c.b16 %v3657_v51, %v3657_v51  ;;  %v4408_v13 = vrot.slane %v4312_v34, 2  ;;  %5007 = vmatpush.bf16.msra.mxu2 %v5616_v33  ;;  %v5615_v34 = vld [vmem:[%s7387_s5 + $0xf0] sm:$0xff] }
 0x3ec   : > { %v7135_v8 = vpop.permute.xlu2 %3622  ;;  %v3656_v46 = vunpack.c.l.b16 %v3223_v44  ;;  %v3658_v51 = vunpack.c.l.b16 %v3225_v32 }
 0x3ed   : > { %v4461_v53 = vsel %vm2164_vm2, %v4398_v55, %v4399_v41  ;;  %v4473_v38 = vsel %vm2164_vm2, %v4404_v63, %v4405_v42  ;;  %v4406_v55 = vrot.slane %v4216_v6, 6  ;;  %v4479_v62 = vsel %vm2164_vm2, %v4407_v47, %v4408_v13 }
 0x3ee   : > { %v4462_v2 = vsel %vm2168_vm4, %v4458_v54, %v4461_v53  ;;  %v3746_v56 = vshll.u32 %v3673_v48, 16  ;;  %v3226_v53 = vld [vmem:[#allocation3 + $0x40] sm:$0x7]  ;;  %v3744_v25 = vshrl.u32 %v3673_v48, 16  ;;  %v3672_v35 = vpack.c.b16 %v3656_v46, %v3656_v46 }
 0x3ef   : > { %4629 = vst [vmem:[#allocation1] ss:$4 sm:$0xff] %v4462_v2  ;;  %v3659_v17 = vunpack.c.l.b16 %v3226_v53  ;;  %5008 = vmatpush.bf16.msra.mxu2 %v5615_v34 }
 0x3f0   : > { %v3748_v18 = vrot.slane %v3746_v56, 1  ;;  %v3739_v60 = vshll.u32 %v3672_v35, 16 }
 0x3f1   : > { %v4059_v30 = vpop.permute.xlu1 %4058  ;;  %v3469_v27 = vpop.permute.xlu0 %3468 }
 0x3f2   : > { %v4306_v14 = vsel %vm4144_vm10, %v3253_v19, %v4059_v30  ;;  %v4165_v50 = vsel %vm4144_vm10, %v3157_v26, %v3469_v27  ;;  %v3749_v36 = vor.u32 %v3748_v18, %v3744_v25  ;;  %v3194_v19 = vld [vmem:[#allocation3 + $0x3c] sm:$0x6]  ;;  %v3545_v30 = vrot.slane %v3529_v57, 1  ;;  %v5614_v57 = vld [vmem:[%s7387_s5 + $0xe8] sm:$0xff] }
 0x3f3   : > { %v4402_v31 = vrot.slane %v4306_v14, 2  ;;  %v4470_v0 = vsel %vm674_vm9, %v4165_v50, %v4403_v29  ;;  %v3675_v26 = vpack.c.b16 %v3659_v17, %v3659_v17  ;;  %v3528_v27 = vpack.c.b16 %v3512_v43, %v3512_v43  ;;  %v3257_v14 = vld [vmem:[#allocation3 + $0x3c] sm:$0x3]  ;;  %v3159_v17 = vld [vmem:[#allocation3 + $0x30] sm:$0x3]  ;;  %5009 = vmatpush.bf16.msra.mxu2 %v5614_v57 }
 0x3f4   : > { %v7159_v37 = vpop.permute.xlu2 %3876  ;;  %v4474_v39 = vsel %vm2168_vm4, %v4470_v0, %v4473_v38  ;;  %v5620_v38 = vld [vmem:[%s7387_s5 + $0x118] sm:$0xff]  ;;  %v3741_v48 = vrot.slane %v3739_v60, 1  ;;  %v5619_v25 = vld [vmem:[%s7387_s5 + $0x110] sm:$0xff] }
 0x3f5   : > { %v4467_v9 = vsel %vm2164_vm2, %v4401_v20, %v4402_v31  ;;  %4631 = vst [vmem:[#allocation1 + $0x2] ss:$4 sm:$0xff] %v4474_v39  ;;  %v3515_v20 = vunpack.c.l.b16 %v3194_v19  ;;  %5040 = vmatpush.bf16.msra.mxu3 %v5620_v38  ;;  %v3544_v6 = vrot.slane %v3528_v27, 1  ;;  %v3758_v18 = vshrl.u32 %v3675_v26, 16  ;;  %v3227_v38 = vld [vmem:[#allocation3 + $0x4c] sm:$0x7] }
 0x3f6   : > { %v4468_v15 = vsel %vm2168_vm4, %v4464_v4, %v4467_v9  ;;  %v7182_v4 = vpack.c.b16 %v3658_v51, %v3658_v51  ;;  %v3760_v9 = vshll.u32 %v3675_v26, 16 }
 0x3f7   : > { %4630 = vst [vmem:[#allocation1 + $0x1] ss:$4 sm:$0xff] %v4468_v15  ;;  %v3531_v11 = vpack.c.b16 %v3515_v20, %v3515_v20 }
 0x3f8   : > { %v3762_v44 = vrot.slane %v3760_v9, 1 }
 0x3f9   : > { %v3471_v41 = vpop.permute.xlu1 %3470  ;;  %v3619_v16 = vpop.permute.xlu0 %3618  ;;  %v3547_v1 = vrot.slane %v3531_v11, 1  ;;  %5041 = vmatpush.bf16.msra.mxu3 %v5619_v25  ;;  %v3161_v11 = vld [vmem:[#allocation3 + $0x38] sm:$0x3] }
 0x3fa   : > { %v4168_v52 = vsel %vm4144_vm10, %v3158_v59, %v3471_v41  ;;  %v4222_v50 = vsel %vm4144_vm10, %v3545_v30, %v3619_v16  ;;  %v3193_v59 = vld [vmem:[#allocation3 + $0x38] sm:$0x6]  ;;  %v3763_v30 = vor.u32 %v3762_v44, %v3758_v18  ;;  %v5618_v18 = vld [vmem:[%s7387_s5 + $0x108] sm:$0xff] }
 0x3fb   : > { %v4476_v7 = vsel %vm674_vm9, %v4168_v52, %v4406_v55  ;;  %v4412_v15 = vrot.slane %v4222_v50, 6  ;;  %v3160_v55 = vld [vmem:[#allocation3 + $0x34] sm:$0x3]  ;;  %v3737_v52 = vshrl.u32 %v3672_v35, 16  ;;  %v3514_v53 = vunpack.c.l.b16 %v3193_v59  ;;  %v3258_v59 = vld [vmem:[#allocation3 + $0x40] sm:$0x3] }
 0x3fc   : > { %v4480_v45 = vsel %vm2168_vm4, %v4476_v7, %v4479_v62  ;;  %v4067_v54 = vpop.permute.xlu2 %4066  ;;  %v4228_v32 = vsel %vm4144_vm10, %v3547_v1, %v7135_v8  ;;  %v4171_v8 = vsel %vm4144_vm10, %v3159_v17, %v6841_v49  ;;  %v5612_v1 = vld [vmem:[%s7387_s5 + $0xd8] sm:$0xff] }
 0x3fd   : > { %4632 = vst [vmem:[#allocation1 + $0x3] ss:$4 sm:$0xff] %v4480_v45  ;;  %v4318_v31 = vsel %vm4144_vm10, %v3257_v14, %v4067_v54  ;;  %v4219_v45 = vsel %vm4144_vm10, %v3544_v6, %v7129_v3  ;;  %v3753_v54 = vshll.u32 %v7182_v4, 16  ;;  %v3742_v46 = vor.u32 %v3741_v48, %v3737_v52  ;;  %5042 = vmatpush.bf16.msra.mxu3 %v5618_v18 }
 0x3fe   : > { %v4414_v47 = vrot.slane %v4318_v31, 2  ;;  %v4324_v3 = vsel %vm4144_vm10, %v3259_v21, %v6909_v40  ;;  %v4409_v43 = vrot.slane %v4219_v45, 6  ;;  %v3751_v31 = vshrl.u32 %v7182_v4, 16 }
 0x3ff   : > { %v3755_v51 = vrot.slane %v3753_v54, 1  ;;  %v4420_v60 = vrot.slane %v4324_v3, 2  ;;  %v3660_v4 = vunpack.c.l.b16 %v3227_v38  ;;  %v3229_v3 = vld [vmem:[#allocation3 + $0x54] sm:$0x7] }
 0x400   : > { %v4482_v50 = vsel %vm674_vm9, %v4171_v8, %v4409_v43  ;;  %v3228_v8 = vld [vmem:[#allocation3 + $0x50] sm:$0x7] }
 0x401   : > { %v3875_v2 = vpop.permute.xlu1 %3874  ;;  %v3873_v63 = vpop.permute.xlu0 %3872  ;;  %v3756_v34 = vor.u32 %v3755_v51, %v3751_v31  ;;  %v3676_v54 = vpack.c.b16 %v3660_v4, %v3660_v4  ;;  %v3662_v51 = vunpack.c.l.b16 %v3229_v3 }
 0x402   : > { %v4270_v28 = vsel %vm4144_vm10, %v3749_v36, %v3875_v2  ;;  %v4267_v2 = vsel %vm4144_vm10, %v3742_v46, %v3873_v63  ;;  %v3256_v36 = vld [vmem:[#allocation3 + $0x38] sm:$0x3] }
 0x403   : > { %v4413_v0 = vrot.slane %v4270_v28, 4  ;;  %v3162_v28 = vld [vmem:[#allocation3 + $0x3c] sm:$0x3]  ;;  %v4410_v26 = vrot.slane %v4267_v2, 4  ;;  %v4273_v48 = vsel %vm4144_vm10, %v3756_v34, %v7159_v37  ;;  %v3767_v57 = vshll.u32 %v3676_v54, 16 }
 0x404   : > { %v4641_v42 = vld.sshfl [vmem:[#allocation1] sm:$0xff pattern:$0x73625140]  ;;  %v4642_v29 = vld.sshfl [vmem:[#allocation1 + $0x8] sm:$0xff pattern:$0x73625140]  ;;  %v3479_v58 = vpop.permute.xlu2 %3478  ;;  %v3678_v31 = vpack.c.b16 %v3662_v51, %v3662_v51 }
 0x405   : > { %4933 = vmatmul.bf16.gmra.mxu2 %v4641_v42  ;;  %4962 = vmatmul.bf16.gmra.mxu3 %v4642_v29  ;;  %v4643_v10 = vld.sshfl [vmem:[#allocation1 + $0x10] sm:$0xff pattern:$0x73625140]  ;;  %v4491_v16 = vsel %vm2164_vm2, %v4413_v0, %v4414_v47  ;;  %v7192_v7 = vld.sshfl [vmem:[#allocation1 + $0x18] sm:$0xff pattern:$0x73625140]  ;;  %v3530_v42 = vpack.c.b16 %v3514_v53, %v3514_v53  ;;  %v4180_v40 = vsel %vm4144_vm10, %v3162_v28, %v3479_v58 }
 0x406   : > { %4991 = vmatmul.bf16.gmra.mxu1 %v4643_v10  ;;  %v4418_v10 = vrot.slane %v4228_v32, 6  ;;  %v5613_v58 = vld [vmem:[%s7387_s5 + $0xe0] sm:$0xff]  ;;  %v4416_v44 = vrot.slane %v4273_v48, 4  ;;  %v3769_v43 = vrot.slane %v3767_v57, 1  ;;  %v5611_v28 = vld [vmem:[%s7387_s5 + $0xd0] sm:$0xff]  ;;  %v3781_v48 = vshll.u32 %v3678_v31, 16 }
 0x407   : > { %v3546_v6 = vrot.slane %v3530_v42, 1  ;;  %v3195_v47 = vld [vmem:[#allocation3 + $0x48] sm:$0x6]  ;;  %5010 = vmatpush.bf16.msra.mxu2 %v5613_v58 }
 0x408   : > { %v4500_v0 = vsel %vm674_vm9, %v4180_v40, %v4418_v10 }
 0x409   : > { %v7184_v39 = vpop.permute.xlu1 %3620  ;;  %v3475_v13 = vpop.permute.xlu0 %3474 }
 0x40a   : > { %v4174_v41 = vsel %vm4144_vm10, %v3160_v55, %v3475_v13  ;;  %v4225_v13 = vsel %vm4144_vm10, %v3546_v6, %v7184_v39 }
 0x40b   : > { %v4488_v62 = vsel %vm674_vm9, %v4174_v41, %v4412_v15  ;;  %v4415_v21 = vrot.slane %v4225_v13, 6  ;;  %5011 = vmatpush.bf16.msra.mxu2 %v5612_v1 }
 0x40c   : > { %v4492_v56 = vsel %vm2168_vm4, %v4488_v62, %v4491_v16  ;;  %v7209_v35 = vpop.permute.xlu2 %3882  ;;  %v3516_v16 = vunpack.c.l.b16 %v3195_v47 }
 0x40d   : > { %4647 = vst [vmem:[#allocation1 + $0x1] ss:$4 sm:$0xff] %v4492_v56 }
 0x40e   : > { %v3532_v39 = vpack.c.b16 %v3516_v16, %v3516_v16  ;;  %v5609_v16 = vld [vmem:[%s7387_s5 + $0xc0] sm:$0xff] }
 0x40f   : > { %5012 = vmatpush.bf16.msra.mxu2 %v5611_v28 }
 0x410   : > { %v3548_v2 = vrot.slane %v3532_v39, 1 }
 0x411   : > { %v4065_v19 = vpop.permute.xlu1 %4064  ;;  %v3879_v29 = vpop.permute.xlu0 %3878 }
 0x412   : > { %v4315_v63 = vsel %vm4144_vm10, %v3256_v36, %v4065_v19  ;;  %v4276_v14 = vsel %vm4144_vm10, %v3763_v30, %v3879_v29  ;;  %v3260_v36 = vld [vmem:[#allocation3 + $0x50] sm:$0x3]  ;;  %v3765_v30 = vshrl.u32 %v3676_v54, 16 }
 0x413   : > { %v4411_v27 = vrot.slane %v4315_v63, 2  ;;  %v4419_v20 = vrot.slane %v4276_v14, 4  ;;  %v3230_v63 = vld [vmem:[#allocation3 + $0x58] sm:$0x7]  ;;  %v3163_v14 = vld [vmem:[#allocation3 + $0x48] sm:$0x3] }
 0x414   : > { %v7230_v52 = vpop.permute.xlu2 %3628 }
 0x415   : > { %v4485_v33 = vsel %vm2164_vm2, %v4410_v26, %v4411_v27  ;;  %v4503_v49 = vsel %vm2164_vm2, %v4419_v20, %v4420_v60  ;;  %v3770_v27 = vor.u32 %v3769_v43, %v3765_v30  ;;  %v3262_v30 = vld [vmem:[#allocation3 + $0x58] sm:$0x3] }
 0x416   : > { %v4486_v9 = vsel %vm2168_vm4, %v4482_v50, %v4485_v33  ;;  %v4504_v15 = vsel %vm2168_vm4, %v4500_v0, %v4503_v49  ;;  %v3197_v33 = vld [vmem:[#allocation3 + $0x50] sm:$0x6]  ;;  %v3663_v0 = vunpack.c.l.b16 %v3230_v63  ;;  %v3661_v49 = vunpack.c.l.b16 %v3228_v8  ;;  %v3261_v8 = vld [vmem:[#allocation3 + $0x54] sm:$0x3] }
 0x417   : > { %4646 = vst [vmem:[#allocation1] ss:$4 sm:$0xff] %v4486_v9  ;;  %v4183_v9 = vsel %vm4144_vm10, %v3163_v14, %v6913_v61  ;;  %v5617_v61 = vld [vmem:[%s7387_s5 + $0x100] sm:$0xff] }
 0x418   : > { %4649 = vst [vmem:[#allocation1 + $0x3] ss:$4 sm:$0xff] %v4504_v15  ;;  %v3518_v15 = vunpack.c.l.b16 %v3197_v33  ;;  %v3679_v13 = vpack.c.b16 %v3663_v0, %v3663_v0  ;;  %5043 = vmatpush.bf16.msra.mxu3 %v5617_v61  ;;  %v3164_v61 = vld [vmem:[#allocation3 + $0x4c] sm:$0x3] }
 0x419   : > { %v3477_v55 = vpop.permute.xlu1 %3476  ;;  %v4069_v41 = vpop.permute.xlu0 %4068 }
 0x41a   : > { %v4177_v62 = vsel %vm4144_vm10, %v3161_v11, %v3477_v55  ;;  %v4321_v56 = vsel %vm4144_vm10, %v3258_v59, %v4069_v41  ;;  %v5610_v55 = vld [vmem:[%s7387_s5 + $0xc8] sm:$0xff]  ;;  %v3677_v11 = vpack.c.b16 %v3661_v49, %v3661_v49  ;;  %v3196_v59 = vld [vmem:[#allocation3 + $0x4c] sm:$0x6] }
 0x41b   : > { %v4417_v45 = vrot.slane %v4321_v56, 2  ;;  %v4494_v37 = vsel %vm674_vm9, %v4177_v62, %v4415_v21  ;;  %5013 = vmatpush.bf16.msra.mxu2 %v5610_v55  ;;  %v3534_v62 = vpack.c.b16 %v3518_v15, %v3518_v15  ;;  %v3198_v56 = vld [vmem:[#allocation3 + $0x54] sm:$0x6] }
 0x41c   : > { %v4073_v32 = vpop.permute.xlu2 %4072  ;;  %v3774_v54 = vshll.u32 %v3677_v11, 16  ;;  %v3519_v39 = vunpack.c.l.b16 %v3198_v56  ;;  %v3772_v28 = vshrl.u32 %v3677_v11, 16 }
 0x41d   : > { %v4497_v46 = vsel %vm2164_vm2, %v4416_v44, %v4417_v45  ;;  %v4327_v29 = vsel %vm4144_vm10, %v3260_v36, %v4073_v32  ;;  %v3783_v44 = vrot.slane %v3781_v48, 1  ;;  %v3788_v45 = vshll.u32 %v3679_v13, 16  ;;  %v3165_v32 = vld [vmem:[#allocation3 + $0x50] sm:$0x3] }
 0x41e   : > { %v4498_v53 = vsel %vm2168_vm4, %v4494_v37, %v4497_v46  ;;  %v4423_v38 = vrot.slane %v4327_v29, 2  ;;  %v3517_v37 = vunpack.c.l.b16 %v3196_v59  ;;  %v3779_v46 = vshrl.u32 %v3678_v31, 16  ;;  %v3166_v59 = vld [vmem:[#allocation3 + $0x54] sm:$0x3] }
 0x41f   : > { %4648 = vst [vmem:[#allocation1 + $0x2] ss:$4 sm:$0xff] %v4498_v53  ;;  %5014 = vmatpush.bf16.msra.mxu2 %v5609_v16  ;;  %v3550_v53 = vrot.slane %v3534_v62, 1  ;;  %v3790_v57 = vrot.slane %v3788_v45, 1  ;;  %v3535_v36 = vpack.c.b16 %v3519_v39, %v3519_v39 }
 0x420   : > { %v3784_v1 = vor.u32 %v3783_v44, %v3779_v46  ;;  %v3533_v3 = vpack.c.b16 %v3517_v37, %v3517_v37  ;;  %v4679_v39 = vld.sshfl [vmem:[#allocation1 + $0x20] sm:$0xff pattern:$0x73625140] }
 0x421   : > { %v7243_v25 = vpop.permute.xlu1 %3626  ;;  %v3625_v17 = vpop.permute.xlu0 %3624  ;;  %v3551_v33 = vrot.slane %v3535_v36, 1 }
 0x422   : > { %v4231_v19 = vsel %vm4144_vm10, %v3548_v2, %v3625_v17  ;;  %v3776_v2 = vrot.slane %v3774_v54, 1  ;;  %v4237_v17 = vsel %vm4144_vm10, %v3550_v53, %v7230_v52  ;;  %v3263_v52 = vld [vmem:[#allocation3 + $0x5c] sm:$0x3] }
 0x423   : > { %v4421_v60 = vrot.slane %v4231_v19, 6  ;;  %v3786_v19 = vshrl.u32 %v3679_v13, 16 }
 0x424   : > { %v3485_v18 = vpop.permute.xlu2 %3484 }
 0x425   : > { %v4506_v34 = vsel %vm674_vm9, %v4183_v9, %v4421_v60  ;;  %v3777_v60 = vor.u32 %v3776_v2, %v3772_v28 }
 0x426   : > { %v4658_v42 = vld.sshfl [vmem:[#allocation1] sm:$0xff pattern:$0x73625140]  ;;  %v4659_v26 = vld.sshfl [vmem:[#allocation1 + $0x8] sm:$0xff pattern:$0x73625140] }
 0x427   : > { %4938 = vmatmul.bf16.gmra.mxu2 %v4658_v42  ;;  %v4660_v40 = vld.sshfl [vmem:[#allocation1 + $0x10] sm:$0xff pattern:$0x73625140]  ;;  %4967 = vmatmul.bf16.gmra.mxu3 %v4659_v26  ;;  %v7257_v47 = vld.sshfl [vmem:[#allocation1 + $0x18] sm:$0xff pattern:$0x73625140]  ;;  %v4189_v42 = vsel %vm4144_vm10, %v3165_v32, %v3485_v18  ;;  %v4282_v0 = vsel %vm4144_vm10, %v3777_v60, %v7209_v35 }
 0x428   : > { %4996 = vmatmul.bf16.gmra.mxu1 %v4660_v40  ;;  %v4427_v26 = vrot.slane %v4237_v17, 6  ;;  %v3791_v40 = vor.u32 %v3790_v57, %v3786_v19  ;;  %v4425_v48 = vrot.slane %v4282_v0, 4  ;;  %v7310_v32 = vld [vmem:[%s7388_s6] ss:$0 sm:$0xff] }
 0x429   : > { %v3881_v10 = vpop.permute.xlu1 %3880  ;;  %v7251_v50 = vpop.permute.xlu0 %3630 }
 0x42a   : > { %v4279_v20 = vsel %vm4144_vm10, %v3770_v27, %v3881_v10  ;;  %v3549_v10 = vrot.slane %v3533_v3, 1  ;;  %v4518_v31 = vsel %vm674_vm9, %v4189_v42, %v4427_v26 }
 0x42b   : > { %v4422_v58 = vrot.slane %v4279_v20, 4 }
 0x42c   : > { %v4234_v9 = vsel %vm4144_vm10, %v3549_v10, %v7243_v25 }
 0x42d   : > { %v4509_v6 = vsel %vm2164_vm2, %v4422_v58, %v4423_v38  ;;  %v4424_v13 = vrot.slane %v4234_v9, 6 }
 0x42e   : > { %v4510_v4 = vsel %vm2168_vm4, %v4506_v34, %v4509_v6  ;;  %v4336_v34 = vsel %vm4144_vm10, %v3263_v52, %v6863_v5  ;;  %v4240_v6 = vsel %vm4144_vm10, %v3551_v33, %v7251_v50 }
 0x42f   : > { %4663 = vst [vmem:[#allocation1] ss:$4 sm:$0xff] %v4510_v4  ;;  %v4432_v11 = vrot.slane %v4336_v34, 2  ;;  %v4430_v35 = vrot.slane %v4240_v6, 6 }
 0x431   : > { %v3887_v41 = vpop.permute.xlu1 %3886  ;;  %v3885_v21 = vpop.permute.xlu0 %3884 }
 0x432   : > { %v4285_v43 = vsel %vm4144_vm10, %v3784_v1, %v3885_v21  ;;  %v4288_v38 = vsel %vm4144_vm10, %v3791_v40, %v3887_v41 }
 0x433   : > { %v4428_v27 = vrot.slane %v4285_v43, 4  ;;  %v4431_v4 = vrot.slane %v4288_v38, 4 }
 0x435   : > { %v4527_v50 = vsel %vm2164_vm2, %v4431_v4, %v4432_v11 }
 0x439   : > { %v4077_v51 = vpop.permute.xlu1 %4076  ;;  %v4075_v29 = vpop.permute.xlu0 %4074 }
 0x43a   : > { %v4333_v63 = vsel %vm4144_vm10, %v3262_v30, %v4077_v51  ;;  %v4330_v20 = vsel %vm4144_vm10, %v3261_v8, %v4075_v29 }
 0x43b   : > { %v4429_v14 = vrot.slane %v4333_v63, 2  ;;  %v4426_v15 = vrot.slane %v4330_v20, 2 }
 0x43d   : > { %v4521_v58 = vsel %vm2164_vm2, %v4428_v27, %v4429_v14  ;;  %v4515_v16 = vsel %vm2164_vm2, %v4425_v48, %v4426_v15 }
 0x43e   : > { %v4522_v49 = vsel %vm2168_vm4, %v4518_v31, %v4521_v58 }
 0x43f   : > { %4665 = vst [vmem:[#allocation1 + $0x2] ss:$4 sm:$0xff] %v4522_v49 }
 0x441   : > { %v3483_v55 = vpop.permute.xlu1 %3482  ;;  %v3487_v41 = vpop.permute.xlu0 %3486 }
 0x442   : > { %v4186_v25 = vsel %vm4144_vm10, %v3164_v61, %v3483_v55  ;;  %v4192_v5 = vsel %vm4144_vm10, %v3166_v59, %v3487_v41 }
 0x443   : > { %v4512_v62 = vsel %vm674_vm9, %v4186_v25, %v4424_v13  ;;  %v4524_v56 = vsel %vm674_vm9, %v4192_v5, %v4430_v35  ;;  %vm5073_vm9 = vcmask 261120  }
 0x444   : > { %v4516_v44 = vsel %vm2168_vm4, %v4512_v62, %v4515_v16  ;;  %v4528_v21 = vsel %vm2168_vm4, %v4524_v56, %v4527_v50 }
 0x445   : > { %4664 = vst [vmem:[#allocation1 + $0x1] ss:$4 sm:$0xff] %v4516_v44 }
 0x446   : > { %4666 = vst [vmem:[#allocation1 + $0x3] ss:$4 sm:$0xff] %v4528_v21 }
 0x44d   : > { %v4675_v45 = vld.sshfl [vmem:[#allocation1] sm:$0xff pattern:$0x73625140]  ;;  %v4676_v54 = vld.sshfl [vmem:[#allocation1 + $0x8] sm:$0xff pattern:$0x73625140] }
 0x44e   : > { %4943 = vmatmul.bf16.gmra.mxu2 %v4675_v45  ;;  %4972 = vmatmul.bf16.gmra.mxu3 %v4676_v54  ;;  %v4677_v37 = vld.sshfl [vmem:[#allocation1 + $0x10] sm:$0xff pattern:$0x73625140]  ;;  %v4678_v46 = vld.sshfl [vmem:[#allocation1 + $0x18] sm:$0xff pattern:$0x73625140] }
 0x44f   : > { %5001 = vmatmul.bf16.gmra.mxu1 %v4677_v37 }
 0x45d   : > { %v4987_v36 = vpop.f32.mrf.mxu1 }
 0x45e   : > { %5015 = vmatmul.bf16.vlgmr.msra.gmra.mxu2 %v7143_v24  ;;  %5525 = vmatmul.msk.bf16.vlgmr.msra.gmra.mxu3 %vm4144_vm10, %v6942_v22 }
 0x462   : > { %v4929_v53 = vpop.f32.mrf.mxu2  ;;  %v4958_v24 = vpop.f32.mrf.mxu3 }
 0x463   : > { %v4930_v19 = vadd.f32 %v7310_v32, %v4929_v53 }
 0x465   : > { %v4959_v28 = vadd.f32 %v4958_v24, %v4930_v19  ;;  %v4989_v42 = vpop.f32.mrf.mxu1 }
 0x467   : > { %v4988_v29 = vadd.f32 %v4987_v36, %v4959_v28 }
 0x46a   : > { %v4931_v1 = vpop.f32.mrf.mxu2  ;;  %v4960_v18 = vpop.f32.mrf.mxu3 }
 0x46b   : > { %v4932_v63 = vadd.f32 %v7310_v32, %v4931_v1 }
 0x46d   : > { %v4961_v14 = vadd.f32 %v4960_v18, %v4932_v63 }
 0x46e   : > { %5020 = vmatmul.bf16.gmra.mxu2 %v7192_v7  ;;  %5526 = vmatmul.msk.bf16.gmra.mxu3 %vm4144_vm10, %v7034_v12 }
 0x46f   : > { %v4990_v20 = vadd.f32 %v4989_v42, %v4961_v14 }
 0x47e   : > { %5025 = vmatmul.bf16.gmra.mxu2 %v7257_v47  ;;  %5527 = vmatmul.msk.bf16.gmra.mxu3 %vm4144_vm10, %v7089_v23 }
 0x483   : > { %v4992_v60 = vpop.f32.mrf.mxu1 }
 0x488   : > { %v4934_v22 = vpop.f32.mrf.mxu2  ;;  %v4963_v7 = vpop.f32.mrf.mxu3 }
 0x489   : > { %v4935_v10 = vadd.f32 %v7310_v32, %v4934_v22 }
 0x48b   : > { %v4964_v58 = vadd.f32 %v4963_v7, %v4935_v10  ;;  %v4994_v48 = vpop.f32.mrf.mxu1 }
 0x48d   : > { %v4993_v34 = vadd.f32 %v4992_v60, %v4964_v58 }
 0x48e   : > { %5030 = vmatmul.bf16.gmra.mxu2 %v4678_v46  ;;  %5528 = vmatmul.msk.bf16.gmra.mxu3 %vm4144_vm10, %v4679_v39 }
 0x490   : > { %v4936_v57 = vpop.f32.mrf.mxu2  ;;  %v4965_v2 = vpop.f32.mrf.mxu3 }
 0x491   : > { %v4937_v49 = vadd.f32 %v7310_v32, %v4936_v57 }
 0x493   : > { %v4966_v13 = vadd.f32 %v4965_v2, %v4937_v49 }
 0x495   : > { %v4995_v35 = vadd.f32 %v4994_v48, %v4966_v13 }
 0x4a5   : > { %v4997_v16 = vpop.f32.mrf.mxu1 }
 0x4aa   : > { %v4939_v12 = vpop.f32.mrf.mxu2  ;;  %v4968_v17 = vpop.f32.mrf.mxu3 }
 0x4ab   : > { %v4940_v11 = vadd.f32 %v7310_v32, %v4939_v12 }
 0x4ad   : > { %v4969_v5 = vadd.f32 %v4968_v17, %v4940_v11  ;;  %v4999_v39 = vpop.f32.mrf.mxu1 }
 0x4af   : > { %v4998_v44 = vadd.f32 %v4997_v16, %v4969_v5 }
 0x4b2   : > { %v4941_v47 = vpop.f32.mrf.mxu2  ;;  %v4970_v3 = vpop.f32.mrf.mxu3 }
 0x4b3   : > { %v4942_v56 = vadd.f32 %v7310_v32, %v4941_v47 }
 0x4b5   : > { %v4971_v37 = vadd.f32 %v4970_v3, %v4942_v56 }
 0x4b7   : > { %v5000_v1 = vadd.f32 %v4999_v39, %v4971_v37 }
 0x4cc   : > { %v5002_v12 = vpop.f32.mrf.mxu1 }
 0x4d1   : > { %v4944_v23 = vpop.f32.mrf.mxu2  ;;  %v7305_v43 = vpop.f32.mrf.mxu3 }
 0x4d2   : > { %v4945_v24 = vadd.f32 %v7310_v32, %v4944_v23 }
 0x4d4   : > { %v4974_v57 = vadd.f32 %v7305_v43, %v4945_v24  ;;  %v5004_v63 = vpop.f32.mrf.mxu1 }
 0x4d6   : > { %v5003_v3 = vadd.f32 %v5002_v12, %v4974_v57 }
 0x4d9   : > { %v7313_v30 = vpop.f32.mrf.mxu2  ;;  %v7315_v51 = vpop.f32.mrf.mxu3 }
 0x4da   : > { %v4947_v47 = vadd.f32 %v7310_v32, %v7313_v30 }
 0x4dc   : > { %v4976_v28 = vadd.f32 %v7315_v51, %v4947_v47 }
 0x4e1   : > { %v5016_v26 = vpop.f32.mrf.mxu2  ;;  %v5045_v40 = vpop.f32.mrf.mxu3 }
 0x4e2   : > { %v5017_v27 = vadd.f32 %v5016_v26, %v4988_v29  ;;  %v5005_v29 = vadd.f32 %v5004_v63, %v4976_v28 }
 0x4e4   : > { %v5046_v8 = vadd.f32 %v5045_v40, %v5017_v27 }
 0x4e6   : > { %v5065_v52 = vmax.f32 %v5046_v8, 0.0 }
 0x4e8   : > { %5074 = vst.msk [vmem:[%s7322_s23] sm:$0xff] %vm5073_vm9, %v5065_v52 }
 0x4e9   : > { %v5018_v31 = vpop.f32.mrf.mxu2  ;;  %v5047_v33 = vpop.f32.mrf.mxu3 }
 0x4ea   : > { %v5019_v38 = vadd.f32 %v5018_v31, %v4990_v20 }
 0x4ec   : > { %v5048_v0 = vadd.f32 %v5047_v33, %v5019_v38 }
 0x4ee   : > { %v5066_v9 = vmax.f32 %v5048_v0, 0.0 }
 0x4f0   : > { %5075 = vst.msk [vmem:[%s7322_s23 + $0x8] sm:$0xff] %vm5073_vm9, %v5066_v9 }
 0x4f1   : > { %v5021_v6 = vpop.f32.mrf.mxu2  ;;  %v5050_v15 = vpop.f32.mrf.mxu3 }
 0x4f2   : > { %v5022_v4 = vadd.f32 %v5021_v6, %v4993_v34 }
 0x4f4   : > { %v5051_v55 = vadd.f32 %v5050_v15, %v5022_v4 }
 0x4f6   : > { %v5067_v61 = vmax.f32 %v5051_v55, 0.0 }
 0x4f8   : > { %5076 = vst.msk [vmem:[%s7322_s23 + $0x10] sm:$0xff] %vm5073_vm9, %v5067_v61 }
 0x4f9   : > { %v5023_v59 = vpop.f32.mrf.mxu2  ;;  %v5052_v41 = vpop.f32.mrf.mxu3 }
 0x4fa   : > { %v5024_v25 = vadd.f32 %v5023_v59, %v4995_v35 }
 0x4fc   : > { %v5053_v62 = vadd.f32 %v5052_v41, %v5024_v25 }
 0x4fe   : > { %v5068_v50 = vmax.f32 %v5053_v62, 0.0 }
 0x500   : > { %5077 = vst.msk [vmem:[%s7322_s23 + $0x18] sm:$0xff] %vm5073_vm9, %v5068_v50 }
 0x501   : > { %v5026_v21 = vpop.f32.mrf.mxu2  ;;  %v5055_v45 = vpop.f32.mrf.mxu3 }
 0x502   : > { %v5027_v54 = vadd.f32 %v5026_v21, %v4998_v44 }
 0x504   : > { %v5056_v46 = vadd.f32 %v5055_v45, %v5027_v54 }
 0x506   : > { %v5069_v53 = vmax.f32 %v5056_v46, 0.0 }
 0x508   : > { %5078 = vst.msk [vmem:[%s7322_s23 + $0x20] sm:$0xff] %vm5073_vm9, %v5069_v53 }
 0x509   : > { %v5028_v18 = vpop.f32.mrf.mxu2  ;;  %v5057_v22 = vpop.f32.mrf.mxu3 }
 0x50a   : > { %v5029_v7 = vadd.f32 %v5028_v18, %v5000_v1 }
 0x50c   : > { %v5058_v2 = vadd.f32 %v5057_v22, %v5029_v7 }
 0x50e   : > { %v5070_v17 = vmax.f32 %v5058_v2, 0.0 }
 0x510   : > { %5079 = vst.msk [vmem:[%s7322_s23 + $0x28] sm:$0xff] %vm5073_vm9, %v5070_v17 }
 0x511   : > { %v5031_v23 = vpop.f32.mrf.mxu2  ;;  %v5060_v36 = vpop.f32.mrf.mxu3 }
 0x512   : > { %v5032_v19 = vadd.f32 %v5031_v23, %v5003_v3 }
 0x514   : > { %v5061_v42 = vadd.f32 %v5060_v36, %v5032_v19 }
 0x516   : > { %v5071_v43 = vmax.f32 %v5061_v42, 0.0 }
 0x518   : > { %5080 = vst.msk [vmem:[%s7322_s23 + $0x30] sm:$0xff] %vm5073_vm9, %v5071_v43 }
 0x519   : > { %v5033_v32 = vpop.f32.mrf.mxu2  ;;  %v5062_v26 = vpop.f32.mrf.mxu3 }
 0x51a   : > { %v5034_v30 = vadd.f32 %v5033_v32, %v5005_v29 }
 0x51c   : > { %v5063_v51 = vadd.f32 %v5062_v26, %v5034_v30 }
 0x51e   : > { %v5072_v40 = vmax.f32 %v5063_v51, 0.0 }
 0x520   : > { %5081 = vst.msk [vmem:[%s7322_s23 + $0x38] sm:$0xff] %vm5073_vm9, %v5072_v40 }
 0x521   : > { %5700 = shalt.err (!%p5697_p3)
}
 0x522   : > { %s5741_s21 = smov 128   ;;  %s5742_s23 = smov 8  }
 0x523   : > { %5624 = dma.vmem_to_hbm [thread:$0]  (%p5821_p5), %s5097_s14, 1024, %s5099_s15, %s5083_s28, %s5741_s21, %s5741_s21, %s5742_s23  }
 0x524 PF: > { %p5630_p4 = scmp.ge.s32.totalorder %s5735_s27, 2  ;;  %s5113_s8 = sand.u32 1, %s5723_s24  }
 0x525   : > { %s5114_s9 = scalar_lea.sflag [#allocation5], %s5113_s8 }
 0x526   : > { %p5627_p7 = pnand %p5630_p4, %p5825_p6 }
 0x528   : > { %p5628_p8 = pneg %p5627_p7 }
 0x52a   : > { %5718 = dma.done.wait (%p5628_p8), %s5114_s9, 1024  }
 0x52b   : > { %5720 = vsyncadd (%p5628_p8), %s5114_s9, 4294966272  ;;  %p17_p9 = scmp.ge.s32.totalorder %s5808_s30, 4   ;;  %s7408_s24 = smov %s5727_s25 }
 0x52c   : > { %s7409_s25 = smov %s5731_s26  ;;  %s7410_s26 = smov %s5819_s10 }
 0x52d   : > { %s7411_s27 = smov %s5808_s30  ;;  %19 = sbr.rel (!%p17_p9) target bundleno = 3 (0x3), region = 117 }
 0x532   :  { %5120 = vsyncpa [#allocation5], 1 }
 0x533   :  { %5122 = vsyncpa [#allocation5 + $0x1], 1 }

</bundles_post_ra>
